<compile_context>
chip_gen: v7x
topology: tpu7x:2x2x1
jax: 0.10.0
libtpu: 0.0.40
codegen_flags: <defaults>
</compile_context>

<pallas_src>
import math
import functools

import jax
import jax.numpy as jnp
from jax.experimental import pallas as pl
from jax.experimental.pallas import tpu as pltpu


# ----------------------------------------------------------------------------
# In-kernel helpers
# ----------------------------------------------------------------------------
def _mlp(x, w1_ref, b1_ref, w2_ref, b2_ref):
    """PyG MLP(num_layers=2, norm=None):  relu(x @ W1 + b1) @ W2 + b2."""
    f32 = jnp.float32
    h = jnp.dot(x, w1_ref[...], preferred_element_type=f32) + b1_ref[...]
    h = jnp.maximum(h, 0.0)
    return jnp.dot(h, w2_ref[...], preferred_element_type=f32) + b2_ref[...]


# ----------------------------------------------------------------------------
# Fully fused UniMP forward kernel
# ----------------------------------------------------------------------------
def unimp_fused_kernel(
    # raw hetero inputs
    xa_ref, xb_ref, ea_to_ref, ea_rev_ref,
    # graph structure / indicator matrices
    ssrc_ref, sdst_ref, sdstT_ref, sdst_rep_ref,
    hsel_ref, rep_heads_ref, colsel_ref, h2f_ref, bm_ref, bmT_ref,
    # node-type MLPs
    na_w1, na_b1, na_w2, na_b2,
    nb_w1, nb_b1, nb_w2, nb_b2,
    # edge-relation MLPs
    eto_w1, eto_b1, eto_w2, eto_b2,
    erev_w1, erev_b1, erev_w2, erev_b2,
    # stacked (num_layers leading axis) TransformerConv + BatchNorm params
    wqkvs_ref, bqkvs_ref, we2_ref, wb_o_ref, wb_r_ref, gamma_ref, betabn_ref,
    # pooling head
    pin_w1, pin_b1, pin_w2, pin_b2, pool_w_ref,
    out_w1, out_b1, out_w2, out_b2,
    # output
    o_ref,
    # VMEM scratch (homogeneous node / edge feature stores)
    x_sc, e_sc,
    *, hidden, min_score, tol,
):
    f32 = jnp.float32
    bf16 = jnp.bfloat16
    H = hidden

    na = xa_ref.shape[0]
    ea_cnt = ea_to_ref.shape[0]
    num_layers = wqkvs_ref.shape[0]

    # ---- 1) node_lins / edge_lins + to_homogeneous concat ------------------
    # (kept as a VMEM-scratch staging write: unaligned-row masked stores are a
    #  known-safe lowering; the reload cost is ~3 KiB at these sizes)
    x_sc[0:na, :] = _mlp(xa_ref[...], na_w1, na_b1, na_w2, na_b2)
    x_sc[na:, :] = _mlp(xb_ref[...], nb_w1, nb_b1, nb_w2, nb_b2)
    e_sc[0:ea_cnt, :] = _mlp(ea_to_ref[...], eto_w1, eto_b1, eto_w2, eto_b2)
    e_sc[ea_cnt:, :] = _mlp(ea_rev_ref[...], erev_w1, erev_b1, erev_w2, erev_b2)

    x = x_sc[...]                 # (N, H) f32
    edge_attr = e_sc[...]         # (E, H) f32

    # ---- hoisted loop-invariant structure reads / masks --------------------
    ssrc = ssrc_ref[...]          # (E, N)        bf16  one-hot of edge source
    sdst = sdst_ref[...]          # (E, N)        bf16  one-hot of edge destination
    sdst_t = sdstT_ref[...]       # (N, E)        bf16
    hsel = hsel_ref[...]          # (H, heads)    bf16  feature -> head sum selector
    rep_h = rep_heads_ref[...]    # (heads, N*heads) bf16  replicate per-head logits
    colsel = colsel_ref[...]      # (N*heads, heads) bf16  packed column -> head
    h2f = h2f_ref[...]            # (heads, H)    bf16  head -> feature-lane broadcast
    rep01 = sdst_rep_ref[...].astype(f32)         # (E, N*heads) 0/1
    neg_mask = (rep01 - 1.0) * 1e30               # 0 where dst matches, -1e30 else

    # ---- 2) TransformerConv(beta=True, edge_dim=H) + BatchNorm1d layers ----
    for l in range(num_layers):
        # single lane-dense projection: [q*inv_sqrt | k | v | skip]  (N, 4H)
        proj = jnp.dot(x, wqkvs_ref[l], preferred_element_type=f32) + bqkvs_ref[l]
        # widened edge projection [e | e] so one gather serves k and v  (E, 2H)
        e2 = jnp.dot(edge_attr, we2_ref[l], preferred_element_type=f32)

        # per-edge gathers as one-hot matmuls (bf16 operands, f32 accumulate)
        q_i = jnp.dot(sdst, proj[:, 0:H].astype(bf16),
                      preferred_element_type=f32)                      # (E, H)
        kv_j = jnp.dot(ssrc, proj[:, H:3 * H].astype(bf16),
                       preferred_element_type=f32) + e2                # (E, 2H)
        k_j = kv_j[:, 0:H]
        v_j = kv_j[:, H:2 * H]
        x_r = proj[:, 3 * H:4 * H]                                     # (N, H)

        # attention logits per head (scale already folded into wq/bq)
        a_small = jnp.dot((q_i * k_j).astype(bf16), hsel,
                          preferred_element_type=f32)                  # (E, heads)

        # per-destination segment max: the ONLY pass over (E, N*heads)
        a_rep = jnp.dot(a_small.astype(bf16), rep_h,
                        preferred_element_type=f32)                    # (E, N*heads)
        node_max = jnp.max(a_rep + neg_mask, axis=0, keepdims=True)    # (1, N*heads)
        max_e = jnp.dot((rep01 * node_max).astype(bf16), colsel,
                        preferred_element_type=f32)                    # (E, heads)

        # exp / sum / normalize in small (E, heads) / (N, heads) space
        p = jnp.exp(a_small - max_e)                                   # (E, heads)
        node_sum = jnp.dot(sdst_t, p.astype(bf16),
                           preferred_element_type=f32)                 # (N, heads)
        inv_e = jnp.dot(sdst,
                        pl.reciprocal(node_sum + 1e-16, approx=True).astype(bf16),
                        preferred_element_type=f32)                    # (E, heads)
        alpha = jnp.dot((p * inv_e).astype(bf16), h2f,
                        preferred_element_type=f32)                    # (E, H)

        # weighted messages, scatter-sum to destinations (MXU)
        out = jnp.dot(sdst_t, (v_j * alpha).astype(bf16),
                      preferred_element_type=f32)                      # (N, H)

        # beta gating, folded to two matmuls: sigmoid(out @ wb_o' + x_r @ wb_r')
        beta = jax.nn.sigmoid(
            jnp.dot(out, wb_o_ref[l], preferred_element_type=f32)
            + jnp.dot(x_r, wb_r_ref[l], preferred_element_type=f32))   # (N, 1)
        out = beta * x_r + (1.0 - beta) * out

        # BatchNorm1d (training-mode batch stats), one-pass E[x^2] - mean^2
        mean = jnp.mean(out, axis=0, keepdims=True)
        var = jnp.mean(out * out, axis=0, keepdims=True) - mean * mean
        scale = gamma_ref[l] * jax.lax.rsqrt(var + 1e-5)
        x = out * scale + (betabn_ref[l] - mean * scale)

    # ---- 3) pool_in_lin -----------------------------------------------------
    x = _mlp(x, pin_w1, pin_b1, pin_w2, pin_b2)

    # ---- 4) TopKPooling(min_score) + global_mean_pool (keep-mask form) ------
    bm = bm_ref[...]              # (N, G) f32 one-hot batch assignment
    bm_t = bmT_ref[...]           # (G, N) bf16
    raw = jnp.dot(x, pool_w_ref[...], preferred_element_type=f32)      # (N, 1)
    masked_s = jnp.where(bm > 0.5, raw, -1e30)                         # (N, G)
    g_max = jnp.max(masked_s, axis=0, keepdims=True)                   # (1, G)
    ex = jnp.exp(masked_s - g_max) * bm
    g_sum = jnp.sum(ex, axis=0, keepdims=True)                         # (1, G)
    score = ex * pl.reciprocal(g_sum + 1e-16, approx=True)             # (N, G)

    sg_max = jnp.max(score, axis=0, keepdims=True)                     # (1, G)
    thresh = jnp.minimum(sg_max - tol, min_score)                      # (1, G)
    keep = jnp.where(score > thresh, 1.0, 0.0) * bm                    # (N, G)
    scale_n = jnp.sum(score * keep, axis=1, keepdims=True)             # (N, 1)
    keep_n = jnp.sum(keep, axis=1, keepdims=True)                      # (N, 1)

    pooled = jnp.dot(bm_t, (x * scale_n).astype(bf16),
                     preferred_element_type=f32)                       # (G, H)
    counts = jnp.dot(bm_t, keep_n.astype(bf16),
                     preferred_element_type=f32)                       # (G, 1)
    emb = pooled * pl.reciprocal(counts, approx=True)                  # >=1 kept/graph

    # ---- 5) out_lin -> the only HBM write of the whole forward pass ---------
    o_ref[...] = _mlp(emb, out_w1, out_b1, out_w2, out_b2)

    # TODO(synk): the optional `score=True` branch (sorted scores + data.src[perm])
    # is not implemented since it returns dynamically-sized index sets.


# ----------------------------------------------------------------------------
# Host-side wrapper
# ----------------------------------------------------------------------------
def unimp_forward(args, *, n_nodes, n_edges, hidden, n_graphs, out_channels,
                  min_score=1e-3, tol=1e-7):
    kernel = functools.partial(unimp_fused_kernel, hidden=hidden,
                               min_score=min_score, tol=tol)
    return pl.pallas_call(
        kernel,
        in_specs=[pl.BlockSpec(memory_space=pltpu.MemorySpace.VMEM)] * len(args),
        out_specs=pl.BlockSpec(memory_space=pltpu.MemorySpace.VMEM),
        out_shape=jax.ShapeDtypeStruct((n_graphs, out_channels), jnp.float32),
        scratch_shapes=[pltpu.VMEM((n_nodes, hidden), jnp.float32),
                        pltpu.VMEM((n_edges, hidden), jnp.float32)],
        compiler_params=pltpu.CompilerParams(vmem_limit_bytes=32 * 1024 * 1024),
    )(*args)


# ----------------------------------------------------------------------------
# Deterministic parameter construction
# ----------------------------------------------------------------------------
def linear_params(k, fin, fout, bias=True):
    k1, k2 = jax.random.split(k)
    bound = 1.0 / math.sqrt(fin)
    w = jax.random.uniform(k1, (fin, fout), jnp.float32, -bound, bound)
    b = jax.random.uniform(k2, (1, fout), jnp.float32, -bound, bound) if bias else None
    return w, b


def mlp_params(k, fin, fh, fout):
    k1, k2 = jax.random.split(k)
    w1, b1 = linear_params(k1, fin, fh)
    w2, b2 = linear_params(k2, fh, fout)
    return (w1, b1, w2, b2)


# ----------------------------------------------------------------------------
# Main: synthetic hetero graph + full UniMP forward pass
# ----------------------------------------------------------------------------
if __name__ == "__main__":
    hidden = 32
    out_channels = 8
    num_layers = 2
    heads = 4
    head_dim = hidden // heads
    inv_sqrt = 1.0 / math.sqrt(head_dim)

    Na, Nb = 10, 14          # nodes per type
    Fa, Fb = 12, 6           # raw feature dims per node type
    Ea, Eb = 20, 16          # edges per relation
    Fea, Feb = 8, 6          # raw edge_attr dims per relation
    G = 2                    # graphs in the batch

    key = jax.random.PRNGKey(0)
    ki = iter(jax.random.split(key, 64))

    # raw hetero inputs
    x_a = jax.random.normal(next(ki), (Na, Fa), jnp.float32)
    x_b = jax.random.normal(next(ki), (Nb, Fb), jnp.float32)
    ea_to = jax.random.normal(next(ki), (Ea, Fea), jnp.float32)
    ea_rev = jax.random.normal(next(ki), (Eb, Feb), jnp.float32)
    src_to = jax.random.randint(next(ki), (Ea,), 0, Na)      # ('a','to','b')
    dst_to = jax.random.randint(next(ki), (Ea,), 0, Nb)
    src_rev = jax.random.randint(next(ki), (Eb,), 0, Nb)     # ('b','rev','a')
    dst_rev = jax.random.randint(next(ki), (Eb,), 0, Na)
    batch_a = jnp.array([0] * 6 + [1] * 4, jnp.int32)
    batch_b = jnp.array([0] * 8 + [1] * 6, jnp.int32)

    # parameters
    node_lin = {"a": mlp_params(next(ki), Fa, hidden, hidden),
                "b": mlp_params(next(ki), Fb, hidden, hidden)}
    edge_lin = {"to": mlp_params(next(ki), Fea, hidden, hidden),
                "rev": mlp_params(next(ki), Feb, hidden, hidden)}

    wqkvs_l, bqkvs_l, we2_l = [], [], []
    wbo_l, wbr_l, gamma_l, betabn_l = [], [], [], []
    for _ in range(num_layers):
        wq, bq = linear_params(next(ki), hidden, hidden)
        wk, bk = linear_params(next(ki), hidden, hidden)
        wv, bv = linear_params(next(ki), hidden, hidden)
        we, _ = linear_params(next(ki), hidden, hidden, bias=False)
        wskip, bskip = linear_params(next(ki), hidden, hidden)
        wbeta, _ = linear_params(next(ki), 3 * hidden, 1, bias=False)
        # fold 1/sqrt(head_dim) into q; concat [q|k|v|skip] into one 128-lane matmul
        wqkvs_l.append(jnp.concatenate([wq * inv_sqrt, wk, wv, wskip], axis=1))
        bqkvs_l.append(jnp.concatenate([bq * inv_sqrt, bk, bv, bskip], axis=1))
        # widened edge projection [we | we] so one ssrc gather serves k and v
        we2_l.append(jnp.concatenate([we, we], axis=1))
        # fold [out, x_r, out - x_r] @ W_beta into two matmuls (host-side, exact)
        wbo_l.append(wbeta[:hidden] + wbeta[2 * hidden:])
        wbr_l.append(wbeta[hidden:2 * hidden] - wbeta[2 * hidden:])
        gamma_l.append(jnp.ones((1, hidden), jnp.float32))     # BatchNorm weight
        betabn_l.append(jnp.zeros((1, hidden), jnp.float32))   # BatchNorm bias
    conv_stacked = tuple(jnp.stack(t, axis=0) for t in
                         (wqkvs_l, bqkvs_l, we2_l, wbo_l, wbr_l, gamma_l, betabn_l))

    pool_in = mlp_params(next(ki), hidden, hidden, hidden)
    pool_w, _ = linear_params(next(ki), hidden, 1, bias=False)   # TopKPooling weight
    out_lin = mlp_params(next(ki), hidden, hidden, out_channels)

    # ---- to_homogeneous structure + indicator matrices (host glue) ----------
    N = Na + Nb
    E = Ea + Eb
    src_hom = jnp.concatenate([src_to, src_rev + Na])
    dst_hom = jnp.concatenate([dst_to + Na, dst_rev])
    batch_hom = jnp.concatenate([batch_a, batch_b])

    s_src = jax.nn.one_hot(src_hom, N, dtype=jnp.float32)        # (E, N)
    s_dst = jax.nn.one_hot(dst_hom, N, dtype=jnp.float32)        # (E, N)
    bm = jax.nn.one_hot(batch_hom, G, dtype=jnp.float32)         # (N, G)

    frows = jnp.arange(hidden)
    hcols = jnp.arange(heads)
    pcols = jnp.arange(N * heads)                                # packed: n*heads + h
    # feature -> head sum selector (H, heads)
    hsel = (frows[:, None] // head_dim == hcols[None, :]).astype(jnp.bfloat16)
    # head -> feature-lane broadcast (heads, H)
    h2f = (hcols[:, None] == frows[None, :] // head_dim).astype(jnp.bfloat16)
    # replicate per-head logits into packed columns (heads, N*heads)
    rep_heads = (hcols[:, None] == pcols[None, :] % heads).astype(jnp.bfloat16)
    # compress packed columns back to heads (N*heads, heads)
    colsel = (pcols[:, None] % heads == hcols[None, :]).astype(jnp.bfloat16)
    # destination one-hot repeated per head (E, N*heads), bf16 residency
    s_dst_rep = jnp.repeat(s_dst, heads, axis=1).astype(jnp.bfloat16)

    args = (
        x_a, x_b, ea_to, ea_rev,
        s_src.astype(jnp.bfloat16), s_dst.astype(jnp.bfloat16),
        s_dst.T.astype(jnp.bfloat16), s_dst_rep,
        hsel, rep_heads, colsel, h2f, bm, bm.T.astype(jnp.bfloat16),
        *node_lin["a"], *node_lin["b"], *edge_lin["to"], *edge_lin["rev"],
        *conv_stacked,
        *pool_in, pool_w,
        *out_lin,
    )

    emb = unimp_forward(args, n_nodes=N, n_edges=E, hidden=hidden, n_graphs=G,
                        out_channels=out_channels, min_score=0.001, tol=1e-7)
    emb = jax.block_until_ready(emb)

    assert emb.shape == (G, out_channels)
    assert bool(jnp.all(jnp.isfinite(emb)))
    print("KERNEL_OK")
</pallas_src>

<mosaic_0001>
module attributes {stable_mosaic.version = 11 : i64} {
  func.func @unimp_fused_kernel(%arg0: memref<10x12xf32, #tpu.memory_space<vmem>>, %arg1: memref<14x6xf32, #tpu.memory_space<vmem>>, %arg2: memref<20x8xf32, #tpu.memory_space<vmem>>, %arg3: memref<16x6xf32, #tpu.memory_space<vmem>>, %arg4: memref<36x24xbf16, #tpu.memory_space<vmem>>, %arg5: memref<36x24xbf16, #tpu.memory_space<vmem>>, %arg6: memref<24x36xbf16, #tpu.memory_space<vmem>>, %arg7: memref<36x96xbf16, #tpu.memory_space<vmem>>, %arg8: memref<32x4xbf16, #tpu.memory_space<vmem>>, %arg9: memref<4x96xbf16, #tpu.memory_space<vmem>>, %arg10: memref<96x4xbf16, #tpu.memory_space<vmem>>, %arg11: memref<4x32xbf16, #tpu.memory_space<vmem>>, %arg12: memref<24x2xf32, #tpu.memory_space<vmem>>, %arg13: memref<2x24xbf16, #tpu.memory_space<vmem>>, %arg14: memref<12x32xf32, #tpu.memory_space<vmem>>, %arg15: memref<1x32xf32, #tpu.memory_space<vmem>>, %arg16: memref<32x32xf32, #tpu.memory_space<vmem>>, %arg17: memref<1x32xf32, #tpu.memory_space<vmem>>, %arg18: memref<6x32xf32, #tpu.memory_space<vmem>>, %arg19: memref<1x32xf32, #tpu.memory_space<vmem>>, %arg20: memref<32x32xf32, #tpu.memory_space<vmem>>, %arg21: memref<1x32xf32, #tpu.memory_space<vmem>>, %arg22: memref<8x32xf32, #tpu.memory_space<vmem>>, %arg23: memref<1x32xf32, #tpu.memory_space<vmem>>, %arg24: memref<32x32xf32, #tpu.memory_space<vmem>>, %arg25: memref<1x32xf32, #tpu.memory_space<vmem>>, %arg26: memref<6x32xf32, #tpu.memory_space<vmem>>, %arg27: memref<1x32xf32, #tpu.memory_space<vmem>>, %arg28: memref<32x32xf32, #tpu.memory_space<vmem>>, %arg29: memref<1x32xf32, #tpu.memory_space<vmem>>, %arg30: memref<2x32x128xf32, #tpu.memory_space<vmem>>, %arg31: memref<2x1x128xf32, #tpu.memory_space<vmem>>, %arg32: memref<2x32x64xf32, #tpu.memory_space<vmem>>, %arg33: memref<2x32x1xf32, #tpu.memory_space<vmem>>, %arg34: memref<2x32x1xf32, #tpu.memory_space<vmem>>, %arg35: memref<2x1x32xf32, #tpu.memory_space<vmem>>, %arg36: memref<2x1x32xf32, #tpu.memory_space<vmem>>, %arg37: memref<32x32xf32, #tpu.memory_space<vmem>>, %arg38: memref<1x32xf32, #tpu.memory_space<vmem>>, %arg39: memref<32x32xf32, #tpu.memory_space<vmem>>, %arg40: memref<1x32xf32, #tpu.memory_space<vmem>>, %arg41: memref<32x1xf32, #tpu.memory_space<vmem>>, %arg42: memref<32x32xf32, #tpu.memory_space<vmem>>, %arg43: memref<1x32xf32, #tpu.memory_space<vmem>>, %arg44: memref<32x8xf32, #tpu.memory_space<vmem>>, %arg45: memref<1x8xf32, #tpu.memory_space<vmem>>, %arg46: memref<2x8xf32, #tpu.memory_space<vmem>>, %arg47: memref<24x32xf32, #tpu.memory_space<vmem>>, %arg48: memref<36x32xf32, #tpu.memory_space<vmem>>) attributes {dimension_semantics = [], scalar_prefetch = 0 : i64, scratch_operands = 2 : i64, tpu.core_type = #tpu.core_type<tc>} {
    %c0 = arith.constant 0 : index
    %c0_0 = arith.constant 0 : index
    %0 = vector.load %arg0[%c0, %c0_0] : memref<10x12xf32, #tpu.memory_space<vmem>>, vector<10x12xf32>
    %c0_1 = arith.constant 0 : index
    %c0_2 = arith.constant 0 : index
    %1 = vector.load %arg14[%c0_1, %c0_2] : memref<12x32xf32, #tpu.memory_space<vmem>>, vector<12x32xf32>
    %cst = arith.constant dense<0.000000e+00> : vector<10x32xf32>
    %2 = tpu.matmul %0, %1, %cst {dimension_numbers = #tpu.dot_dimension_numbers<[1], [0], [0], [1], [0, 0, 1, 1], [], []>} : vector<10x12xf32>, vector<12x32xf32>, vector<10x32xf32> -> vector<10x32xf32>
    %c0_3 = arith.constant 0 : index
    %c0_4 = arith.constant 0 : index
    %3 = vector.load %arg15[%c0_3, %c0_4] : memref<1x32xf32, #tpu.memory_space<vmem>>, vector<1x32xf32>
    %4 = vector.broadcast %3 : vector<1x32xf32> to vector<10x32xf32>
    %5 = arith.addf %2, %4 : vector<10x32xf32>
    %cst_5 = arith.constant 0.000000e+00 : f32
    %6 = vector.broadcast %cst_5 : f32 to vector<10x32xf32>
    %7 = arith.maximumf %5, %6 : vector<10x32xf32>
    %c0_6 = arith.constant 0 : index
    %c0_7 = arith.constant 0 : index
    %8 = vector.load %arg16[%c0_6, %c0_7] : memref<32x32xf32, #tpu.memory_space<vmem>>, vector<32x32xf32>
    %cst_8 = arith.constant dense<0.000000e+00> : vector<10x32xf32>
    %9 = tpu.matmul %7, %8, %cst_8 {dimension_numbers = #tpu.dot_dimension_numbers<[1], [0], [0], [1], [0, 0, 1, 1], [], []>} : vector<10x32xf32>, vector<32x32xf32>, vector<10x32xf32> -> vector<10x32xf32>
    %c0_9 = arith.constant 0 : index
    %c0_10 = arith.constant 0 : index
    %10 = vector.load %arg17[%c0_9, %c0_10] : memref<1x32xf32, #tpu.memory_space<vmem>>, vector<1x32xf32>
    %11 = vector.broadcast %10 : vector<1x32xf32> to vector<10x32xf32>
    %12 = arith.addf %9, %11 : vector<10x32xf32>
    %c0_11 = arith.constant 0 : index
    %c0_12 = arith.constant 0 : index
    %13 = vector.load %arg47[%c0_11, %c0_12] : memref<24x32xf32, #tpu.memory_space<vmem>>, vector<10x32xf32>
    tpu.vector_store %arg47[%c0_11, %c0_12], %12 {strides = array<i32>} : memref<24x32xf32, #tpu.memory_space<vmem>>, vector<10x32xf32>,
    %c0_13 = arith.constant 0 : index
    %c0_14 = arith.constant 0 : index
    %14 = vector.load %arg1[%c0_13, %c0_14] : memref<14x6xf32, #tpu.memory_space<vmem>>, vector<14x6xf32>
    %c0_15 = arith.constant 0 : index
    %c0_16 = arith.constant 0 : index
    %15 = vector.load %arg18[%c0_15, %c0_16] : memref<6x32xf32, #tpu.memory_space<vmem>>, vector<6x32xf32>
    %cst_17 = arith.constant dense<0.000000e+00> : vector<14x32xf32>
    %16 = tpu.matmul %14, %15, %cst_17 {dimension_numbers = #tpu.dot_dimension_numbers<[1], [0], [0], [1], [0, 0, 1, 1], [], []>} : vector<14x6xf32>, vector<6x32xf32>, vector<14x32xf32> -> vector<14x32xf32>
    %c0_18 = arith.constant 0 : index
    %c0_19 = arith.constant 0 : index
    %17 = vector.load %arg19[%c0_18, %c0_19] : memref<1x32xf32, #tpu.memory_space<vmem>>, vector<1x32xf32>
    %18 = vector.broadcast %17 : vector<1x32xf32> to vector<14x32xf32>
    %19 = arith.addf %16, %18 : vector<14x32xf32>
    %cst_20 = arith.constant 0.000000e+00 : f32
    %20 = vector.broadcast %cst_20 : f32 to vector<14x32xf32>
    %21 = arith.maximumf %19, %20 : vector<14x32xf32>
    %c0_21 = arith.constant 0 : index
    %c0_22 = arith.constant 0 : index
    %22 = vector.load %arg20[%c0_21, %c0_22] : memref<32x32xf32, #tpu.memory_space<vmem>>, vector<32x32xf32>
    %cst_23 = arith.constant dense<0.000000e+00> : vector<14x32xf32>
    %23 = tpu.matmul %21, %22, %cst_23 {dimension_numbers = #tpu.dot_dimension_numbers<[1], [0], [0], [1], [0, 0, 1, 1], [], []>} : vector<14x32xf32>, vector<32x32xf32>, vector<14x32xf32> -> vector<14x32xf32>
    %c0_24 = arith.constant 0 : index
    %c0_25 = arith.constant 0 : index
    %24 = vector.load %arg21[%c0_24, %c0_25] : memref<1x32xf32, #tpu.memory_space<vmem>>, vector<1x32xf32>
    %25 = vector.broadcast %24 : vector<1x32xf32> to vector<14x32xf32>
    %26 = arith.addf %23, %25 : vector<14x32xf32>
    %c10 = arith.constant 10 : index
    %c0_26 = arith.constant 0 : index
    %27 = vector.load %arg47[%c10, %c0_26] : memref<24x32xf32, #tpu.memory_space<vmem>>, vector<14x32xf32>
    tpu.vector_store %arg47[%c10, %c0_26], %26 {strides = array<i32>} : memref<24x32xf32, #tpu.memory_space<vmem>>, vector<14x32xf32>,
    %c0_27 = arith.constant 0 : index
    %c0_28 = arith.constant 0 : index
    %28 = vector.load %arg2[%c0_27, %c0_28] : memref<20x8xf32, #tpu.memory_space<vmem>>, vector<20x8xf32>
    %c0_29 = arith.constant 0 : index
    %c0_30 = arith.constant 0 : index
    %29 = vector.load %arg22[%c0_29, %c0_30] : memref<8x32xf32, #tpu.memory_space<vmem>>, vector<8x32xf32>
    %cst_31 = arith.constant dense<0.000000e+00> : vector<20x32xf32>
    %30 = tpu.matmul %28, %29, %cst_31 {dimension_numbers = #tpu.dot_dimension_numbers<[1], [0], [0], [1], [0, 0, 1, 1], [], []>} : vector<20x8xf32>, vector<8x32xf32>, vector<20x32xf32> -> vector<20x32xf32>
    %c0_32 = arith.constant 0 : index
    %c0_33 = arith.constant 0 : index
    %31 = vector.load %arg23[%c0_32, %c0_33] : memref<1x32xf32, #tpu.memory_space<vmem>>, vector<1x32xf32>
    %32 = vector.broadcast %31 : vector<1x32xf32> to vector<20x32xf32>
    %33 = arith.addf %30, %32 : vector<20x32xf32>
    %cst_34 = arith.constant 0.000000e+00 : f32
    %34 = vector.broadcast %cst_34 : f32 to vector<20x32xf32>
    %35 = arith.maximumf %33, %34 : vector<20x32xf32>
    %c0_35 = arith.constant 0 : index
    %c0_36 = arith.constant 0 : index
    %36 = vector.load %arg24[%c0_35, %c0_36] : memref<32x32xf32, #tpu.memory_space<vmem>>, vector<32x32xf32>
    %cst_37 = arith.constant dense<0.000000e+00> : vector<20x32xf32>
    %37 = tpu.matmul %35, %36, %cst_37 {dimension_numbers = #tpu.dot_dimension_numbers<[1], [0], [0], [1], [0, 0, 1, 1], [], []>} : vector<20x32xf32>, vector<32x32xf32>, vector<20x32xf32> -> vector<20x32xf32>
    %c0_38 = arith.constant 0 : index
    %c0_39 = arith.constant 0 : index
    %38 = vector.load %arg25[%c0_38, %c0_39] : memref<1x32xf32, #tpu.memory_space<vmem>>, vector<1x32xf32>
    %39 = vector.broadcast %38 : vector<1x32xf32> to vector<20x32xf32>
    %40 = arith.addf %37, %39 : vector<20x32xf32>
    %c0_40 = arith.constant 0 : index
    %c0_41 = arith.constant 0 : index
    %41 = vector.load %arg48[%c0_40, %c0_41] : memref<36x32xf32, #tpu.memory_space<vmem>>, vector<20x32xf32>
    tpu.vector_store %arg48[%c0_40, %c0_41], %40 {strides = array<i32>} : memref<36x32xf32, #tpu.memory_space<vmem>>, vector<20x32xf32>,
    %c0_42 = arith.constant 0 : index
    %c0_43 = arith.constant 0 : index
    %42 = vector.load %arg3[%c0_42, %c0_43] : memref<16x6xf32, #tpu.memory_space<vmem>>, vector<16x6xf32>
    %c0_44 = arith.constant 0 : index
    %c0_45 = arith.constant 0 : index
    %43 = vector.load %arg26[%c0_44, %c0_45] : memref<6x32xf32, #tpu.memory_space<vmem>>, vector<6x32xf32>
    %cst_46 = arith.constant dense<0.000000e+00> : vector<16x32xf32>
    %44 = tpu.matmul %42, %43, %cst_46 {dimension_numbers = #tpu.dot_dimension_numbers<[1], [0], [0], [1], [0, 0, 1, 1], [], []>} : vector<16x6xf32>, vector<6x32xf32>, vector<16x32xf32> -> vector<16x32xf32>
    %c0_47 = arith.constant 0 : index
    %c0_48 = arith.constant 0 : index
    %45 = vector.load %arg27[%c0_47, %c0_48] : memref<1x32xf32, #tpu.memory_space<vmem>>, vector<1x32xf32>
    %46 = vector.broadcast %45 : vector<1x32xf32> to vector<16x32xf32>
    %47 = arith.addf %44, %46 : vector<16x32xf32>
    %cst_49 = arith.constant 0.000000e+00 : f32
    %48 = vector.broadcast %cst_49 : f32 to vector<16x32xf32>
    %49 = arith.maximumf %47, %48 : vector<16x32xf32>
    %c0_50 = arith.constant 0 : index
    %c0_51 = arith.constant 0 : index
    %50 = vector.load %arg28[%c0_50, %c0_51] : memref<32x32xf32, #tpu.memory_space<vmem>>, vector<32x32xf32>
    %cst_52 = arith.constant dense<0.000000e+00> : vector<16x32xf32>
    %51 = tpu.matmul %49, %50, %cst_52 {dimension_numbers = #tpu.dot_dimension_numbers<[1], [0], [0], [1], [0, 0, 1, 1], [], []>} : vector<16x32xf32>, vector<32x32xf32>, vector<16x32xf32> -> vector<16x32xf32>
    %c0_53 = arith.constant 0 : index
    %c0_54 = arith.constant 0 : index
    %52 = vector.load %arg29[%c0_53, %c0_54] : memref<1x32xf32, #tpu.memory_space<vmem>>, vector<1x32xf32>
    %53 = vector.broadcast %52 : vector<1x32xf32> to vector<16x32xf32>
    %54 = arith.addf %51, %53 : vector<16x32xf32>
    %c20 = arith.constant 20 : index
    %c0_55 = arith.constant 0 : index
    %55 = vector.load %arg48[%c20, %c0_55] : memref<36x32xf32, #tpu.memory_space<vmem>>, vector<16x32xf32>
    tpu.vector_store %arg48[%c20, %c0_55], %54 {strides = array<i32>} : memref<36x32xf32, #tpu.memory_space<vmem>>, vector<16x32xf32>,
    %c0_56 = arith.constant 0 : index
    %c0_57 = arith.constant 0 : index
    %56 = vector.load %arg47[%c0_56, %c0_57] : memref<24x32xf32, #tpu.memory_space<vmem>>, vector<24x32xf32>
    %c0_58 = arith.constant 0 : index
    %c0_59 = arith.constant 0 : index
    %57 = vector.load %arg48[%c0_58, %c0_59] : memref<36x32xf32, #tpu.memory_space<vmem>>, vector<36x32xf32>
    %c0_60 = arith.constant 0 : index
    %c0_61 = arith.constant 0 : index
    %58 = vector.load %arg4[%c0_60, %c0_61] : memref<36x24xbf16, #tpu.memory_space<vmem>>, vector<36x24xbf16>
    %c0_62 = arith.constant 0 : index
    %c0_63 = arith.constant 0 : index
    %59 = vector.load %arg5[%c0_62, %c0_63] : memref<36x24xbf16, #tpu.memory_space<vmem>>, vector<36x24xbf16>
    %c0_64 = arith.constant 0 : index
    %c0_65 = arith.constant 0 : index
    %60 = vector.load %arg6[%c0_64, %c0_65] : memref<24x36xbf16, #tpu.memory_space<vmem>>, vector<24x36xbf16>
    %c0_66 = arith.constant 0 : index
    %c0_67 = arith.constant 0 : index
    %61 = vector.load %arg8[%c0_66, %c0_67] : memref<32x4xbf16, #tpu.memory_space<vmem>>, vector<32x4xbf16>
    %c0_68 = arith.constant 0 : index
    %c0_69 = arith.constant 0 : index
    %62 = vector.load %arg9[%c0_68, %c0_69] : memref<4x96xbf16, #tpu.memory_space<vmem>>, vector<4x96xbf16>
    %c0_70 = arith.constant 0 : index
    %c0_71 = arith.constant 0 : index
    %63 = vector.load %arg10[%c0_70, %c0_71] : memref<96x4xbf16, #tpu.memory_space<vmem>>, vector<96x4xbf16>
    %c0_72 = arith.constant 0 : index
    %c0_73 = arith.constant 0 : index
    %64 = vector.load %arg11[%c0_72, %c0_73] : memref<4x32xbf16, #tpu.memory_space<vmem>>, vector<4x32xbf16>
    %c0_74 = arith.constant 0 : index
    %c0_75 = arith.constant 0 : index
    %65 = vector.load %arg7[%c0_74, %c0_75] : memref<36x96xbf16, #tpu.memory_space<vmem>>, vector<36x96xbf16>
    %66 = arith.extf %65 : vector<36x96xbf16> to vector<36x96xf32>
    %cst_76 = arith.constant 1.000000e+00 : f32
    %67 = vector.broadcast %cst_76 : f32 to vector<36x96xf32>
    %68 = arith.subf %66, %67 : vector<36x96xf32>
    %cst_77 = arith.constant 1.000000e+30 : f32
    %69 = vector.broadcast %cst_77 : f32 to vector<36x96xf32>
    %70 = arith.mulf %68, %69 : vector<36x96xf32>
    %c0_78 = arith.constant 0 : index
    %c0_79 = arith.constant 0 : index
    %c0_80 = arith.constant 0 : index
    %71 = vector.load %arg30[%c0_78, %c0_79, %c0_80] : memref<2x32x128xf32, #tpu.memory_space<vmem>>, vector<1x32x128xf32>
    %72 = vector.shape_cast %71 : vector<1x32x128xf32> to vector<32x128xf32>
    %cst_81 = arith.constant dense<0.000000e+00> : vector<24x128xf32>
    %73 = tpu.matmul %56, %72, %cst_81 {dimension_numbers = #tpu.dot_dimension_numbers<[1], [0], [0], [1], [0, 0, 1, 1], [], []>} : vector<24x32xf32>, vector<32x128xf32>, vector<24x128xf32> -> vector<24x128xf32>
    %c0_82 = arith.constant 0 : index
    %c0_83 = arith.constant 0 : index
    %c0_84 = arith.constant 0 : index
    %74 = vector.load %arg31[%c0_82, %c0_83, %c0_84] : memref<2x1x128xf32, #tpu.memory_space<vmem>>, vector<1x1x128xf32>
    %75 = vector.shape_cast %74 : vector<1x1x128xf32> to vector<1x128xf32>
    %76 = vector.broadcast %75 : vector<1x128xf32> to vector<24x128xf32>
    %77 = arith.addf %73, %76 : vector<24x128xf32>
    %c0_85 = arith.constant 0 : index
    %c0_86 = arith.constant 0 : index
    %c0_87 = arith.constant 0 : index
    %78 = vector.load %arg32[%c0_85, %c0_86, %c0_87] : memref<2x32x64xf32, #tpu.memory_space<vmem>>, vector<1x32x64xf32>
    %79 = vector.shape_cast %78 : vector<1x32x64xf32> to vector<32x64xf32>
    %cst_88 = arith.constant dense<0.000000e+00> : vector<36x64xf32>
    %80 = tpu.matmul %57, %79, %cst_88 {dimension_numbers = #tpu.dot_dimension_numbers<[1], [0], [0], [1], [0, 0, 1, 1], [], []>} : vector<36x32xf32>, vector<32x64xf32>, vector<36x64xf32> -> vector<36x64xf32>
    %81 = vector.extract_strided_slice %77 {offsets = [0, 0], sizes = [24, 32], strides = [1, 1]} : vector<24x128xf32> to vector<24x32xf32>
    %82 = arith.truncf %81 : vector<24x32xf32> to vector<24x32xbf16>
    %cst_89 = arith.constant dense<0.000000e+00> : vector<36x32xf32>
    %83 = tpu.matmul %59, %82, %cst_89 {dimension_numbers = #tpu.dot_dimension_numbers<[1], [0], [0], [1], [0, 0, 1, 1], [], []>} : vector<36x24xbf16>, vector<24x32xbf16>, vector<36x32xf32> -> vector<36x32xf32>
    %84 = vector.extract_strided_slice %77 {offsets = [0, 32], sizes = [24, 64], strides = [1, 1]} : vector<24x128xf32> to vector<24x64xf32>
    %85 = arith.truncf %84 : vector<24x64xf32> to vector<24x64xbf16>
    %cst_90 = arith.constant dense<0.000000e+00> : vector<36x64xf32>
    %86 = tpu.matmul %58, %85, %cst_90 {dimension_numbers = #tpu.dot_dimension_numbers<[1], [0], [0], [1], [0, 0, 1, 1], [], []>} : vector<36x24xbf16>, vector<24x64xbf16>, vector<36x64xf32> -> vector<36x64xf32>
    %87 = arith.addf %86, %80 : vector<36x64xf32>
    %88 = vector.extract_strided_slice %87 {offsets = [0, 0], sizes = [36, 32], strides = [1, 1]} : vector<36x64xf32> to vector<36x32xf32>
    %89 = vector.extract_strided_slice %87 {offsets = [0, 32], sizes = [36, 32], strides = [1, 1]} : vector<36x64xf32> to vector<36x32xf32>
    %90 = vector.extract_strided_slice %77 {offsets = [0, 96], sizes = [24, 32], strides = [1, 1]} : vector<24x128xf32> to vector<24x32xf32>
    %91 = arith.mulf %83, %88 : vector<36x32xf32>
    %92 = arith.truncf %91 : vector<36x32xf32> to vector<36x32xbf16>
    %cst_91 = arith.constant dense<0.000000e+00> : vector<36x4xf32>
    %93 = tpu.matmul %92, %61, %cst_91 {dimension_numbers = #tpu.dot_dimension_numbers<[1], [0], [0], [1], [0, 0, 1, 1], [], []>} : vector<36x32xbf16>, vector<32x4xbf16>, vector<36x4xf32> -> vector<36x4xf32>
    %94 = arith.truncf %93 : vector<36x4xf32> to vector<36x4xbf16>
    %cst_92 = arith.constant dense<0.000000e+00> : vector<36x96xf32>
    %95 = tpu.matmul %94, %62, %cst_92 {dimension_numbers = #tpu.dot_dimension_numbers<[1], [0], [0], [1], [0, 0, 1, 1], [], []>} : vector<36x4xbf16>, vector<4x96xbf16>, vector<36x96xf32> -> vector<36x96xf32>
    %96 = arith.addf %95, %70 : vector<36x96xf32>
    %cst_93 = arith.constant dense<0xFF800000> : vector<96xf32>
    %97 = vector.multi_reduction <maximumf>, %96, %cst_93 [0] : vector<36x96xf32> to vector<96xf32>
    %98 = vector.shape_cast %97 : vector<96xf32> to vector<1x96xf32>
    %99 = vector.broadcast %98 : vector<1x96xf32> to vector<36x96xf32>
    %100 = arith.mulf %66, %99 : vector<36x96xf32>
    %101 = arith.truncf %100 : vector<36x96xf32> to vector<36x96xbf16>
    %cst_94 = arith.constant dense<0.000000e+00> : vector<36x4xf32>
    %102 = tpu.matmul %101, %63, %cst_94 {dimension_numbers = #tpu.dot_dimension_numbers<[1], [0], [0], [1], [0, 0, 1, 1], [], []>} : vector<36x96xbf16>, vector<96x4xbf16>, vector<36x4xf32> -> vector<36x4xf32>
    %103 = arith.subf %93, %102 : vector<36x4xf32>
    %104 = math.exp %103 : vector<36x4xf32>
    %105 = arith.truncf %104 : vector<36x4xf32> to vector<36x4xbf16>
    %cst_95 = arith.constant dense<0.000000e+00> : vector<24x4xf32>
    %106 = tpu.matmul %60, %105, %cst_95 {dimension_numbers = #tpu.dot_dimension_numbers<[1], [0], [0], [1], [0, 0, 1, 1], [], []>} : vector<24x36xbf16>, vector<36x4xbf16>, vector<24x4xf32> -> vector<24x4xf32>
    %cst_96 = arith.constant 1.000000e-16 : f32
    %107 = vector.broadcast %cst_96 : f32 to vector<24x4xf32>
    %108 = arith.addf %106, %107 : vector<24x4xf32>
    %109 = tpu.reciprocal %108 {approx = true} : vector<24x4xf32> -> vector<24x4xf32>
    %110 = arith.truncf %109 : vector<24x4xf32> to vector<24x4xbf16>
    %cst_97 = arith.constant dense<0.000000e+00> : vector<36x4xf32>
    %111 = tpu.matmul %59, %110, %cst_97 {dimension_numbers = #tpu.dot_dimension_numbers<[1], [0], [0], [1], [0, 0, 1, 1], [], []>} : vector<36x24xbf16>, vector<24x4xbf16>, vector<36x4xf32> -> vector<36x4xf32>
    %112 = arith.mulf %104, %111 : vector<36x4xf32>
    %113 = arith.truncf %112 : vector<36x4xf32> to vector<36x4xbf16>
    %cst_98 = arith.constant dense<0.000000e+00> : vector<36x32xf32>
    %114 = tpu.matmul %113, %64, %cst_98 {dimension_numbers = #tpu.dot_dimension_numbers<[1], [0], [0], [1], [0, 0, 1, 1], [], []>} : vector<36x4xbf16>, vector<4x32xbf16>, vector<36x32xf32> -> vector<36x32xf32>
    %115 = arith.mulf %89, %114 : vector<36x32xf32>
    %116 = arith.truncf %115 : vector<36x32xf32> to vector<36x32xbf16>
    %cst_99 = arith.constant dense<0.000000e+00> : vector<24x32xf32>
    %117 = tpu.matmul %60, %116, %cst_99 {dimension_numbers = #tpu.dot_dimension_numbers<[1], [0], [0], [1], [0, 0, 1, 1], [], []>} : vector<24x36xbf16>, vector<36x32xbf16>, vector<24x32xf32> -> vector<24x32xf32>
    %c0_100 = arith.constant 0 : index
    %c0_101 = arith.constant 0 : index
    %c0_102 = arith.constant 0 : index
    %118 = vector.load %arg33[%c0_100, %c0_101, %c0_102] : memref<2x32x1xf32, #tpu.memory_space<vmem>>, vector<1x32x1xf32>
    %119 = vector.shape_cast %118 : vector<1x32x1xf32> to vector<32x1xf32>
    %cst_103 = arith.constant dense<0.000000e+00> : vector<24x1xf32>
    %120 = tpu.matmul %117, %119, %cst_103 {dimension_numbers = #tpu.dot_dimension_numbers<[1], [0], [0], [1], [0, 0, 1, 1], [], []>} : vector<24x32xf32>, vector<32x1xf32>, vector<24x1xf32> -> vector<24x1xf32>
    %c0_104 = arith.constant 0 : index
    %c0_105 = arith.constant 0 : index
    %c0_106 = arith.constant 0 : index
    %121 = vector.load %arg34[%c0_104, %c0_105, %c0_106] : memref<2x32x1xf32, #tpu.memory_space<vmem>>, vector<1x32x1xf32>
    %122 = vector.shape_cast %121 : vector<1x32x1xf32> to vector<32x1xf32>
    %cst_107 = arith.constant dense<0.000000e+00> : vector<24x1xf32>
    %123 = tpu.matmul %90, %122, %cst_107 {dimension_numbers = #tpu.dot_dimension_numbers<[1], [0], [0], [1], [0, 0, 1, 1], [], []>} : vector<24x32xf32>, vector<32x1xf32>, vector<24x1xf32> -> vector<24x1xf32>
    %124 = arith.addf %120, %123 : vector<24x1xf32>
    %125 = arith.negf %124 : vector<24x1xf32>
    %126 = math.exp %125 : vector<24x1xf32>
    %cst_108 = arith.constant 1.000000e+00 : f32
    %127 = vector.broadcast %cst_108 : f32 to vector<24x1xf32>
    %128 = arith.addf %127, %126 : vector<24x1xf32>
    %129 = arith.divf %127, %128 : vector<24x1xf32>
    %130 = vector.broadcast %129 : vector<24x1xf32> to vector<24x32xf32>
    %131 = arith.mulf %130, %90 : vector<24x32xf32>
    %cst_109 = arith.constant 1.000000e+00 : f32
    %132 = vector.broadcast %cst_109 : f32 to vector<24x1xf32>
    %133 = arith.subf %132, %129 : vector<24x1xf32>
    %134 = vector.broadcast %133 : vector<24x1xf32> to vector<24x32xf32>
    %135 = arith.mulf %134, %117 : vector<24x32xf32>
    %136 = arith.addf %131, %135 : vector<24x32xf32>
    %cst_110 = arith.constant dense<0.000000e+00> : vector<32xf32>
    %137 = vector.multi_reduction <add>, %136, %cst_110 [0] : vector<24x32xf32> to vector<32xf32>
    %138 = vector.shape_cast %137 : vector<32xf32> to vector<1x32xf32>
    %cst_111 = arith.constant 2.400000e+01 : f32
    %139 = vector.broadcast %cst_111 : f32 to vector<1x32xf32>
    %140 = arith.divf %138, %139 : vector<1x32xf32>
    %141 = arith.mulf %136, %136 : vector<24x32xf32>
    %cst_112 = arith.constant dense<0.000000e+00> : vector<32xf32>
    %142 = vector.multi_reduction <add>, %141, %cst_112 [0] : vector<24x32xf32> to vector<32xf32>
    %143 = vector.shape_cast %142 : vector<32xf32> to vector<1x32xf32>
    %cst_113 = arith.constant 2.400000e+01 : f32
    %144 = vector.broadcast %cst_113 : f32 to vector<1x32xf32>
    %145 = arith.divf %143, %144 : vector<1x32xf32>
    %146 = arith.mulf %140, %140 : vector<1x32xf32>
    %147 = arith.subf %145, %146 : vector<1x32xf32>
    %c0_114 = arith.constant 0 : index
    %c0_115 = arith.constant 0 : index
    %c0_116 = arith.constant 0 : index
    %148 = vector.load %arg35[%c0_114, %c0_115, %c0_116] : memref<2x1x32xf32, #tpu.memory_space<vmem>>, vector<1x1x32xf32>
    %149 = vector.shape_cast %148 : vector<1x1x32xf32> to vector<1x32xf32>
    %cst_117 = arith.constant 9.99999974E-6 : f32
    %150 = vector.broadcast %cst_117 : f32 to vector<1x32xf32>
    %151 = arith.addf %147, %150 : vector<1x32xf32>
    %152 = math.rsqrt %151 : vector<1x32xf32>
    %153 = arith.mulf %149, %152 : vector<1x32xf32>
    %154 = vector.broadcast %153 : vector<1x32xf32> to vector<24x32xf32>
    %155 = arith.mulf %136, %154 : vector<24x32xf32>
    %c0_118 = arith.constant 0 : index
    %c0_119 = arith.constant 0 : index
    %c0_120 = arith.constant 0 : index
    %156 = vector.load %arg36[%c0_118, %c0_119, %c0_120] : memref<2x1x32xf32, #tpu.memory_space<vmem>>, vector<1x1x32xf32>
    %157 = vector.shape_cast %156 : vector<1x1x32xf32> to vector<1x32xf32>
    %158 = arith.mulf %140, %153 : vector<1x32xf32>
    %159 = arith.subf %157, %158 : vector<1x32xf32>
    %160 = vector.broadcast %159 : vector<1x32xf32> to vector<24x32xf32>
    %161 = arith.addf %155, %160 : vector<24x32xf32>
    %c1 = arith.constant 1 : index
    %c0_121 = arith.constant 0 : index
    %c0_122 = arith.constant 0 : index
    %162 = vector.load %arg30[%c1, %c0_121, %c0_122] : memref<2x32x128xf32, #tpu.memory_space<vmem>>, vector<1x32x128xf32>
    %163 = vector.shape_cast %162 : vector<1x32x128xf32> to vector<32x128xf32>
    %cst_123 = arith.constant dense<0.000000e+00> : vector<24x128xf32>
    %164 = tpu.matmul %161, %163, %cst_123 {dimension_numbers = #tpu.dot_dimension_numbers<[1], [0], [0], [1], [0, 0, 1, 1], [], []>} : vector<24x32xf32>, vector<32x128xf32>, vector<24x128xf32> -> vector<24x128xf32>
    %c1_124 = arith.constant 1 : index
    %c0_125 = arith.constant 0 : index
    %c0_126 = arith.constant 0 : index
    %165 = vector.load %arg31[%c1_124, %c0_125, %c0_126] : memref<2x1x128xf32, #tpu.memory_space<vmem>>, vector<1x1x128xf32>
    %166 = vector.shape_cast %165 : vector<1x1x128xf32> to vector<1x128xf32>
    %167 = vector.broadcast %166 : vector<1x128xf32> to vector<24x128xf32>
    %168 = arith.addf %164, %167 : vector<24x128xf32>
    %c1_127 = arith.constant 1 : index
    %c0_128 = arith.constant 0 : index
    %c0_129 = arith.constant 0 : index
    %169 = vector.load %arg32[%c1_127, %c0_128, %c0_129] : memref<2x32x64xf32, #tpu.memory_space<vmem>>, vector<1x32x64xf32>
    %170 = vector.shape_cast %169 : vector<1x32x64xf32> to vector<32x64xf32>
    %cst_130 = arith.constant dense<0.000000e+00> : vector<36x64xf32>
    %171 = tpu.matmul %57, %170, %cst_130 {dimension_numbers = #tpu.dot_dimension_numbers<[1], [0], [0], [1], [0, 0, 1, 1], [], []>} : vector<36x32xf32>, vector<32x64xf32>, vector<36x64xf32> -> vector<36x64xf32>
    %172 = vector.extract_strided_slice %168 {offsets = [0, 0], sizes = [24, 32], strides = [1, 1]} : vector<24x128xf32> to vector<24x32xf32>
    %173 = arith.truncf %172 : vector<24x32xf32> to vector<24x32xbf16>
    %cst_131 = arith.constant dense<0.000000e+00> : vector<36x32xf32>
    %174 = tpu.matmul %59, %173, %cst_131 {dimension_numbers = #tpu.dot_dimension_numbers<[1], [0], [0], [1], [0, 0, 1, 1], [], []>} : vector<36x24xbf16>, vector<24x32xbf16>, vector<36x32xf32> -> vector<36x32xf32>
    %175 = vector.extract_strided_slice %168 {offsets = [0, 32], sizes = [24, 64], strides = [1, 1]} : vector<24x128xf32> to vector<24x64xf32>
    %176 = arith.truncf %175 : vector<24x64xf32> to vector<24x64xbf16>
    %cst_132 = arith.constant dense<0.000000e+00> : vector<36x64xf32>
    %177 = tpu.matmul %58, %176, %cst_132 {dimension_numbers = #tpu.dot_dimension_numbers<[1], [0], [0], [1], [0, 0, 1, 1], [], []>} : vector<36x24xbf16>, vector<24x64xbf16>, vector<36x64xf32> -> vector<36x64xf32>
    %178 = arith.addf %177, %171 : vector<36x64xf32>
    %179 = vector.extract_strided_slice %178 {offsets = [0, 0], sizes = [36, 32], strides = [1, 1]} : vector<36x64xf32> to vector<36x32xf32>
    %180 = vector.extract_strided_slice %178 {offsets = [0, 32], sizes = [36, 32], strides = [1, 1]} : vector<36x64xf32> to vector<36x32xf32>
    %181 = vector.extract_strided_slice %168 {offsets = [0, 96], sizes = [24, 32], strides = [1, 1]} : vector<24x128xf32> to vector<24x32xf32>
    %182 = arith.mulf %174, %179 : vector<36x32xf32>
    %183 = arith.truncf %182 : vector<36x32xf32> to vector<36x32xbf16>
    %cst_133 = arith.constant dense<0.000000e+00> : vector<36x4xf32>
    %184 = tpu.matmul %183, %61, %cst_133 {dimension_numbers = #tpu.dot_dimension_numbers<[1], [0], [0], [1], [0, 0, 1, 1], [], []>} : vector<36x32xbf16>, vector<32x4xbf16>, vector<36x4xf32> -> vector<36x4xf32>
    %185 = arith.truncf %184 : vector<36x4xf32> to vector<36x4xbf16>
    %cst_134 = arith.constant dense<0.000000e+00> : vector<36x96xf32>
    %186 = tpu.matmul %185, %62, %cst_134 {dimension_numbers = #tpu.dot_dimension_numbers<[1], [0], [0], [1], [0, 0, 1, 1], [], []>} : vector<36x4xbf16>, vector<4x96xbf16>, vector<36x96xf32> -> vector<36x96xf32>
    %187 = arith.addf %186, %70 : vector<36x96xf32>
    %cst_135 = arith.constant dense<0xFF800000> : vector<96xf32>
    %188 = vector.multi_reduction <maximumf>, %187, %cst_135 [0] : vector<36x96xf32> to vector<96xf32>
    %189 = vector.shape_cast %188 : vector<96xf32> to vector<1x96xf32>
    %190 = vector.broadcast %189 : vector<1x96xf32> to vector<36x96xf32>
    %191 = arith.mulf %66, %190 : vector<36x96xf32>
    %192 = arith.truncf %191 : vector<36x96xf32> to vector<36x96xbf16>
    %cst_136 = arith.constant dense<0.000000e+00> : vector<36x4xf32>
    %193 = tpu.matmul %192, %63, %cst_136 {dimension_numbers = #tpu.dot_dimension_numbers<[1], [0], [0], [1], [0, 0, 1, 1], [], []>} : vector<36x96xbf16>, vector<96x4xbf16>, vector<36x4xf32> -> vector<36x4xf32>
    %194 = arith.subf %184, %193 : vector<36x4xf32>
    %195 = math.exp %194 : vector<36x4xf32>
    %196 = arith.truncf %195 : vector<36x4xf32> to vector<36x4xbf16>
    %cst_137 = arith.constant dense<0.000000e+00> : vector<24x4xf32>
    %197 = tpu.matmul %60, %196, %cst_137 {dimension_numbers = #tpu.dot_dimension_numbers<[1], [0], [0], [1], [0, 0, 1, 1], [], []>} : vector<24x36xbf16>, vector<36x4xbf16>, vector<24x4xf32> -> vector<24x4xf32>
    %cst_138 = arith.constant 1.000000e-16 : f32
    %198 = vector.broadcast %cst_138 : f32 to vector<24x4xf32>
    %199 = arith.addf %197, %198 : vector<24x4xf32>
    %200 = tpu.reciprocal %199 {approx = true} : vector<24x4xf32> -> vector<24x4xf32>
    %201 = arith.truncf %200 : vector<24x4xf32> to vector<24x4xbf16>
    %cst_139 = arith.constant dense<0.000000e+00> : vector<36x4xf32>
    %202 = tpu.matmul %59, %201, %cst_139 {dimension_numbers = #tpu.dot_dimension_numbers<[1], [0], [0], [1], [0, 0, 1, 1], [], []>} : vector<36x24xbf16>, vector<24x4xbf16>, vector<36x4xf32> -> vector<36x4xf32>
    %203 = arith.mulf %195, %202 : vector<36x4xf32>
    %204 = arith.truncf %203 : vector<36x4xf32> to vector<36x4xbf16>
    %cst_140 = arith.constant dense<0.000000e+00> : vector<36x32xf32>
    %205 = tpu.matmul %204, %64, %cst_140 {dimension_numbers = #tpu.dot_dimension_numbers<[1], [0], [0], [1], [0, 0, 1, 1], [], []>} : vector<36x4xbf16>, vector<4x32xbf16>, vector<36x32xf32> -> vector<36x32xf32>
    %206 = arith.mulf %180, %205 : vector<36x32xf32>
    %207 = arith.truncf %206 : vector<36x32xf32> to vector<36x32xbf16>
    %cst_141 = arith.constant dense<0.000000e+00> : vector<24x32xf32>
    %208 = tpu.matmul %60, %207, %cst_141 {dimension_numbers = #tpu.dot_dimension_numbers<[1], [0], [0], [1], [0, 0, 1, 1], [], []>} : vector<24x36xbf16>, vector<36x32xbf16>, vector<24x32xf32> -> vector<24x32xf32>
    %c1_142 = arith.constant 1 : index
    %c0_143 = arith.constant 0 : index
    %c0_144 = arith.constant 0 : index
    %209 = vector.load %arg33[%c1_142, %c0_143, %c0_144] : memref<2x32x1xf32, #tpu.memory_space<vmem>>, vector<1x32x1xf32>
    %210 = vector.shape_cast %209 : vector<1x32x1xf32> to vector<32x1xf32>
    %cst_145 = arith.constant dense<0.000000e+00> : vector<24x1xf32>
    %211 = tpu.matmul %208, %210, %cst_145 {dimension_numbers = #tpu.dot_dimension_numbers<[1], [0], [0], [1], [0, 0, 1, 1], [], []>} : vector<24x32xf32>, vector<32x1xf32>, vector<24x1xf32> -> vector<24x1xf32>
    %c1_146 = arith.constant 1 : index
    %c0_147 = arith.constant 0 : index
    %c0_148 = arith.constant 0 : index
    %212 = vector.load %arg34[%c1_146, %c0_147, %c0_148] : memref<2x32x1xf32, #tpu.memory_space<vmem>>, vector<1x32x1xf32>
    %213 = vector.shape_cast %212 : vector<1x32x1xf32> to vector<32x1xf32>
    %cst_149 = arith.constant dense<0.000000e+00> : vector<24x1xf32>
    %214 = tpu.matmul %181, %213, %cst_149 {dimension_numbers = #tpu.dot_dimension_numbers<[1], [0], [0], [1], [0, 0, 1, 1], [], []>} : vector<24x32xf32>, vector<32x1xf32>, vector<24x1xf32> -> vector<24x1xf32>
    %215 = arith.addf %211, %214 : vector<24x1xf32>
    %216 = arith.negf %215 : vector<24x1xf32>
    %217 = math.exp %216 : vector<24x1xf32>
    %cst_150 = arith.constant 1.000000e+00 : f32
    %218 = vector.broadcast %cst_150 : f32 to vector<24x1xf32>
    %219 = arith.addf %218, %217 : vector<24x1xf32>
    %220 = arith.divf %218, %219 : vector<24x1xf32>
    %221 = vector.broadcast %220 : vector<24x1xf32> to vector<24x32xf32>
    %222 = arith.mulf %221, %181 : vector<24x32xf32>
    %cst_151 = arith.constant 1.000000e+00 : f32
    %223 = vector.broadcast %cst_151 : f32 to vector<24x1xf32>
    %224 = arith.subf %223, %220 : vector<24x1xf32>
    %225 = vector.broadcast %224 : vector<24x1xf32> to vector<24x32xf32>
    %226 = arith.mulf %225, %208 : vector<24x32xf32>
    %227 = arith.addf %222, %226 : vector<24x32xf32>
    %cst_152 = arith.constant dense<0.000000e+00> : vector<32xf32>
    %228 = vector.multi_reduction <add>, %227, %cst_152 [0] : vector<24x32xf32> to vector<32xf32>
    %229 = vector.shape_cast %228 : vector<32xf32> to vector<1x32xf32>
    %cst_153 = arith.constant 2.400000e+01 : f32
    %230 = vector.broadcast %cst_153 : f32 to vector<1x32xf32>
    %231 = arith.divf %229, %230 : vector<1x32xf32>
    %232 = arith.mulf %227, %227 : vector<24x32xf32>
    %cst_154 = arith.constant dense<0.000000e+00> : vector<32xf32>
    %233 = vector.multi_reduction <add>, %232, %cst_154 [0] : vector<24x32xf32> to vector<32xf32>
    %234 = vector.shape_cast %233 : vector<32xf32> to vector<1x32xf32>
    %cst_155 = arith.constant 2.400000e+01 : f32
    %235 = vector.broadcast %cst_155 : f32 to vector<1x32xf32>
    %236 = arith.divf %234, %235 : vector<1x32xf32>
    %237 = arith.mulf %231, %231 : vector<1x32xf32>
    %238 = arith.subf %236, %237 : vector<1x32xf32>
    %c1_156 = arith.constant 1 : index
    %c0_157 = arith.constant 0 : index
    %c0_158 = arith.constant 0 : index
    %239 = vector.load %arg35[%c1_156, %c0_157, %c0_158] : memref<2x1x32xf32, #tpu.memory_space<vmem>>, vector<1x1x32xf32>
    %240 = vector.shape_cast %239 : vector<1x1x32xf32> to vector<1x32xf32>
    %cst_159 = arith.constant 9.99999974E-6 : f32
    %241 = vector.broadcast %cst_159 : f32 to vector<1x32xf32>
    %242 = arith.addf %238, %241 : vector<1x32xf32>
    %243 = math.rsqrt %242 : vector<1x32xf32>
    %244 = arith.mulf %240, %243 : vector<1x32xf32>
    %245 = vector.broadcast %244 : vector<1x32xf32> to vector<24x32xf32>
    %246 = arith.mulf %227, %245 : vector<24x32xf32>
    %c1_160 = arith.constant 1 : index
    %c0_161 = arith.constant 0 : index
    %c0_162 = arith.constant 0 : index
    %247 = vector.load %arg36[%c1_160, %c0_161, %c0_162] : memref<2x1x32xf32, #tpu.memory_space<vmem>>, vector<1x1x32xf32>
    %248 = vector.shape_cast %247 : vector<1x1x32xf32> to vector<1x32xf32>
    %249 = arith.mulf %231, %244 : vector<1x32xf32>
    %250 = arith.subf %248, %249 : vector<1x32xf32>
    %251 = vector.broadcast %250 : vector<1x32xf32> to vector<24x32xf32>
    %252 = arith.addf %246, %251 : vector<24x32xf32>
    %c0_163 = arith.constant 0 : index
    %c0_164 = arith.constant 0 : index
    %253 = vector.load %arg37[%c0_163, %c0_164] : memref<32x32xf32, #tpu.memory_space<vmem>>, vector<32x32xf32>
    %cst_165 = arith.constant dense<0.000000e+00> : vector<24x32xf32>
    %254 = tpu.matmul %252, %253, %cst_165 {dimension_numbers = #tpu.dot_dimension_numbers<[1], [0], [0], [1], [0, 0, 1, 1], [], []>} : vector<24x32xf32>, vector<32x32xf32>, vector<24x32xf32> -> vector<24x32xf32>
    %c0_166 = arith.constant 0 : index
    %c0_167 = arith.constant 0 : index
    %255 = vector.load %arg38[%c0_166, %c0_167] : memref<1x32xf32, #tpu.memory_space<vmem>>, vector<1x32xf32>
    %256 = vector.broadcast %255 : vector<1x32xf32> to vector<24x32xf32>
    %257 = arith.addf %254, %256 : vector<24x32xf32>
    %cst_168 = arith.constant 0.000000e+00 : f32
    %258 = vector.broadcast %cst_168 : f32 to vector<24x32xf32>
    %259 = arith.maximumf %257, %258 : vector<24x32xf32>
    %c0_169 = arith.constant 0 : index
    %c0_170 = arith.constant 0 : index
    %260 = vector.load %arg39[%c0_169, %c0_170] : memref<32x32xf32, #tpu.memory_space<vmem>>, vector<32x32xf32>
    %cst_171 = arith.constant dense<0.000000e+00> : vector<24x32xf32>
    %261 = tpu.matmul %259, %260, %cst_171 {dimension_numbers = #tpu.dot_dimension_numbers<[1], [0], [0], [1], [0, 0, 1, 1], [], []>} : vector<24x32xf32>, vector<32x32xf32>, vector<24x32xf32> -> vector<24x32xf32>
    %c0_172 = arith.constant 0 : index
    %c0_173 = arith.constant 0 : index
    %262 = vector.load %arg40[%c0_172, %c0_173] : memref<1x32xf32, #tpu.memory_space<vmem>>, vector<1x32xf32>
    %263 = vector.broadcast %262 : vector<1x32xf32> to vector<24x32xf32>
    %264 = arith.addf %261, %263 : vector<24x32xf32>
    %c0_174 = arith.constant 0 : index
    %c0_175 = arith.constant 0 : index
    %265 = vector.load %arg12[%c0_174, %c0_175] : memref<24x2xf32, #tpu.memory_space<vmem>>, vector<24x2xf32>
    %c0_176 = arith.constant 0 : index
    %c0_177 = arith.constant 0 : index
    %266 = vector.load %arg13[%c0_176, %c0_177] : memref<2x24xbf16, #tpu.memory_space<vmem>>, vector<2x24xbf16>
    %c0_178 = arith.constant 0 : index
    %c0_179 = arith.constant 0 : index
    %267 = vector.load %arg41[%c0_178, %c0_179] : memref<32x1xf32, #tpu.memory_space<vmem>>, vector<32x1xf32>
    %cst_180 = arith.constant dense<0.000000e+00> : vector<24x1xf32>
    %268 = tpu.matmul %264, %267, %cst_180 {dimension_numbers = #tpu.dot_dimension_numbers<[1], [0], [0], [1], [0, 0, 1, 1], [], []>} : vector<24x32xf32>, vector<32x1xf32>, vector<24x1xf32> -> vector<24x1xf32>
    %cst_181 = arith.constant 5.000000e-01 : f32
    %269 = vector.broadcast %cst_181 : f32 to vector<24x2xf32>
    %270 = arith.cmpf ogt, %265, %269 : vector<24x2xf32>
    %cst_182 = arith.constant -1.000000e+30 : f32
    %271 = vector.shape_cast %268 : vector<24x1xf32> to vector<24x1xf32>
    %272 = vector.broadcast %271 : vector<24x1xf32> to vector<24x2xf32>
    %273 = vector.broadcast %cst_182 : f32 to vector<24x2xf32>
    %274 = arith.select %270, %272, %273 : vector<24x2xi1>, vector<24x2xf32>
    %cst_183 = arith.constant dense<0xFF800000> : vector<2xf32>
    %275 = vector.multi_reduction <maximumf>, %274, %cst_183 [0] : vector<24x2xf32> to vector<2xf32>
    %276 = vector.shape_cast %275 : vector<2xf32> to vector<1x2xf32>
    %277 = vector.broadcast %276 : vector<1x2xf32> to vector<24x2xf32>
    %278 = arith.subf %274, %277 : vector<24x2xf32>
    %279 = math.exp %278 : vector<24x2xf32>
    %280 = arith.mulf %279, %265 : vector<24x2xf32>
    %cst_184 = arith.constant dense<0.000000e+00> : vector<2xf32>
    %281 = vector.multi_reduction <add>, %280, %cst_184 [0] : vector<24x2xf32> to vector<2xf32>
    %282 = vector.shape_cast %281 : vector<2xf32> to vector<1x2xf32>
    %cst_185 = arith.constant 1.000000e-16 : f32
    %283 = vector.broadcast %cst_185 : f32 to vector<1x2xf32>
    %284 = arith.addf %282, %283 : vector<1x2xf32>
    %285 = tpu.reciprocal %284 {approx = true} : vector<1x2xf32> -> vector<1x2xf32>
    %286 = vector.broadcast %285 : vector<1x2xf32> to vector<24x2xf32>
    %287 = arith.mulf %280, %286 : vector<24x2xf32>
    %cst_186 = arith.constant dense<0xFF800000> : vector<2xf32>
    %288 = vector.multi_reduction <maximumf>, %287, %cst_186 [0] : vector<24x2xf32> to vector<2xf32>
    %289 = vector.shape_cast %288 : vector<2xf32> to vector<1x2xf32>
    %cst_187 = arith.constant 1.000000e-07 : f32
    %290 = vector.broadcast %cst_187 : f32 to vector<1x2xf32>
    %291 = arith.subf %289, %290 : vector<1x2xf32>
    %cst_188 = arith.constant 1.000000e-03 : f32
    %292 = vector.broadcast %cst_188 : f32 to vector<1x2xf32>
    %293 = arith.minimumf %291, %292 : vector<1x2xf32>
    %294 = vector.broadcast %293 : vector<1x2xf32> to vector<24x2xf32>
    %295 = arith.cmpf ogt, %287, %294 : vector<24x2xf32>
    %cst_189 = arith.constant 1.000000e+00 : f32
    %cst_190 = arith.constant 0.000000e+00 : f32
    %296 = vector.broadcast %cst_189 : f32 to vector<24x2xf32>
    %297 = vector.broadcast %cst_190 : f32 to vector<24x2xf32>
    %298 = arith.select %295, %296, %297 : vector<24x2xi1>, vector<24x2xf32>
    %299 = arith.mulf %298, %265 : vector<24x2xf32>
    %300 = arith.mulf %287, %299 : vector<24x2xf32>
    %cst_191 = arith.constant dense<0.000000e+00> : vector<24xf32>
    %301 = vector.multi_reduction <add>, %300, %cst_191 [1] : vector<24x2xf32> to vector<24xf32>
    %302 = vector.shape_cast %301 : vector<24xf32> to vector<24x1xf32>
    %cst_192 = arith.constant dense<0.000000e+00> : vector<24xf32>
    %303 = vector.multi_reduction <add>, %299, %cst_192 [1] : vector<24x2xf32> to vector<24xf32>
    %304 = vector.shape_cast %303 : vector<24xf32> to vector<24x1xf32>
    %305 = vector.broadcast %302 : vector<24x1xf32> to vector<24x32xf32>
    %306 = arith.mulf %264, %305 : vector<24x32xf32>
    %307 = arith.truncf %306 : vector<24x32xf32> to vector<24x32xbf16>
    %cst_193 = arith.constant dense<0.000000e+00> : vector<2x32xf32>
    %308 = tpu.matmul %266, %307, %cst_193 {dimension_numbers = #tpu.dot_dimension_numbers<[1], [0], [0], [1], [0, 0, 1, 1], [], []>} : vector<2x24xbf16>, vector<24x32xbf16>, vector<2x32xf32> -> vector<2x32xf32>
    %309 = arith.truncf %304 : vector<24x1xf32> to vector<24x1xbf16>
    %cst_194 = arith.constant dense<0.000000e+00> : vector<2x1xf32>
    %310 = tpu.matmul %266, %309, %cst_194 {dimension_numbers = #tpu.dot_dimension_numbers<[1], [0], [0], [1], [0, 0, 1, 1], [], []>} : vector<2x24xbf16>, vector<24x1xbf16>, vector<2x1xf32> -> vector<2x1xf32>
    %311 = tpu.reciprocal %310 {approx = true} : vector<2x1xf32> -> vector<2x1xf32>
    %312 = vector.broadcast %311 : vector<2x1xf32> to vector<2x32xf32>
    %313 = arith.mulf %308, %312 : vector<2x32xf32>
    %c0_195 = arith.constant 0 : index
    %c0_196 = arith.constant 0 : index
    %314 = vector.load %arg42[%c0_195, %c0_196] : memref<32x32xf32, #tpu.memory_space<vmem>>, vector<32x32xf32>
    %cst_197 = arith.constant dense<0.000000e+00> : vector<2x32xf32>
    %315 = tpu.matmul %313, %314, %cst_197 {dimension_numbers = #tpu.dot_dimension_numbers<[1], [0], [0], [1], [0, 0, 1, 1], [], []>} : vector<2x32xf32>, vector<32x32xf32>, vector<2x32xf32> -> vector<2x32xf32>
    %c0_198 = arith.constant 0 : index
    %c0_199 = arith.constant 0 : index
    %316 = vector.load %arg43[%c0_198, %c0_199] : memref<1x32xf32, #tpu.memory_space<vmem>>, vector<1x32xf32>
    %317 = vector.broadcast %316 : vector<1x32xf32> to vector<2x32xf32>
    %318 = arith.addf %315, %317 : vector<2x32xf32>
    %cst_200 = arith.constant 0.000000e+00 : f32
    %319 = vector.broadcast %cst_200 : f32 to vector<2x32xf32>
    %320 = arith.maximumf %318, %319 : vector<2x32xf32>
    %c0_201 = arith.constant 0 : index
    %c0_202 = arith.constant 0 : index
    %321 = vector.load %arg44[%c0_201, %c0_202] : memref<32x8xf32, #tpu.memory_space<vmem>>, vector<32x8xf32>
    %cst_203 = arith.constant dense<0.000000e+00> : vector<2x8xf32>
    %322 = tpu.matmul %320, %321, %cst_203 {dimension_numbers = #tpu.dot_dimension_numbers<[1], [0], [0], [1], [0, 0, 1, 1], [], []>} : vector<2x32xf32>, vector<32x8xf32>, vector<2x8xf32> -> vector<2x8xf32>
    %c0_204 = arith.constant 0 : index
    %c0_205 = arith.constant 0 : index
    %323 = vector.load %arg45[%c0_204, %c0_205] : memref<1x8xf32, #tpu.memory_space<vmem>>, vector<1x8xf32>
    %324 = vector.broadcast %323 : vector<1x8xf32> to vector<2x8xf32>
    %325 = arith.addf %322, %324 : vector<2x8xf32>
    %c0_206 = arith.constant 0 : index
    %c0_207 = arith.constant 0 : index
    %326 = vector.load %arg46[%c0_206, %c0_207] : memref<2x8xf32, #tpu.memory_space<vmem>>, vector<2x8xf32>
    tpu.vector_store %arg46[%c0_206, %c0_207], %325 {strides = array<i32>} : memref<2x8xf32, #tpu.memory_space<vmem>>, vector<2x8xf32>,
    return
  }
}

</mosaic_0001>

<bundles_post_ra>
// kernel: tpu_custom_call.1
= control target key start
LH: loop header
LB: loop body
LE: loop exit
PB: predicated region body
PF: predicated region fallthrough
CT: control target
= control target key end

     0   :  { %s5692_s6 = smov 1   ;;  %s5693_s10 = smov 2   ;;  %s6885_s0 = inlined_call_operand.smem [shape: u32[47], index: -1, kind: input, shape index: {}] }
   0x1   :  { %s5756_s5 = sld [smem:[%s6885_s0]]   ;;  %s5694_s14 = smov 3  }
   0x2   :  { %s5761_s9 = sld [smem:[%s6885_s0 + %s5692_s6]]   ;;  %s5695_s18 = smov 4  }
   0x3   :  { %s5766_s13 = sld [smem:[%s6885_s0 + %s5693_s10]]   ;;  %s5696_s22 = smov 5  }
   0x4   :  { %s5771_s17 = sld [smem:[%s6885_s0 + %s5694_s14]]   ;;  %s5697_s26 = smov 6  }
   0x5   :  { %s5776_s21 = sld [smem:[%s6885_s0 + %s5695_s18]]   ;;  %s5698_s30 = smov 7  }
   0x6   :  { %s5781_s25 = sld [smem:[%s6885_s0 + %s5696_s22]]   ;;  %s5699_s4 = smov 8  }
   0x7   :  { %s5786_s29 = sld [smem:[%s6885_s0 + %s5697_s26]]   ;;  %s5700_s10 = smov 9  }
   0x8   :  { %s5791_s3 = sld [smem:[%s6885_s0 + %s5698_s30]]   ;;  %s5701_s15 = smov 10  }
   0x9   :  { %s5796_s8 = sld [smem:[%s6885_s0 + %s5699_s4]]   ;;  %s5702_s20 = smov 11  }
   0xa   :  { %s5801_s14 = sld [smem:[%s6885_s0 + %s5700_s10]]   ;;  %s5703_s26 = smov 12  }
   0xb   :  { %6905 = sst [smem:[#allocation10_spill]] %s5776_s21  ;;  %s5704_s1 = smov 13  }
   0xc   :  { %6906 = sst [smem:[#allocation11_spill]] %s5781_s25  ;;  %s5705_s7 = smov 14  }
   0xd   :  { %6907 = sst [smem:[#allocation12_spill]] %s5786_s29  ;;  %s5707_s22 = smov 16  }
   0xe   :  { %6908 = sst [smem:[#allocation13_spill]] %s5791_s3  ;;  %s5708_s28 = smov 17  }
   0xf   :  { %6909 = sst [smem:[#allocation14_spill]] %s5796_s8 }
  0x10   :  { %s5806_s19 = sld [smem:[%s6885_s0 + %s5701_s15]]   ;;  %s5706_s15 = smov 15  }
  0x11   :  { %s5811_s24 = sld [smem:[%s6885_s0 + %s5702_s20]]  }
  0x12   :  { %s5816_s30 = sld [smem:[%s6885_s0 + %s5703_s26]]  }
  0x13   :  { %s5821_s6 = sld [smem:[%s6885_s0 + %s5704_s1]]  }
  0x14   :  { %s5826_s12 = sld [smem:[%s6885_s0 + %s5705_s7]]   ;;  %s5709_s7 = smov 18  }
  0x15   :  { %s5831_s20 = sld [smem:[%s6885_s0 + %s5706_s15]]   ;;  %s5710_s15 = smov 19  }
  0x16   :  { %6910 = sst [smem:[#allocation15_spill]] %s5806_s19 }
  0x17   :  { %6911 = sst [smem:[#allocation16_spill]] %s5811_s24 }
  0x18   :  { %6912 = sst [smem:[#allocation17_spill]] %s5816_s30 }
  0x19   :  { %6913 = sst [smem:[#allocation18_spill]] %s5821_s6 }
  0x1a   :  { %s5836_s27 = sld [smem:[%s6885_s0 + %s5707_s22]]   ;;  %s5711_s22 = smov 20  }
  0x1b   :  { %s5841_s4 = sld [smem:[%s6885_s0 + %s5708_s28]]   ;;  %s5712_s28 = smov 21  }
  0x1c   :  { %s5846_s6 = sld [smem:[%s6885_s0 + %s5709_s7]]   ;;  %s5713_s7 = smov 22  }
  0x1d   :  { %s5851_s30 = sld [smem:[%s6885_s0 + %s5710_s15]]   ;;  %s5714_s15 = smov 23  }
  0x1e   :  { %s5856_s24 = sld [smem:[%s6885_s0 + %s5711_s22]]   ;;  %s5715_s22 = smov 24  }
  0x1f   :  { %s5861_s29 = sld [smem:[%s6885_s0 + %s5712_s28]]   ;;  %s5716_s28 = smov 25  }
  0x20   :  { %s5866_s3 = sld [smem:[%s6885_s0 + %s5713_s7]]   ;;  %s5717_s7 = smov 26  }
  0x21   :  { %6914 = sst [smem:[#allocation19_spill]] %s5841_s4 }
  0x22   :  { %s5871_s19 = sld [smem:[%s6885_s0 + %s5714_s15]]   ;;  %s5718_s15 = smov 27  }
  0x23   :  { %s5876_s21 = sld [smem:[%s6885_s0 + %s5715_s22]]   ;;  %s5719_s22 = smov 28  }
  0x24   :  { %s5881_s8 = sld [smem:[%s6885_s0 + %s5716_s28]]   ;;  %s5720_s28 = smov 29  }
  0x25   :  { %6915 = sst [smem:[#allocation20_spill]] %s5861_s29 }
  0x26   :  { %s5886_s25 = sld [smem:[%s6885_s0 + %s5717_s7]]   ;;  %s5721_s7 = smov 30  }
  0x27   :  { %s5896_s4 = sld [smem:[%s6885_s0 + %s5719_s22]]   ;;  %s5723_s22 = smov 32  }
  0x28   :  { %6916 = sst [smem:[#allocation21_spill]] %s5871_s19 }
  0x29   :  { %s5891_s19 = sld [smem:[%s6885_s0 + %s5718_s15]]   ;;  %s5722_s15 = smov 31  }
  0x2a   :  { %6917 = sst [smem:[#allocation22_spill]] %s5881_s8 }
  0x2b   :  { %s5901_s8 = sld [smem:[%s6885_s0 + %s5720_s28]]   ;;  %s5724_s28 = smov 33  }
  0x2c   :  { %s5906_s29 = sld [smem:[%s6885_s0 + %s5721_s7]]   ;;  %s5725_s7 = smov 34  }
  0x2d   :  { %6919 = sst [smem:[#allocation24_spill]] %s5896_s4 }
  0x2e   :  { %s5916_s4 = sld [smem:[%s6885_s0 + %s5723_s22]]   ;;  %s5727_s22 = smov 36  }
  0x2f   :  { %6918 = sst [smem:[#allocation23_spill]] %s5891_s19 }
  0x30   :  { %s5911_s19 = sld [smem:[%s6885_s0 + %s5722_s15]]   ;;  %s5726_s15 = smov 35  }
  0x31   :  { %6920 = sst [smem:[#allocation25_spill]] %s5901_s8 }
  0x32   :  { %6921 = sst [smem:[#allocation26_spill]] %s5906_s29 }
  0x33   :  { %s5921_s8 = sld [smem:[%s6885_s0 + %s5724_s28]]   ;;  %s5728_s28 = smov 37  }
  0x34   :  { %6923 = sst [smem:[#allocation28_spill]] %s5916_s4 }
  0x35   :  { %s5926_s29 = sld [smem:[%s6885_s0 + %s5725_s7]]   ;;  %s5729_s7 = smov 38  }
  0x36   :  { %6922 = sst [smem:[#allocation27_spill]] %s5911_s19 }
  0x37   :  { %s5931_s19 = sld [smem:[%s6885_s0 + %s5726_s15]]   ;;  %s5730_s15 = smov 39  }
  0x38   :  { %s5936_s4 = sld [smem:[%s6885_s0 + %s5727_s22]]   ;;  %s5731_s22 = smov 40  }
  0x39   :  { %6924 = sst [smem:[#allocation29_spill]] %s5921_s8 }
  0x3a   :  { %s5941_s8 = sld [smem:[%s6885_s0 + %s5728_s28]]   ;;  %s5732_s28 = smov 41  }
  0x3b   :  { %6925 = sst [smem:[#allocation30_spill]] %s5926_s29 }
  0x3c   :  { %s5946_s29 = sld [smem:[%s6885_s0 + %s5729_s7]]   ;;  %s5733_s7 = smov 42  }
  0x3d   :  { %6926 = sst [smem:[#allocation31_spill]] %s5931_s19 }
  0x3e   :  { %6927 = sst [smem:[#allocation32_spill]] %s5936_s4 }
  0x3f   :  { %s5951_s19 = sld [smem:[%s6885_s0 + %s5730_s15]]   ;;  %s5734_s15 = smov 43  }
  0x40   :  { %6928 = sst [smem:[#allocation33_spill]] %s5941_s8 }
  0x41   :  { %s5956_s4 = sld [smem:[%s6885_s0 + %s5731_s22]]   ;;  %s5735_s22 = smov 44  }
  0x42   :  { %6929 = sst [smem:[#allocation34_spill]] %s5946_s29 }
  0x43   :  { %s5961_s8 = sld [smem:[%s6885_s0 + %s5732_s28]]   ;;  %s5736_s28 = smov 45  }
  0x44   :  { %s5966_s29 = sld [smem:[%s6885_s0 + %s5733_s7]]   ;;  %s5737_s7 = smov 46  }
  0x45   :  { %6930 = sst [smem:[#allocation35_spill]] %s5951_s19 }
  0x46   :  { %s5971_s19 = sld [smem:[%s6885_s0 + %s5734_s15]]  }
  0x47   :  { %6931 = sst [smem:[#allocation36_spill]] %s5956_s4 }
  0x48   :  { %s5976_s4 = sld [smem:[%s6885_s0 + %s5735_s22]]  }
  0x49   :  { %6932 = sst [smem:[#allocation37_spill]] %s5961_s8 }
  0x4a   :  { %6933 = sst [smem:[#allocation38_spill]] %s5966_s29 }
  0x4b   :  { %s5981_s8 = sld [smem:[%s6885_s0 + %s5736_s28]]  }
  0x4c   :  { %s5986_s29 = sld [smem:[%s6885_s0 + %s5737_s7]]  }
  0x4d   :  { %98 = vsyncpa [#allocation5], 0 }
  0x4e   :  { %99 = vsyncpa [#allocation6], 0  ;;  %s5738_s15 = smov [#allocation4]   ;;  %s5644_s18 = scalar_lea.hbm %s5801_s14, 32 }
  0x4f   :  { %s124_s16 = sshll.u32 %s5738_s15, 4  ;;  %p5645_p0 = scmp.ne.s32.totalorder %s5801_s14, %s5644_s18  ;;  %s125_s16 = int_to_ptr.vmem [resolvable:$true] %s124_s16 }
  0x50   :  { %p5648_p1 = scmp.lt.u32.totalorder %s5644_s18, %s5801_s14 }
  0x52   :  { %p5650_p2 = pnand %p5648_p1, %p5645_p0 }
  0x54   :  { %5653 = shalt.err (!%p5650_p2)
}
  0x55   :  { %s5654_s22 = scalar_lea.vmem %s125_s16, 32  ;;  %p5659_p4 = scmp.lt.s32.totalorder %s125_s16, %s125_s16 }
  0x56   :  { %p5655_p3 = scmp.ne.s32.totalorder %s125_s16, %s5654_s22  ;;  %p5660_p5 = scmp.lt.s32.totalorder %s5654_s22, %s5654_s22 }
  0x58   :  { %p5661_p6 = por %p5660_p5, %p5659_p4 }
  0x5a   :  { %p5662_p7 = pnand %p5661_p6, %p5655_p3 }
  0x5c   :  { %5665 = shalt.err (!%p5662_p7)
}
  0x5d   :  { %127 = dma.hbm_to_vmem [thread:$0]  %s5801_s14, 32, %s125_s16, [#allocation5]  }
  0x5e   :  { %5688 = dma.done.wait [#allocation5], 32  }
  0x5f   :  { %5689 = vsyncadd [#allocation5], 4294967264  ;;  %vm222_vm0 = vcmask 1043456   ;;  %vm416_vm1 = vcmask 1045504   ;;  %vm5739_vm2 = vmmov 1   ;;  %vm409_vm4 = vcmask 48128  }
  0x60   :  { %vm5993_vm3 = vmpackc.low %vm222_vm0, %vm5739_vm2  ;;  %v206_v1 = vld [vmem:[%s5826_s12] sm:$0xff]  ;;  %v207_v2 = vld [vmem:[%s5826_s12 + $0x8] sm:$0xf]  ;;  %vm215_vm5 = vcmask 97280   ;;  %v5740_v21 = vmov 0.0   ;;  %vm314_vm6 = vcmask 261120  }
  0x61   :  { %v401_v3 = vld [vmem:[%s5846_s6] sm:$0x3f]  ;;  %v5349_v4 = vpack.c.bf16 %v207_v2, %v206_v1  ;;  %v400_v7 = vld [vmem:[%s5761_s9 + $0x8] sm:$0x3f]  ;;  %v499_v15 = vld [vmem:[%s5856_s24 + $0x10] sm:$0xff]  ;;  %vm5741_vm7 = vmmov 0  }
  0x62   :  { %4780 = vmatprep.subr.msk.mxu0 %vm416_vm1, %v401_v3  ;;  %v399_v5 = vld [vmem:[%s5761_s9] sm:$0xff]  ;;  %v205_v8 = vld [vmem:[%s5756_s5 + $0x8] sm:$0x3]  ;;  %v500_v16 = vld [vmem:[%s5856_s24 + $0x18] sm:$0xff]  ;;  %vm603_vm8 = vcmask 64512   ;;  %s6936_s0 = sld [smem:[#allocation24_spill]] }
  0x63   :  { %v204_v6 = vld [vmem:[%s5756_s5] sm:$0xff]  ;;  %4781 = vmatpush3.msk.msra.mxu0 %vm416_vm1, %v401_v3  ;;  %4782 = vmatprep.mubr.msk.f32.mxu0 %vm409_vm4, %v399_v5  ;;  %v498_v10 = vld [vmem:[%s5856_s24 + $0x8] sm:$0xff]  ;;  %v5367_v17 = vpack.c.bf16 %v500_v16, %v499_v15  ;;  %v305_v18 = vld [vmem:[%s5836_s27 + $0x10] sm:$0xff]  ;;  %v5742_v46 = vmov 0.0|0.0   ;;  %s6937_s5 = sld [smem:[#allocation20_spill]]  ;;  %s6938_s9 = sld [smem:[#allocation19_spill]] }
  0x64   :  { %v497_v9 = vld [vmem:[%s5856_s24] sm:$0xff]  ;;  %5351 = vmatprep.subr.msk.bf16.mxu1 %vm5993_vm3, %v5349_v4  ;;  %4766 = vmatprep.mubr.msk.f32.mxu1 %vm215_vm5, %v204_v6  ;;  %v304_v13 = vld [vmem:[%s5836_s27 + $0x8] sm:$0xff]  ;;  %v306_v19 = vld [vmem:[%s5836_s27 + $0x18] sm:$0xff]  ;;  %vm590_vm9 = vcmask 259072   ;;  %vm397_vm10 = vcmask 254976   ;;  %s6944_s14 = sld [smem:[#allocation25_spill]] }
  0x65   :  { %v5363_v11 = vpack.c.bf16 %v498_v10, %v497_v9  ;;  %v303_v12 = vld [vmem:[%s5836_s27] sm:$0xff]  ;;  %5354 = vmatpush3.bf16.msk.msra.mxu1 %vm5993_vm3, %v5349_v4  ;;  %4783 = vmatmul.mubr.msk.f32.vlgmr.msra.gmra.mrb[0].mxu0 %vm409_vm4, %v400_v7  ;;  %v5359_v20 = vpack.c.bf16 %v306_v19, %v305_v18  ;;  %v593_v39 = vld [vmem:[%s5766_s13 + $0x8] sm:$0xff]  ;;  %v594_v40 = vld [vmem:[%s5766_s13 + $0x10] sm:$0xf]  ;;  %s6945_s24 = sld [smem:[#allocation27_spill]]  ;;  %vm798_vm11 = vcmask 257024  }
  0x66   :  { %v5355_v14 = vpack.c.bf16 %v304_v13, %v303_v12  ;;  %v4357_v22 = vld [vmem:[%s5851_s30] ss:$0 sm:$0xff]  ;;  %v801_v42 = vld [vmem:[%s5771_s17 + $0x8] sm:$0xff]  ;;  %v698_v47 = vld [vmem:[%s5876_s21 + $0x10] sm:$0xff]  ;;  %s6946_s30 = sld [smem:[#allocation11_spill]]  ;;  %s5743_s6 = smov 96  }
  0x67   :  { %5364 = vmatprep.subr.bf16.mxu0 %v5363_v11  ;;  %v4350_v25 = vld [vmem:[%s5831_s20] ss:$0 sm:$0xff]  ;;  %v697_v44 = vld [vmem:[%s5876_s21 + $0x8] sm:$0xff]  ;;  %v699_v48 = vld [vmem:[%s5876_s21 + $0x18] sm:$0xff]  ;;  %vm1273_vm12 = vcmask 195584   ;;  %s6947_s12 = sld [smem:[#allocation14_spill]] }
  0x68   :  { %5356 = vmatprep.subr.bf16.mxu1 %v5355_v14  ;;  %5366 = vmatpush3.bf16.msra.mxu0 %v5363_v11  ;;  %v595_v36 = vld [vmem:[%s5866_s3] sm:$0xff]  ;;  %v5375_v49 = vpack.c.bf16 %v699_v48, %v698_v47  ;;  %v897_v51 = vld [vmem:[%s6936_s0 + $0x8] sm:$0xff]  ;;  %v898_v53 = vld [vmem:[%s6936_s0 + $0x10] sm:$0xff]  ;;  %s6943_s3 = sld [smem:[#allocation22_spill]]  ;;  %s6948_s20 = sld [smem:[#allocation10_spill]]  ;;  %vm1528_vm13 = vcmask 1041408  }
  0x69   :  { %4767 = vmatmul.mubr.msk.f32.vlgmr.msra.gmra.mrb[0].mxu1 %vm215_vm5, %v205_v8  ;;  %5368 = vmatprep.subr.bf16.mxu0 %v5367_v17  ;;  %v802_v37 = vld [vmem:[%s5886_s25] sm:$0x3f]  ;;  %v899_v54 = vld [vmem:[%s6936_s0 + $0x18] sm:$0xff]  ;;  %s6942_s25 = sld [smem:[#allocation28_spill]]  ;;  %vm1518_vm14 = vcmask 31744   ;;  %s6949_s27 = sld [smem:[#allocation15_spill]] }
  0x6a   :  { %5358 = vmatpush3.bf16.msra.mxu1 %v5355_v14  ;;  %v592_v38 = vld [vmem:[%s5766_s13] sm:$0xff]  ;;  %v5381_v55 = vpack.c.bf16 %v899_v54, %v898_v53  ;;  %s6939_s13 = sld [smem:[#allocation21_spill]]  ;;  %vm1588_vm15 = vcmask 785408   ;;  %s6951_s26 = sld [smem:[#allocation12_spill]]  ;;  %vm1740_vm2 = vcmask 293888   ;;  %vm2292_vm3 = vcmask 1048320  }
  0x6b   :  { %5360 = vmatprep.subr.bf16.mxu1 %v5359_v20  ;;  %v800_v41 = vld [vmem:[%s5771_s17] sm:$0xff]  ;;  %s6940_s17 = sld [smem:[#allocation26_spill]]  ;;  %s6950_s23 = sld [smem:[#allocation13_spill]] }
  0x6c   :  { %5370 = vmatpush3.bf16.msra.mxu0 %v5367_v17  ;;  %v696_v43 = vld [vmem:[%s5876_s21] sm:$0xff]  ;;  %s6941_s21 = sld [smem:[#allocation23_spill]]  ;;  %s6952_s28 = sld [smem:[#allocation16_spill]] }
  0x6d   :  { %v5372_v45 = vpack.c.bf16 %v697_v44, %v696_v43  ;;  %5371 = vmatprep.subr.bf16.mxu0 %v5742_v46  ;;  %v896_v50 = vld [vmem:[%s6936_s0] sm:$0xff]  ;;  %s5744_s1 = smov 32   ;;  %s6953_s2 = sld [smem:[#allocation30_spill]] }
  0x6e   :  { %5362 = vmatpush3.bf16.msra.mxu1 %v5359_v20  ;;  %v5377_v52 = vpack.c.bf16 %v897_v51, %v896_v50  ;;  %v4361_v56 = vld [vmem:[%s6937_s5] ss:$0 sm:$0xff]  ;;  %s6954_s7 = sld [smem:[#allocation29_spill]]  ;;  %s6955_s10 = sld [smem:[#allocation31_spill]] }
  0x6f   :  { %4796 = vmatprep.subr.mxu1 %v5740_v21  ;;  %v4354_v59 = vld [vmem:[%s6938_s9] ss:$0 sm:$0xff]  ;;  %s6956_s11 = sld [smem:[#allocation32_spill]]  ;;  %s6957_s15 = sld [smem:[#allocation33_spill]] }
  0x70   :  { %v4364_v2 = vld [vmem:[%s6939_s13] ss:$0 sm:$0xff]  ;;  %s6958_s16 = sld [smem:[#allocation35_spill]]  ;;  %s6959_s18 = sld [smem:[#allocation37_spill]] }
  0x71   :  { %v1049_v3 = vld [vmem:[%s6940_s17] sm:$0xff]  ;;  %v1050_v4 = vld [vmem:[%s6940_s17 + $0x8] sm:$0xff]  ;;  %v1051_v10 = vld [vmem:[%s6940_s17 + $0x10] sm:$0xff]  ;;  %s6960_s22 = sld [smem:[#allocation34_spill]]  ;;  %s6961_s0 = sld [smem:[#allocation36_spill]] }
  0x72   :  { %v5386_v8 = vpack.c.bf16 %v1050_v4, %v1049_v3  ;;  %v1052_v11 = vld [vmem:[%s6940_s17 + $0x18] sm:$0xff]  ;;  %v4372_v20 = vld [vmem:[%s6941_s21] ss:$0 sm:$0xff]  ;;  %s6962_s5 = sld [smem:[#allocation17_spill]]  ;;  %s6963_s9 = sld [smem:[#allocation18_spill]] }
  0x73   :  { %v5389_v15 = vpack.c.bf16 %v1052_v11, %v1051_v10  ;;  %v4384_v53 = vld [vmem:[%s6945_s24] ss:$0 sm:$0xff]  ;;  %v6152_v10 = vld [vmem:[%s6946_s30 + $0x10] ss:$0 sps:$4 sm:$0x33]   ;;  %s6964_s13 = sld [smem:[#allocation38_spill]] }
  0x74   :  { %v5543_v11 = vld [vmem:[%s6947_s12] sm:$0xff]  }
 0x138   :  { %v4784_v23 = vpop.f32.mrb[0].mxu0 }
 0x139   :  { %v492_v24 = vadd.f32 %v4784_v23, %v4357_v22  ;;  %v486_v26 = vpop.f32.mrb[1].mxu0 }
 0x13a   :  { %v487_v27 = vadd.f32 %v4357_v22, %v486_v26 }
 0x13b   :  { %v496_v28 = vmax.f32 %v492_v24, 0.0 }
 0x13c   :  { %v4768_v29 = vpop.f32.mrb[0].mxu1  ;;  %v495_v31 = vmax.f32 %v487_v27, 0.0 }
 0x13d   :  { %v298_v30 = vadd.f32 %v4768_v29, %v4350_v25  ;;  %v292_v32 = vpop.f32.mrb[1].mxu1 }
 0x13e   :  { %v293_v33 = vadd.f32 %v4350_v25, %v292_v32  ;;  %4793 = vmatprep.mubr.msk.f32.mxu0 %vm314_vm6, %v495_v31  ;;  %v1149_v32 = vld [vmem:[%s6942_s25] sm:$0xff] }
 0x13f   :  { %4794 = vmatmul.mubr.msk.f32.vlgmr.msra.gmra.mrb[2].mxu0 %vm314_vm6, %v496_v28  ;;  %v302_v35 = vmax.f32 %v298_v30, 0.0 }
 0x140   :  { %v301_v34 = vmax.f32 %v293_v33, 0.0  ;;  %4815 = vmatprep.mubr.msk.f32.mxu0 %vm5741_vm7, %v5740_v21  ;;  %5373 = vmatpush3.bf16.msra.mxu0 %v5372_v45  ;;  %v1150_v33 = vld [vmem:[%s6942_s25 + $0x8] sm:$0xff] }
 0x141   :  { %5374 = vmatprep.subr.bf16.mxu0 %v5742_v46 }
 0x142   :  { %4777 = vmatprep.mubr.msk.f32.mxu1 %vm314_vm6, %v301_v34  ;;  %v5392_v34 = vpack.c.bf16 %v1150_v33, %v1149_v32 }
 0x143   :  { %4778 = vmatmul.mubr.msk.f32.vlgmr.msra.gmra.mrb[2].mxu1 %vm314_vm6, %v302_v35  ;;  %v1151_v35 = vld [vmem:[%s6942_s25 + $0x10] sm:$0xff] }
 0x144   :  { %4797 = vmatpush3.msra.mxu1 %v595_v36  ;;  %4798 = vmatprep.mubr.msk.f32.mxu1 %vm5741_vm7, %v5740_v21  ;;  %v1152_v36 = vld [vmem:[%s6942_s25 + $0x18] sm:$0xff] }
 0x145   :  { %4824 = vmatprep.subr.msk.mxu1 %vm416_vm1, %v802_v37  ;;  %5376 = vmatpush3.bf16.msra.mxu0 %v5375_v49 }
 0x146   :  { %5385 = vmatprep.subr.bf16.mxu0 %v5742_v46 }
 0x147   :  { %4799 = vmatmul.mubr.msk.f32.vlgmr.msra.gmra.mrb[4].mxu1 %vm603_vm8, %v592_v38  ;;  %v4368_v38 = vld [vmem:[%s6943_s3] ss:$0 sm:$0xff] }
 0x148   :  { %4801 = vmatprep.mubr.msk.f32.mxu1 %vm5741_vm7, %v5740_v21  ;;  %4825 = vmatpush3.msk.msra.mxu1 %vm416_vm1, %v802_v37  ;;  %v5395_v37 = vpack.c.bf16 %v1152_v36, %v1151_v35  ;;  %vm1593_vm1 = vcmask 781312  }
 0x149   :  { %5378 = vmatprep.subr.bf16.mxu1 %v5377_v52 }
 0x14b   :  { %4802 = vmatmul.mubr.msk.f32.gmra.mrb[6].mxu1 %vm603_vm8, %v593_v39 }
 0x14c   :  { %4804 = vmatprep.mubr.msk.f32.mxu1 %vm5741_vm7, %v5740_v21 }
 0x14f   :  { %4805 = vmatmul.mubr.msk.f32.gmra.mrb[8].mxu1 %vm603_vm8, %v594_v40  ;;  %vm3932_vm8 = vcmask 15360  }
 0x150   :  { %4826 = vmatprep.mubr.msk.f32.mxu1 %vm409_vm4, %v800_v41 }
 0x153   :  { %4827 = vmatmul.mubr.msk.f32.vlgmr.msra.gmra.mrb[10].mxu1 %vm409_vm4, %v801_v42 }
 0x154   :  { %5380 = vmatpush3.bf16.msra.mxu1 %v5377_v52  ;;  %v4376_v52 = vld [vmem:[%s6944_s14] ss:$0 sm:$0xff] }
 0x155   :  { %5382 = vmatprep.subr.bf16.mxu1 %v5381_v55 }
 0x158   :  { %5384 = vmatpush3.bf16.msra.mxu1 %v5381_v55 }
 0x159   :  { %5391 = vmatprep.subr.bf16.mxu1 %v5742_v46 }
 0x212   :  { %v4795_v57 = vpop.f32.mrb[2].mxu0 }
 0x213   :  { %v586_v58 = vadd.f32 %v4795_v57, %v4361_v56  ;;  %v580_v60 = vpop.f32.mrb[3].mxu0 }
 0x214   :  { %v581_v61 = vadd.f32 %v4361_v56, %v580_v60 }
 0x215   :  { %591 = vst.msk [vmem:[#allocation2 + $0x12] sm:$0x3f] %vm590_vm9, %v586_v58 }
 0x216   :  { %v4779_v62 = vpop.f32.mrb[2].mxu1  ;;  %589 = vst.msk [vmem:[#allocation2 + $0xa] sm:$0xff] %vm314_vm6, %v581_v61 }
 0x217   :  { %v393_v63 = vadd.f32 %v4779_v62, %v4354_v59  ;;  %v387_v0 = vpop.f32.mrb[3].mxu1 }
 0x218   :  { %v388_v1 = vadd.f32 %v4354_v59, %v387_v0 }
 0x219   :  { %398 = vst.msk [vmem:[#allocation2 + $0x8] sm:$0x3] %vm397_vm10, %v393_v63 }
 0x21a   :  { %396 = vst.msk [vmem:[#allocation2] sm:$0xff] %vm314_vm6, %v388_v1  ;;  %v679_v5 = vpop.f32.mrb[4].mxu1 }
 0x21b   :  { %v680_v6 = vadd.f32 %v4364_v2, %v679_v5  ;;  %v4800_v7 = vpop.f32.mrb[5].mxu1 }
 0x21d   :  { %v693_v9 = vmax.f32 %v680_v6, 0.0  ;;  %v992_v31 = vld [vmem:[#allocation2 + $0x10] sm:$0xff]  ;;  %v6128_v6 = vld [vmem:[%s6946_s30] sm:$0xff]  }
 0x21e   :  { %v684_v12 = vpop.f32.mrb[6].mxu1 }
 0x21f   :  { %v685_v13 = vadd.f32 %v4364_v2, %v684_v12  ;;  %v4803_v14 = vpop.f32.mrb[7].mxu1  ;;  %4816 = vmatmul.mubr.msk.f32.vlgmr.msra.gmra.mrb[4].mxu0 %vm314_vm6, %v693_v9  ;;  %v6142_v9 = vld [vmem:[%s6946_s30 + $0x8] sm:$0xff]  }
 0x220   :  { %4818 = vmatprep.mubr.msk.f32.mxu0 %vm5741_vm7, %v5740_v21  ;;  %5387 = vmatpush3.bf16.msra.mxu0 %v5386_v8  ;;  %v991_v30 = vld [vmem:[#allocation2 + $0x8] sm:$0xff] }
 0x221   :  { %v694_v16 = vmax.f32 %v685_v13, 0.0  ;;  %5388 = vmatprep.subr.bf16.mxu0 %v5742_v46  ;;  %v990_v29 = vld [vmem:[#allocation2] sm:$0xff] }
 0x222   :  { %v689_v17 = vpop.f32.mrb[8].mxu1 }
 0x223   :  { %v690_v18 = vadd.f32 %v4364_v2, %v689_v17  ;;  %v4806_v19 = vpop.f32.mrb[9].mxu1  ;;  %4819 = vmatmul.mubr.msk.f32.gmra.mrb[6].mxu0 %vm314_vm6, %v694_v16  ;;  %v5540_v16 = vld [vmem:[%s6948_s20 + $0x8] sm:$0xff]   ;;  %v5541_v17 = vld [vmem:[%s6948_s20 + $0x10] ss:$0 sps:$4 sm:$0x33]  }
 0x224   :  { %4821 = vmatprep.mubr.msk.f32.mxu0 %vm5741_vm7, %v5740_v21  ;;  %5390 = vmatpush3.bf16.msra.mxu0 %v5389_v15  ;;  %v5538_v15 = vld [vmem:[%s6948_s20] sm:$0xff]  }
 0x225   :  { %v695_v22 = vmax.f32 %v690_v18, 0.0  ;;  %4880 = vmatprep.subr.bf16.mxu0 %v5740_v21 }
 0x226   :  { %v4828_v23 = vpop.f32.mrb[10].mxu1 }
 0x227   :  { %v891_v24 = vadd.f32 %v4828_v23, %v4372_v20  ;;  %4822 = vmatmul.mubr.msk.f32.gmra.mrb[8].mxu0 %vm314_vm6, %v695_v22  ;;  %v885_v25 = vpop.f32.mrb[11].mxu1  ;;  %v5544_v23 = vld [vmem:[%s6947_s12 + $0x8] sm:$0xff]  }
 0x228   :  { %v886_v26 = vadd.f32 %v4372_v20, %v885_v25  ;;  %4848 = vmatprep.mubr.msk.f32.mxu0 %vm5741_vm7, %v5740_v21 }
 0x229   :  { %v895_v27 = vmax.f32 %v891_v24, 0.0 }
 0x22a   :  { %v894_v28 = vmax.f32 %v886_v26, 0.0 }
 0x22b   :  { %4849 = vmatmul.mubr.msk.f32.vlgmr.msra.gmra.mrb[10].mxu0 %vm314_vm6, %v990_v29 }
 0x22c   :  { %4837 = vmatprep.mubr.msk.f32.mxu1 %vm314_vm6, %v894_v28  ;;  %4851 = vmatprep.mubr.msk.f32.mxu0 %vm5741_vm7, %v5740_v21 }
 0x22d   :  { %4838 = vmatmul.mubr.msk.f32.vlgmr.msra.gmra.mrb[12].mxu1 %vm314_vm6, %v895_v27 }
 0x22e   :  { %4865 = vmatprep.mubr.msk.f32.mxu1 %vm5741_vm7, %v5740_v21  ;;  %5393 = vmatpush3.bf16.msra.mxu1 %v5392_v34 }
 0x22f   :  { %4852 = vmatmul.mubr.msk.f32.gmra.mrb[12].mxu0 %vm314_vm6, %v991_v30  ;;  %5394 = vmatprep.subr.bf16.mxu1 %v5742_v46 }
 0x230   :  { %4854 = vmatprep.mubr.msk.f32.mxu0 %vm5741_vm7, %v5740_v21 }
 0x232   :  { %5396 = vmatpush3.bf16.msra.mxu1 %v5395_v37 }
 0x233   :  { %4855 = vmatmul.mubr.msk.f32.gmra.mrb[14].mxu0 %vm314_vm6, %v992_v31  ;;  %4896 = vmatprep.subr.bf16.mxu1 %v5740_v21 }
 0x234   :  { %4884 = vmatprep.mubr.msk.bf16.mxu0 %vm5741_vm7, %v5740_v21 }
 0x2f2   :  { %v782_v39 = vpop.f32.mrb[4].mxu0 }
 0x2f3   :  { %v783_v40 = vadd.f32 %v4368_v38, %v782_v39  ;;  %v4817_v41 = vpop.f32.mrb[5].mxu0 }
 0x2f5   :  { %796 = vst.msk [vmem:[#allocation3] sm:$0xff] %vm314_vm6, %v783_v40 }
 0x2f6   :  { %v787_v42 = vpop.f32.mrb[6].mxu0 }
 0x2f7   :  { %v788_v43 = vadd.f32 %v4368_v38, %v787_v42  ;;  %v4820_v44 = vpop.f32.mrb[7].mxu0 }
 0x2f9   :  { %797 = vst.msk [vmem:[#allocation3 + $0x8] sm:$0xff] %vm314_vm6, %v788_v43 }
 0x2fa   :  { %v792_v45 = vpop.f32.mrb[8].mxu0 }
 0x2fb   :  { %v793_v47 = vadd.f32 %v4368_v38, %v792_v45  ;;  %v4823_v48 = vpop.f32.mrb[9].mxu0  ;;  %v1015_v38 = vld [vmem:[#allocation4] sm:$0x3] }
 0x2fc   :  { %v993_v49 = vld [vmem:[#allocation3] sm:$0xff]  ;;  %v6178_v39 = vsel %vm1528_vm13, %v1015_v38, 0 }
 0x2fd   :  { %799 = vst.msk [vmem:[#allocation3 + $0x10] sm:$0xf] %vm798_vm11, %v793_v47  ;;  %4866 = vmatmul.mubr.msk.f32.vlgmr.msra.gmra.mrb[14].mxu1 %vm314_vm6, %v993_v49 }
 0x2fe   :  { %v1135_v50 = vpop.f32.mrb[10].mxu0  ;;  %4868 = vmatprep.mubr.msk.f32.mxu1 %vm5741_vm7, %v5740_v21 }
 0x2ff   :  { %v4850_v51 = vpop.f32.mrb[11].mxu0  ;;  %v6111_v60 = vadd.f32 %v4384_v53, %v1135_v50 }
 0x300   :  { %v4839_v54 = vpop.f32.mrb[12].mxu1  ;;  %v994_v55 = vld [vmem:[#allocation3 + $0x8] sm:$0xff] }
 0x301   :  { %v985_v56 = vadd.f32 %v4839_v54, %v4376_v52  ;;  %v979_v57 = vpop.f32.mrb[13].mxu1  ;;  %4869 = vmatmul.mubr.msk.f32.gmra.mrb[16].mxu1 %vm314_vm6, %v994_v55 }
 0x302   :  { %v980_v58 = vadd.f32 %v4376_v52, %v979_v57  ;;  %v1140_v59 = vpop.f32.mrb[12].mxu0  ;;  %4871 = vmatprep.mubr.msk.f32.mxu1 %vm5741_vm7, %v5740_v21 }
 0x303   :  { %989 = vst.msk [vmem:[#allocation3 + $0x1c] sm:$0xff] %vm314_vm6, %v985_v56  ;;  %v6114_v61 = vadd.f32 %v4384_v53, %v1140_v59  ;;  %v4853_v62 = vpop.f32.mrb[13].mxu0 }
 0x304   :  { %988 = vst.msk [vmem:[#allocation3 + $0x14] sm:$0xff] %vm314_vm6, %v980_v58 }
 0x305   :  { %v1258_v63 = vpack.c.bf16 %v6114_v61, %v6111_v60 }
 0x306   :  { %v1145_v0 = vpop.f32.mrb[14].mxu0 }
 0x307   :  { %v6119_v1 = vadd.f32 %v4384_v53, %v1145_v0  ;;  %1357 = vrot.lane.b32.xlu0 %v1258_v63, %s5743_s6  ;;  %v4856_v2 = vpop.f32.mrb[15].mxu0  ;;  %4881 = vmatpush3.bf16.msra.mxu0 %v1258_v63 }
 0x308   :  { %4882 = vmatprep.subr.bf16.mxu0 %v5740_v21 }
 0x309   :  { %v1259_v3 = vpack.c.bf16 %v6119_v1, %v6119_v1 }
 0x30a   :  { %v997_v8 = vld [vmem:[#allocation3 + $0x20] sm:$0xf] }
 0x30b   :  { %1359 = vrot.lane.b32.xlu0 %v1259_v3, %s5743_s6  ;;  %v995_v4 = vld [vmem:[#allocation3 + $0x10] sm:$0xff]  ;;  %v1284_v5 = vsel %vm222_vm0, %v1259_v3, 0  ;;  %v996_v7 = vld [vmem:[#allocation3 + $0x18] sm:$0xff] }
 0x30c   :  { %4872 = vmatmul.mubr.msk.f32.gmra.mrb[18].mxu1 %vm314_vm6, %v995_v4  ;;  %4883 = vmatpush3.bf16.msra.mxu0 %v1284_v5 }
 0x30d   :  { %4874 = vmatprep.mubr.msk.f32.mxu1 %vm5741_vm7, %v5740_v21  ;;  %4912 = vmatprep.subr.bf16.mxu0 %v5740_v21 }
 0x30f   :  { %4885 = vmatmul.mubr.msk.bf16.vlgmr.msra.gmra.mrb[16].mxu0 %vm1273_vm12, %v6128_v6 }
 0x310   :  { %4875 = vmatmul.mubr.msk.f32.gmra.mrb[20].mxu1 %vm314_vm6, %v996_v7  ;;  %4888 = vmatprep.mubr.msk.bf16.mxu0 %vm5741_vm7, %v5740_v21 }
 0x311   :  { %4877 = vmatprep.mubr.msk.f32.mxu1 %vm5741_vm7, %v5740_v21  ;;  %4913 = vmatpush3.bf16.msra.mxu0 %v5543_v11 }
 0x312   :  { %4914 = vmatprep.subr.bf16.mxu0 %v5740_v21 }
 0x314   :  { %4878 = vmatmul.mubr.msk.f32.gmra.mrb[22].mxu1 %vm314_vm6, %v997_v8 }
 0x315   :  { %4900 = vmatprep.mubr.msk.bf16.mxu1 %vm5741_vm7, %v5740_v21  ;;  %4915 = vmatpush3.bf16.msra.mxu0 %v5544_v23 }
 0x316   :  { %4942 = vmatprep.subr.bf16.mxu0 %v5740_v21 }
 0x317   :  { %4889 = vmatmul.mubr.msk.bf16.gmra.mrb[20].mxu0 %vm1273_vm12, %v6142_v9 }
 0x318   :  { %4892 = vmatprep.mubr.msk.bf16.mxu0 %vm5741_vm7, %v5740_v21 }
 0x31f   :  { %4893 = vmatmul.mubr.msk.bf16.gmra.mrb[24].mxu0 %vm1273_vm12, %v6152_v10 }
 0x320   :  { %4916 = vmatprep.mubr.msk.bf16.mxu0 %vm5741_vm7, %v5740_v21 }
 0x379   :  { %v1358_v12 = vpop.permute.xlu0 %1357 }
 0x37a   :  { %4897 = vmatpush3.bf16.msra.mxu1 %v1358_v12 }
 0x37b   :  { %4898 = vmatprep.subr.bf16.mxu1 %v5740_v21 }
 0x37d   :  { %v1360_v13 = vpop.permute.xlu0 %1359 }
 0x37e   :  { %v1372_v14 = vsel %vm222_vm0, %v1360_v13, 0 }
 0x37f   :  { %4899 = vmatpush3.bf16.msra.mxu1 %v1372_v14 }
 0x380   :  { %4928 = vmatprep.subr.bf16.mxu1 %v5740_v21 }
 0x382   :  { %4901 = vmatmul.mubr.msk.bf16.vlgmr.msra.gmra.mrb[24].mxu1 %vm1273_vm12, %v5538_v15 }
 0x383   :  { %4904 = vmatprep.mubr.msk.bf16.mxu1 %vm5741_vm7, %v5740_v21  ;;  %4929 = vmatpush3.bf16.msra.mxu1 %v6178_v39 }
 0x38a   :  { %4905 = vmatmul.mubr.msk.bf16.gmra.mrb[28].mxu1 %vm1273_vm12, %v5540_v16 }
 0x38b   :  { %4908 = vmatprep.mubr.msk.bf16.mxu1 %vm5741_vm7, %v5740_v21 }
 0x392   :  { %4909 = vmatmul.mubr.msk.bf16.gmra.mrb[32].mxu1 %vm1273_vm12, %v5541_v17 }
 0x393   :  { %4930 = vmatprep.mubr.msk.bf16.mxu1 %vm5741_vm7, %v5740_v21 }
 0x3d0   :  { %v1234_v18 = vpop.f32.mrb[14].mxu1 }
 0x3d1   :  { %v4867_v19 = vpop.f32.mrb[15].mxu1 }
 0x3d4   :  { %v1239_v20 = vpop.f32.mrb[16].mxu1 }
 0x3d5   :  { %v4870_v22 = vpop.f32.mrb[17].mxu1 }
 0x3df   :  { %v1244_v24 = vpop.f32.mrb[18].mxu1 }
 0x3e0   :  { %v4873_v25 = vpop.f32.mrb[19].mxu1 }
 0x3e2   :  { %v1320_v26 = vpop.f32.mrb[16].mxu0 }
 0x3e3   :  { %v1249_v27 = vpop.f32.mrb[20].mxu1  ;;  %v4886_v28 = vpop.f32.mrb[17].mxu0 }
 0x3e4   :  { %v4876_v29 = vpop.f32.mrb[21].mxu1  ;;  %v1323_v30 = vpop.f32.mrb[18].mxu0  ;;  %v5545_v28 = vld [vmem:[%s6949_s27] sm:$0xff]  }
 0x3e5   :  { %v4887_v31 = vpop.f32.mrb[19].mxu0  ;;  %v5546_v29 = vld [vmem:[%s6949_s27 + $0x8] sm:$0xff]  }
 0x3e6   :  { %v5548_v31 = vld [vmem:[%s6949_s27 + $0x18] sm:$0xff]  }
 0x3e7   :  { %v1254_v32 = vpop.f32.mrb[22].mxu1 }
 0x3e8   :  { %v4879_v33 = vpop.f32.mrb[23].mxu1 }
 0x3e9   :  { %v5550_v33 = vld [vmem:[%s6949_s27 + $0x28] sm:$0xff]  }
 0x3ea   :  { %v1328_v34 = vpop.f32.mrb[20].mxu0 }
 0x3eb   :  { %v4890_v35 = vpop.f32.mrb[21].mxu0 }
 0x3ec   :  { %v1331_v36 = vpop.f32.mrb[22].mxu0 }
 0x3ed   :  { %v4891_v37 = vpop.f32.mrb[23].mxu0 }
 0x3ee   :  { %v4524_v37 = vld [vmem:[%s6950_s23] sm:$0xff]  }
 0x3f2   :  { %v1336_v40 = vpop.f32.mrb[24].mxu0 }
 0x3f3   :  { %v4894_v41 = vpop.f32.mrb[25].mxu0 }
 0x3f4   :  { %v1339_v42 = vpop.f32.mrb[26].mxu0 }
 0x3f5   :  { %v4895_v43 = vpop.f32.mrb[27].mxu0 }
 0x3f6   :  { %v1033_v43 = vld [vmem:[%s6950_s23 + $0x10] sm:$0x3] }
 0x455   :  { %v1408_v44 = vpop.f32.mrb[24].mxu1 }
 0x456   :  { %v6181_v45 = vadd.f32 %v1408_v44, %v1234_v18  ;;  %v4902_v47 = vpop.f32.mrb[25].mxu1  ;;  %v6248_v44 = vunpack.c.l.bf16 %v4524_v37 }
 0x457   :  { %v1411_v48 = vpop.f32.mrb[26].mxu1 }
 0x458   :  { %v6183_v49 = vadd.f32 %v1411_v48, %v1239_v20  ;;  %v4903_v50 = vpop.f32.mrb[27].mxu1  ;;  %v1430_v51 = vmul.f32 %v6181_v45, %v1320_v26 }
 0x459   :  { %v6251_v50 = vunpack.c.h.bf16 %v4524_v37 }
 0x45a   :  { %v1431_v52 = vmul.f32 %v6183_v49, %v1323_v30  ;;  %v5547_v30 = vld [vmem:[%s6949_s27 + $0x10] sm:$0xff]  }
 0x45c   :  { %v1435_v53 = vpack.c.bf16 %v1431_v52, %v1430_v51  ;;  %v6255_v52 = vunpack.c.l.bf16 %v1033_v43 }
 0x45d   :  { %v1416_v54 = vpop.f32.mrb[28].mxu1 }
 0x45e   :  { %v6187_v55 = vadd.f32 %v1416_v54, %v1244_v24  ;;  %v4906_v56 = vpop.f32.mrb[29].mxu1  ;;  %4917 = vmatmul.mubr.msk.bf16.vlgmr.msra.gmra.mrb[28].mxu0 %vm314_vm6, %v1435_v53  ;;  %v4379_v53 = vadd.f32 -1.0, %v6248_v44 }
 0x45f   :  { %v1419_v57 = vpop.f32.mrb[30].mxu1  ;;  %4920 = vmatprep.mubr.msk.bf16.mxu0 %vm5741_vm7, %v5740_v21  ;;  %4943 = vmatpush3.bf16.msra.mxu0 %v5545_v28 }
 0x460   :  { %v6192_v58 = vadd.f32 %v1419_v57, %v1249_v27  ;;  %v4907_v59 = vpop.f32.mrb[31].mxu1  ;;  %v1432_v62 = vmul.f32 %v6187_v55, %v1328_v34  ;;  %4944 = vmatprep.subr.bf16.mxu0 %v5740_v21  ;;  %v4531_v34 = vld [vmem:[%s6950_s23 + $0x8] sm:$0xff]   ;;  %v4380_v57 = vadd.f32 -1.0, %v6251_v50 }
 0x461   :  { %v6241_v35 = vunpack.c.l.bf16 %v4531_v34 }
 0x462   :  { %v1433_v63 = vmul.f32 %v6192_v58, %v1331_v36  ;;  %v6243_v36 = vunpack.c.h.bf16 %v4531_v34 }
 0x463   :  { %4945 = vmatpush3.bf16.msra.mxu0 %v5546_v29  ;;  %v4381_v41 = vadd.f32 -1.0, %v6241_v35 }
 0x464   :  { %v1436_v0 = vpack.c.bf16 %v1433_v63, %v1432_v62  ;;  %4946 = vmatprep.subr.bf16.mxu0 %v5740_v21  ;;  %v4382_v48 = vadd.f32 -1.0, %v6243_v36  ;;  %v4383_v63 = vadd.f32 -1.0, %v6255_v52 }
 0x465   :  { %v1424_v2 = vpop.f32.mrb[32].mxu1  ;;  %v6253_v51 = vmul.f32 1e+30, %v4381_v41 }
 0x466   :  { %v6196_v3 = vadd.f32 %v1424_v2, %v1254_v32  ;;  %4921 = vmatmul.mubr.msk.bf16.gmra.mrb[32].mxu0 %vm314_vm6, %v1436_v0  ;;  %v4910_v4 = vpop.f32.mrb[33].mxu1  ;;  %v5549_v32 = vld [vmem:[%s6949_s27 + $0x20] sm:$0xff]   ;;  %v6258_v54 = vmul.f32 1e+30, %v4382_v48  ;;  %v6263_v2 = vmul.f32 1e+30, %v4379_v53 }
 0x467   :  { %v1427_v5 = vpop.f32.mrb[34].mxu1  ;;  %4924 = vmatprep.mubr.msk.bf16.mxu0 %vm5741_vm7, %v5740_v21  ;;  %4947 = vmatpush3.bf16.msra.mxu0 %v5547_v30 }
 0x468   :  { %v1434_v7 = vmul.f32 %v6196_v3, %v1336_v40  ;;  %v4911_v8 = vpop.f32.mrb[35].mxu1  ;;  %4948 = vmatprep.subr.bf16.mxu0 %v5740_v21 }
 0x46a   :  { %v1437_v11 = vpack.c.bf16 %v1434_v7, %v1434_v7  ;;  %v6266_v7 = vmul.f32 1e+30, %v4380_v57 }
 0x46b   :  { %4949 = vmatpush3.bf16.msra.mxu0 %v5548_v31 }
 0x46c   :  { %4950 = vmatprep.subr.bf16.mxu0 %v5740_v21 }
 0x46e   :  { %4925 = vmatmul.mubr.msk.bf16.gmra.mrb[36].mxu0 %vm314_vm6, %v1437_v11 }
 0x46f   :  { %4954 = vmatprep.mubr.msk.bf16.mxu0 %vm5741_vm7, %v5740_v21  ;;  %4951 = vmatpush3.bf16.msra.mxu0 %v5549_v32 }
 0x470   :  { %4952 = vmatprep.subr.bf16.mxu0 %v5740_v21 }
 0x473   :  { %4953 = vmatpush3.bf16.msra.mxu0 %v5550_v33 }
 0x474   :  { %4992 = vmatprep.subr.bf16.mxu0 %v5740_v21 }
 0x531   :  { %v6205_v12 = vpop.f32.mrb[28].mxu0 }
 0x532   :  { %v4918_v13 = vpop.f32.mrb[29].mxu0 }
 0x533   :  { %v6207_v14 = vpop.f32.mrb[30].mxu0  ;;  %v6270_v13 = vmul.f32 1e+30, %v4383_v63 }
 0x534   :  { %v1515_v15 = vpack.c.bf16 %v6207_v14, %v6205_v12  ;;  %v4919_v16 = vpop.f32.mrb[31].mxu0 }
 0x536   :  { %4931 = vmatmul.mubr.msk.bf16.vlgmr.msra.gmra.mrb[36].mxu1 %vm1518_vm14, %v1515_v15 }
 0x537   :  { %4934 = vmatprep.mubr.msk.bf16.mxu1 %vm5741_vm7, %v5740_v21 }
 0x539   :  { %v6214_v17 = vpop.f32.mrb[32].mxu0 }
 0x53a   :  { %v4922_v18 = vpop.f32.mrb[33].mxu0 }
 0x53b   :  { %v6216_v19 = vpop.f32.mrb[34].mxu0 }
 0x53c   :  { %v1516_v20 = vpack.c.bf16 %v6216_v19, %v6214_v17  ;;  %v4923_v22 = vpop.f32.mrb[35].mxu0 }
 0x53e   :  { %4935 = vmatmul.mubr.msk.bf16.gmra.mrb[40].mxu1 %vm1518_vm14, %v1516_v20 }
 0x53f   :  { %4938 = vmatprep.mubr.msk.bf16.mxu1 %vm5741_vm7, %v5740_v21 }
 0x541   :  { %v6223_v23 = vpop.f32.mrb[36].mxu0 }
 0x542   :  { %v4926_v24 = vpop.f32.mrb[37].mxu0  ;;  %v1517_v26 = vpack.c.bf16 %v6223_v23, %v6223_v23 }
 0x543   :  { %v1512_v25 = vpop.f32.mrb[38].mxu0 }
 0x544   :  { %v4927_v27 = vpop.f32.mrb[39].mxu0 }
 0x546   :  { %4939 = vmatmul.mubr.msk.bf16.gmra.mrb[44].mxu1 %vm1518_vm14, %v1517_v26 }
 0x609   :  { %v1566_v38 = vpop.f32.mrb[36].mxu1 }
 0x60a   :  { %v4932_v40 = vpop.f32.mrb[37].mxu1  ;;  %v1567_v16 = vadd.f32 %v1566_v38, %v6263_v2 }
 0x60b   :  { %v1569_v42 = vpop.f32.mrb[38].mxu1 }
 0x60c   :  { %v4933_v47 = vpop.f32.mrb[39].mxu1  ;;  %v1570_v20 = vadd.f32 %v1569_v42, %v6266_v7  ;;  %v1589_v26 = vsel %vm1588_vm15, %v1567_v16, -inf }
 0x60e   :  { %v1590_v30 = vsel %vm1588_vm15, %v1570_v20, -inf }
 0x611   :  { %v1574_v56 = vpop.f32.mrb[40].mxu1 }
 0x612   :  { %v1575_v59 = vadd.f32 %v1574_v56, %v6253_v51  ;;  %v4936_v62 = vpop.f32.mrb[41].mxu1 }
 0x613   :  { %v1577_v0 = vpop.f32.mrb[42].mxu1  ;;  %v6293_v62 = vld [vmem:[%s6951_s26] sm:$0xff]  }
 0x614   :  { %v1578_v4 = vadd.f32 %v1577_v0, %v6258_v54  ;;  %v4937_v5 = vpop.f32.mrb[43].mxu1  ;;  %v1591_v8 = vsel %vm1588_vm15, %v1575_v59, -inf  ;;  %4972 = vmatprep.mubr.msk.bf16.mxu1 %vm1740_vm2, %v6293_v62 }
 0x616   :  { %v1592_v11 = vsel %vm1588_vm15, %v1578_v4, -inf }
 0x617   :  { %v1597_v15 = vmax.f32 %v1591_v8, %v1592_v11 }
 0x619   :  { %v1582_v18 = vpop.f32.mrb[44].mxu1 }
 0x61a   :  { %v1583_v22 = vadd.f32 %v1582_v18, %v6270_v13  ;;  %v4940_v24 = vpop.f32.mrb[45].mxu1 }
 0x61b   :  { %v1585_v25 = vpop.f32.mrb[46].mxu1 }
 0x61c   :  { %v1594_v27 = vsel %vm1593_vm1, %v1583_v22, -inf  ;;  %v4941_v28 = vpop.f32.mrb[47].mxu1 }
 0x61d   :  { %v1595_v29 = vmax.f32 %v1589_v26, %v1594_v27 }
 0x61f   :  { %v1596_v31 = vmax.f32 %v1595_v29, %v1590_v30 }
 0x621   :  { %v1598_v32 = vmax.f32 %v1596_v31, %v1597_v15 }
 0x623   :  { %v1599_v33 = vrot.slane %v1598_v32, 4 }
 0x625   :  { %v1600_v34 = vmax.f32 %v1598_v32, %v1599_v33 }
 0x627   :  { %v1601_v37 = vrot.slane %v1600_v34, 2 }
 0x629   :  { %v1602_v38 = vmax.f32 %v1600_v34, %v1601_v37 }
 0x62b   :  { %v1603_v40 = vrot.slane %v1602_v38, 1 }
 0x62d   :  { %v1604_v41 = vmax.f32 %v1602_v38, %v1603_v40 }
 0x62f   :  { %v1605_v42 = vmul.f32 %v6248_v44, %v1604_v41  ;;  %v1606_v43 = vmul.f32 %v6251_v50, %v1604_v41  ;;  %v1607_v48 = vmul.f32 %v6241_v35, %v1604_v41  ;;  %v1608_v53 = vmul.f32 %v6243_v36, %v1604_v41 }
 0x630   :  { %v1609_v57 = vmul.f32 %v1604_v41, %v6255_v52 }
 0x631   :  { %v1610_v47 = vpack.c.bf16 %v1606_v43, %v1605_v42  ;;  %v1611_v56 = vpack.c.bf16 %v1608_v53, %v1607_v48  ;;  %v6305_v42 = vld [vmem:[%s6951_s26 + $0x8] ss:$0 sps:$4 sm:$0xff]   ;;  %v1028_v43 = vld [vmem:[%s6952_s28] sm:$0x3] }
 0x632   :  { %v1612_v59 = vpack.c.bf16 %v1609_v57, %v1609_v57 }
 0x633   :  { %4955 = vmatmul.mubr.msk.bf16.vlgmr.msra.gmra.mrb[40].mxu0 %vm1588_vm15, %v1610_v47  ;;  %v6314_v47 = vsel %vm1528_vm13, %v1028_v43, 0 }
 0x634   :  { %4958 = vmatprep.mubr.msk.bf16.mxu0 %vm5741_vm7, %v5740_v21  ;;  %4993 = vmatpush3.bf16.msra.mxu0 %v6314_v47 }
 0x635   :  { %5397 = vmatprep.subr.bf16.mxu0 %v5742_v46 }
 0x63b   :  { %4959 = vmatmul.mubr.msk.bf16.gmra.mrb[44].mxu0 %vm1588_vm15, %v1611_v56 }
 0x63c   :  { %4962 = vmatprep.mubr.msk.bf16.mxu0 %vm5741_vm7, %v5740_v21 }
 0x643   :  { %4963 = vmatmul.mubr.msk.bf16.gmra.mrb[48].mxu0 %vm1588_vm15, %v1612_v59 }
 0x644   :  { %4994 = vmatprep.mubr.msk.bf16.mxu0 %vm5741_vm7, %v5740_v21 }
 0x706   :  { %v1692_v63 = vpop.f32.mrb[40].mxu0 }
 0x707   :  { %v1714_v0 = vsub.f32 %v6205_v12, %v1692_v63  ;;  %v4956_v4 = vpop.f32.mrb[41].mxu0 }
 0x708   :  { %v1695_v5 = vpop.f32.mrb[42].mxu0 }
 0x709   :  { %v1719_v8 = vmul.f32 1.442695, %v1714_v0  ;;  %v1715_v11 = vsub.f32 %v6207_v14, %v1695_v5  ;;  %v4957_v15 = vpop.f32.mrb[43].mxu0 }
 0x70b   :  { %v1721_v16 = vmul.f32 1.442695, %v1715_v11  ;;  %5553 = vpow2.f32 %v1719_v8 }
 0x70d   :  { %5555 = vpow2.f32 %v1721_v16 }
 0x70e   :  { %v1700_v18 = vpop.f32.mrb[44].mxu0 }
 0x70f   :  { %v1716_v20 = vsub.f32 %v6214_v17, %v1700_v18  ;;  %v4960_v22 = vpop.f32.mrb[45].mxu0 }
 0x710   :  { %v1703_v24 = vpop.f32.mrb[46].mxu0 }
 0x711   :  { %v1723_v25 = vmul.f32 1.442695, %v1716_v20  ;;  %v1717_v26 = vsub.f32 %v6216_v19, %v1703_v24  ;;  %v4961_v27 = vpop.f32.mrb[47].mxu0 }
 0x713   :  { %v1725_v28 = vmul.f32 1.442695, %v1717_v26  ;;  %5557 = vpow2.f32 %v1723_v25 }
 0x715   :  { %5559 = vpow2.f32 %v1725_v28  ;;  %v5554_v12 = vpop.eup %5553 }
 0x716   :  { %v1708_v29 = vpop.f32.mrb[48].mxu0 }
 0x717   :  { %v5556_v30 = vpop.eup %5555  ;;  %v1718_v14 = vsub.f32 %v6223_v23, %v1708_v29  ;;  %v4964_v31 = vpop.f32.mrb[49].mxu0 }
 0x718   :  { %v1711_v32 = vpop.f32.mrb[50].mxu0  ;;  %v1729_v33 = vpack.c.bf16 %v5556_v30, %v5554_v12 }
 0x719   :  { %v1727_v34 = vmul.f32 1.442695, %v1718_v14  ;;  %v4965_v17 = vpop.f32.mrb[51].mxu0 }
 0x71a   :  { %4966 = vmatprep.subr.bf16.mxu1 %v1729_v33 }
 0x71b   :  { %5561 = vpow2.f32 %v1727_v34  ;;  %4967 = vmatpush3.bf16.msra.mxu1 %v1729_v33 }
 0x71d   :  { %v5558_v19 = vpop.eup %5557 }
 0x71f   :  { %v5560_v37 = vpop.eup %5559 }
 0x720   :  { %v1730_v38 = vpack.c.bf16 %v5560_v37, %v5558_v19 }
 0x722   :  { %4968 = vmatprep.subr.bf16.mxu1 %v1730_v38 }
 0x723   :  { %4969 = vmatpush3.bf16.msra.mxu1 %v1730_v38 }
 0x725   :  { %v5562_v40 = vpop.eup %5561 }
 0x726   :  { %v1731_v41 = vpack.c.bf16 %v5562_v40, %v5562_v40 }
 0x728   :  { %5475 = vmatprep.subr.msk.bf16.mxu1 %vm1528_vm13, %v1731_v41  ;;  %v1748_v23 = vsel %vm1528_vm13, %v1731_v41, 0 }
 0x729   :  { %4971 = vmatpush3.bf16.msra.mxu1 %v1748_v23 }
 0x72a   :  { %4976 = vmatprep.subr.bf16.mxu1 %v5740_v21 }
 0x72c   :  { %4973 = vmatmul.mubr.msk.bf16.vlgmr.msra.gmra.mrb[48].mxu1 %vm1740_vm2, %v6305_v42 }
 0x72d   :  { %4980 = vmatprep.mubr.msk.bf16.mxu1 %vm5741_vm7, %v5740_v21 }
 0x7ff   :  { %v4974_v48 = vpop.f32.mrb[48].mxu1 }
 0x800   :  { %v1793_v53 = vadd.f32 1e-16, %v4974_v48  ;;  %v1784_v56 = vpop.f32.mrb[49].mxu1 }
 0x801   :  { %v1785_v57 = vadd.f32 1e-16, %v1784_v56  ;;  %v4975_v59 = vpop.f32.mrb[50].mxu1 }
 0x802   :  { %v1787_v63 = vpop.f32.mrb[51].mxu1  ;;  %5563 = vrcp.f32 %v1793_v53 }
 0x803   :  { %v1788_v0 = vadd.f32 1e-16, %v1787_v63  ;;  %5565 = vrcp.f32 %v1785_v57  ;;  %v2032_v63 = vld [vmem:[%s6953_s2] sm:$0xff] }
 0x805   :  { %5567 = vrcp.f32 %v1788_v0  ;;  %v2033_v0 = vld [vmem:[%s6953_s2 + $0x8] sm:$0xff] }
 0x80c   :  { %v5564_v4 = vpop.eup %5563 }
 0x80d   :  { %v5566_v5 = vpop.eup %5565  ;;  %v1802_v15 = vpack.c.bf16 %v5564_v4, %v5564_v4  ;;  %v5398_v4 = vpack.c.bf16 %v2033_v0, %v2032_v63 }
 0x80f   :  { %v5568_v8 = vpop.eup %5567  ;;  %v1804_v16 = vsel %vm222_vm0, %v1802_v15, 0 }
 0x810   :  { %v1801_v11 = vpack.c.bf16 %v5568_v8, %v5566_v5  ;;  %v2034_v8 = vld [vmem:[%s6953_s2 + $0x10] sm:$0xff] }
 0x812   :  { %4977 = vmatpush3.bf16.msra.mxu1 %v1801_v11  ;;  %v2035_v11 = vld [vmem:[%s6953_s2 + $0x18] sm:$0xff] }
 0x813   :  { %4978 = vmatprep.subr.bf16.mxu1 %v5740_v21  ;;  %v5401_v15 = vpack.c.bf16 %v2035_v11, %v2034_v8 }
 0x816   :  { %4979 = vmatpush3.bf16.msra.mxu1 %v1804_v16 }
 0x819   :  { %4981 = vmatmul.mubr.msk.bf16.vlgmr.msra.gmra.mrb[52].mxu1 %vm1273_vm12, %v6128_v6 }
 0x81a   :  { %4984 = vmatprep.mubr.msk.bf16.mxu1 %vm5741_vm7, %v5740_v21 }
 0x821   :  { %4985 = vmatmul.mubr.msk.bf16.gmra.mrb[56].mxu1 %vm1273_vm12, %v6142_v9 }
 0x822   :  { %4988 = vmatprep.mubr.msk.bf16.mxu1 %vm5741_vm7, %v5740_v21 }
 0x829   :  { %4989 = vmatmul.mubr.msk.bf16.gmra.mrb[60].mxu1 %vm1273_vm12, %v6152_v10 }
 0x82a   :  { %5012 = vmatprep.mubr.msk.bf16.mxu1 %vm1740_vm2, %v6293_v62 }
 0x8ec   :  { %v1840_v18 = vpop.f32.mrb[52].mxu1 }
 0x8ed   :  { %v4982_v20 = vpop.f32.mrb[53].mxu1  ;;  %v1862_v24 = vmul.f32 %v5554_v12, %v1840_v18 }
 0x8ee   :  { %v1843_v22 = vpop.f32.mrb[54].mxu1 }
 0x8ef   :  { %v1863_v6 = vmul.f32 %v5556_v30, %v1843_v22  ;;  %v4983_v25 = vpop.f32.mrb[55].mxu1 }
 0x8f1   :  { %v1867_v26 = vpack.c.bf16 %v1863_v6, %v1862_v24 }
 0x8f3   :  { %4995 = vmatmul.mubr.msk.bf16.vlgmr.msra.gmra.mrb[52].mxu0 %vm1518_vm14, %v1867_v26 }
 0x8f4   :  { %v1848_v27 = vpop.f32.mrb[56].mxu1  ;;  %4998 = vmatprep.mubr.msk.bf16.mxu0 %vm5741_vm7, %v5740_v21  ;;  %5399 = vmatpush3.bf16.msra.mxu0 %v5398_v4 }
 0x8f5   :  { %v4986_v9 = vpop.f32.mrb[57].mxu1  ;;  %v1864_v29 = vmul.f32 %v5558_v19, %v1848_v27  ;;  %5400 = vmatprep.subr.bf16.mxu0 %v5742_v46 }
 0x8f6   :  { %v1851_v28 = vpop.f32.mrb[58].mxu1 }
 0x8f7   :  { %v1865_v10 = vmul.f32 %v5560_v37, %v1851_v28  ;;  %v4987_v14 = vpop.f32.mrb[59].mxu1  ;;  %v2029_v28 = vld [vmem:[%s6954_s7 + $0x8] sm:$0xff] }
 0x8f8   :  { %5402 = vmatpush3.bf16.msra.mxu0 %v5401_v15  ;;  %v2031_v14 = vld [vmem:[%s6954_s7 + $0x18] sm:$0xff] }
 0x8f9   :  { %v1868_v31 = vpack.c.bf16 %v1865_v10, %v1864_v29  ;;  %5403 = vmatprep.subr.bf16.mxu0 %v5742_v46  ;;  %v2030_v10 = vld [vmem:[%s6954_s7 + $0x10] sm:$0xff] }
 0x8fb   :  { %4999 = vmatmul.mubr.msk.bf16.gmra.mrb[56].mxu0 %vm1518_vm14, %v1868_v31 }
 0x8fc   :  { %v1856_v32 = vpop.f32.mrb[60].mxu1  ;;  %5002 = vmatprep.mubr.msk.bf16.mxu0 %vm5741_vm7, %v5740_v21 }
 0x8fd   :  { %v1866_v12 = vmul.f32 %v5562_v40, %v1856_v32  ;;  %v4990_v30 = vpop.f32.mrb[61].mxu1 }
 0x8fe   :  { %v1859_v33 = vpop.f32.mrb[62].mxu1 }
 0x8ff   :  { %v4991_v34 = vpop.f32.mrb[63].mxu1  ;;  %v1869_v17 = vpack.c.bf16 %v1866_v12, %v1866_v12  ;;  %v5407_v12 = vpack.c.bf16 %v2031_v14, %v2030_v10 }
 0x903   :  { %5003 = vmatmul.mubr.msk.bf16.gmra.mrb[60].mxu0 %vm1518_vm14, %v1869_v17 }
 0x904   :  { %5024 = vmatprep.mubr.msk.f32.mxu0 %vm5741_vm7, %v5740_v21 }
 0x9c6   :  { %v1916_v19 = vpop.f32.mrb[52].mxu0 }
 0x9c7   :  { %1943 = vrot.lane.b32.xlu1 %v1916_v19, %s5744_s1  ;;  %v4996_v37 = vpop.f32.mrb[53].mxu0 }
 0x9c8   :  { %v1919_v38 = vpop.f32.mrb[54].mxu0 }
 0x9c9   :  { %v4997_v41 = vpop.f32.mrb[55].mxu0 }
 0x9cb   :  { %1945 = vrot.lane.b32.xlu1 %v1919_v38, %s5744_s1  ;;  %v5745_v38 = vmov 0  }
 0x9cc   :  { %5535 = vset.pattern.permute.xlu1 %v5745_v38  ;;  %5536 = vset.pattern.permute.xlu0 %v5745_v38 }
 0x9ce   :  { %v1924_v40 = vpop.f32.mrb[56].mxu0 }
 0x9cf   :  { %1947 = vrot.lane.b32.xlu0 %v1924_v40, %s5744_s1  ;;  %v5000_v23 = vpop.f32.mrb[57].mxu0 }
 0x9d0   :  { %v1927_v43 = vpop.f32.mrb[58].mxu0 }
 0x9d1   :  { %1949 = vrot.lane.b32.xlu1 %v1927_v43, %s5744_s1  ;;  %v5001_v48 = vpop.f32.mrb[59].mxu0 }
 0x9d6   :  { %v1932_v53 = vpop.f32.mrb[60].mxu0 }
 0x9d7   :  { %1951 = vrot.lane.b32.xlu0 %v1932_v53, %s5744_s1  ;;  %v5004_v56 = vpop.f32.mrb[61].mxu0 }
 0x9d8   :  { %v1935_v57 = vpop.f32.mrb[62].mxu0 }
 0x9d9   :  { %v5005_v59 = vpop.f32.mrb[63].mxu0 }
 0xa39   :  { %v1944_v5 = vpop.permute.xlu1 %1943 }
 0xa3a   :  { %v1958_v18 = vmul.f32 %v1944_v5, %v6181_v45 }
 0xa3d   :  { %v1946_v16 = vpop.permute.xlu1 %1945 }
 0xa3e   :  { %v1959_v20 = vmul.f32 %v1946_v16, %v6183_v49 }
 0xa40   :  { %v1963_v22 = vpack.c.bf16 %v1959_v20, %v1958_v18 }
 0xa41   :  { %v1948_v24 = vpop.permute.xlu0 %1947 }
 0xa42   :  { %1969 = vrot.lane.b32.xlu1 %v1963_v22, %s5743_s6  ;;  %v1960_v25 = vmul.f32 %v1948_v24, %v6187_v55 }
 0xa43   :  { %v1950_v6 = vpop.permute.xlu1 %1949 }
 0xa44   :  { %v1961_v26 = vmul.f32 %v1950_v6, %v6192_v58  ;;  %v2028_v58 = vld [vmem:[%s6954_s7] sm:$0xff] }
 0xa46   :  { %v1964_v27 = vpack.c.bf16 %v1961_v26, %v1960_v25 }
 0xa48   :  { %1971 = vrot.lane.b32.xlu0 %v1964_v27, %s5743_s6 }
 0xa49   :  { %v1952_v9 = vpop.permute.xlu0 %1951 }
 0xa4a   :  { %v1962_v45 = vmul.f32 %v1952_v9, %v6196_v3  ;;  %v5404_v3 = vpack.c.bf16 %v2029_v28, %v2028_v58 }
 0xa4c   :  { %v1965_v49 = vpack.c.bf16 %v1962_v45, %v1962_v45  ;;  %2039 = vrot.lane.b32.xlu0 %v6111_v60, %s5744_s1 }
 0xa4e   :  { %1973 = vrot.lane.b32.xlu1 %v1965_v49, %s5743_s6 }
 0xa50   :  { %2043 = vrot.lane.b32.xlu0 %v6119_v1, %s5744_s1 }
 0xa52   :  { %2041 = vrot.lane.b32.xlu1 %v6114_v61, %s5744_s1 }
 0xab4   :  { %v1970_v55 = vpop.permute.xlu1 %1969 }
 0xab5   :  { %5006 = vmatprep.subr.bf16.mxu1 %v1970_v55 }
 0xab6   :  { %5007 = vmatpush3.bf16.msra.mxu1 %v1970_v55 }
 0xaba   :  { %v1972_v29 = vpop.permute.xlu0 %1971 }
 0xabb   :  { %5008 = vmatprep.subr.bf16.mxu1 %v1972_v29 }
 0xabc   :  { %5009 = vmatpush3.bf16.msra.mxu1 %v1972_v29 }
 0xabe   :  { %v2040_v31 = vpop.permute.xlu0 %2039 }
 0xabf   :  { %5025 = vmatmul.mubr.msk.f32.vlgmr.msra.gmra.mrb[64].mxu0 %vm314_vm6, %v2040_v31 }
 0xac0   :  { %v1974_v32 = vpop.permute.xlu1 %1973  ;;  %5027 = vmatprep.mubr.msk.f32.mxu0 %vm5741_vm7, %v5740_v21  ;;  %5405 = vmatpush3.bf16.msra.mxu0 %v5404_v3 }
 0xac1   :  { %v1978_v30 = vsel %vm1528_vm13, %v1974_v32, 0  ;;  %5476 = vmatprep.subr.msk.bf16.mxu1 %vm1528_vm13, %v1974_v32  ;;  %5406 = vmatprep.subr.bf16.mxu0 %v5742_v46 }
 0xac2   :  { %5011 = vmatpush3.bf16.msra.mxu1 %v1978_v30  ;;  %v2044_v34 = vpop.permute.xlu0 %2043 }
 0xac3   :  { %5409 = vmatprep.subr.bf16.mxu1 %v5742_v46 }
 0xac4   :  { %v2042_v33 = vpop.permute.xlu1 %2041  ;;  %5408 = vmatpush3.bf16.msra.mxu0 %v5407_v12 }
 0xac5   :  { %5013 = vmatmul.mubr.msk.bf16.vlgmr.msra.gmra.mrb[64].mxu1 %vm1740_vm2, %v6305_v42  ;;  %5028 = vmatmul.mubr.msk.f32.gmra.mrb[66].mxu0 %vm314_vm6, %v2042_v33 }
 0xac6   :  { %5030 = vmatprep.mubr.msk.f32.mxu0 %vm5741_vm7, %v5740_v21  ;;  %5058 = vmatprep.mubr.msk.f32.mxu1 %vm5741_vm7, %v5740_v21 }
 0xac7   :  { %5090 = vmatprep.subr.bf16.mxu0 %v5740_v21 }
 0xac9   :  { %5031 = vmatmul.mubr.msk.f32.gmra.mrb[68].mxu0 %vm314_vm6, %v2044_v34 }
 0xaca   :  { %5041 = vmatprep.mubr.msk.f32.mxu0 %vm5741_vm7, %v5740_v21 }
 0xb98   :  { %v5014_v17 = vpop.f32.mrb[64].mxu1 }
 0xb99   :  { %v2014_v19 = vpop.f32.mrb[65].mxu1 }
 0xb9a   :  { %v5015_v37 = vpop.f32.mrb[66].mxu1  ;;  %5042 = vmatmul.mubr.msk.f32.vlgmr.msra.gmra.mrb[64].mxu0 %vm314_vm6, %v2014_v19 }
 0xb9b   :  { %v2017_v42 = vpop.f32.mrb[67].mxu1  ;;  %5044 = vmatprep.mubr.msk.f32.mxu0 %vm5741_vm7, %v5740_v21 }
 0xb9e   :  { %5045 = vmatmul.mubr.msk.f32.gmra.mrb[66].mxu0 %vm314_vm6, %v2017_v42 }
 0xb9f   :  { %5047 = vmatprep.mubr.msk.f32.mxu0 %vm5741_vm7, %v5740_v21 }
 0xba2   :  { %5048 = vmatmul.mubr.msk.f32.gmra.mrb[68].mxu0 %vm314_vm6, %v5014_v17 }
 0xba3   :  { %5094 = vmatprep.mubr.msk.bf16.mxu0 %vm5741_vm7, %v5740_v21 }
 0xc6d   :  { %v2206_v41 = vpop.f32.mrb[64].mxu0 }
 0xc6e   :  { %v4440_v40 = vmul.f32 -1.442695, %v2206_v41  ;;  %v5043_v23 = vpop.f32.mrb[65].mxu0 }
 0xc70   :  { %5569 = vpow2.f32 %v4440_v40 }
 0xc71   :  { %v2211_v43 = vpop.f32.mrb[66].mxu0 }
 0xc72   :  { %v4441_v48 = vmul.f32 -1.442695, %v2211_v43  ;;  %v5046_v53 = vpop.f32.mrb[67].mxu0 }
 0xc74   :  { %5571 = vpow2.f32 %v4441_v48 }
 0xc75   :  { %v2216_v56 = vpop.f32.mrb[68].mxu0 }
 0xc76   :  { %v4442_v57 = vmul.f32 -1.442695, %v2216_v56  ;;  %v5049_v59 = vpop.f32.mrb[69].mxu0 }
 0xc78   :  { %5573 = vpow2.f32 %v4442_v57 }
 0xc7a   :  { %v5570_v63 = vpop.eup %5569 }
 0xc7b   :  { %v2229_v0 = vadd.f32 1.0, %v5570_v63 }
 0xc7d   :  { %5575 = vrcp.f32 %v2229_v0 }
 0xc7e   :  { %v5572_v4 = vpop.eup %5571 }
 0xc7f   :  { %v2230_v5 = vadd.f32 1.0, %v5572_v4 }
 0xc81   :  { %5577 = vrcp.f32 %v2230_v5 }
 0xc82   :  { %v5574_v8 = vpop.eup %5573 }
 0xc83   :  { %v2231_v11 = vadd.f32 1.0, %v5574_v8 }
 0xc85   :  { %5579 = vrcp.f32 %v2231_v11 }
 0xc87   :  { %v5576_v15 = vpop.eup %5575 }
 0xc88   :  { %v2256_v16 = vsub.f32 1.0, %v5576_v15 }
 0xc8a   :  { %2261 = vperm.xlu1 %5535, %v2256_v16  }
 0xc8b   :  { %v5578_v18 = vpop.eup %5577 }
 0xc8c   :  { %v2257_v20 = vsub.f32 1.0, %v5578_v18 }
 0xc8e   :  { %2266 = vperm.xlu0 %5536, %v2257_v20  }
 0xc8f   :  { %v5580_v22 = vpop.eup %5579 }
 0xc90   :  { %v2258_v24 = vsub.f32 1.0, %v5580_v22 }
 0xc92   :  { %2245 = vperm.xlu0 %5536, %v5578_v18   ;;  %2271 = vperm.xlu1 %5535, %v2258_v24   ;;  %v5746_v24 = vmov 1966171168  }
 0xc96   :  { %2240 = vperm.xlu1 %5535, %v5576_v15  }
 0xc9a   :  { %2250 = vperm.xlu1 %5535, %v5580_v22  }
 0xd09   :  { %v2262_v6 = vpop.permute.xlu1 %2261 }
 0xd0a   :  { %v2274_v25 = vmul.f32 %v2262_v6, %v2014_v19  ;;  %v2328_v6 = vunpack.c.l.s4 %v5746_v24 }
 0xd0c   :  { %2280 = vrot.lane.b32.xlu0 %v2274_v25, %s5743_s6  ;;  %v2330_v25 = vlaneseq }
 0xd0d   :  { %v2267_v26 = vpop.permute.xlu0 %2266 }
 0xd0e   :  { %v2275_v27 = vmul.f32 %v2267_v26, %v2017_v42  ;;  %v2329_v26 = vunpack.c.0.s8 %v2328_v6 }
 0xd10   :  { %2282 = vrot.lane.b32.xlu1 %v2275_v27, %s5743_s6  ;;  %v2331_v27 = vshrl.u32 %v2330_v25, 7  ;;  %v4448_v25 = vld [vmem:[%s6945_s24 + $0x1] ss:$0 sm:$0xff] }
 0xd11   :  { %v2272_v9 = vpop.permute.xlu1 %2271  ;;  %v2246_v55 = vpop.permute.xlu0 %2245 }
 0xd12   :  { %v2276_v45 = vmul.f32 %v5014_v17, %v2272_v9  ;;  %v2254_v3 = vmul.f32 %v2246_v55, %v6114_v61  ;;  %v6424_v9 = vsub.s32 %v2329_v26, %v2331_v27 }
 0xd14   :  { %2284 = vrot.lane.b32.xlu0 %v2276_v45, %s5743_s6 }
 0xd15   :  { %v2241_v49 = vpop.permute.xlu1 %2240 }
 0xd16   :  { %v2253_v29 = vmul.f32 %v2241_v49, %v6111_v60 }
 0xd19   :  { %v2251_v58 = vpop.permute.xlu1 %2250 }
 0xd1a   :  { %v2255_v32 = vmul.f32 %v2251_v58, %v6119_v1  ;;  %v2323_v58 = vld [vmem:[%s6955_s10] sm:$0x1] }
 0xd7e   :  { %v2281_v28 = vpop.permute.xlu0 %2280 }
 0xd7f   :  { %v6402_v10 = vadd.f32 %v2281_v28, %v2253_v29  ;;  %v6430_v28 = vsub.s32 0, %v2331_v27 }
 0xd81   :  { %v2306_v12 = vmul.f32 %v6402_v10, %v6402_v10  ;;  %v2293_v61 = vsel %vm2292_vm3, %v6402_v10, 0.0 }
 0xd82   :  { %v2283_v14 = vpop.permute.xlu1 %2282 }
 0xd83   :  { %v6404_v31 = vadd.f32 %v2283_v14, %v2254_v3  ;;  %v2309_v1 = vsel %vm2292_vm3, %v2306_v12, 0.0 }
 0xd85   :  { %v2294_v30 = vsel %vm2292_vm3, %v6404_v31, 0.0  ;;  %v2307_v33 = vmul.f32 %v6404_v31, %v6404_v31 }
 0xd86   :  { %v2285_v60 = vpop.permute.xlu0 %2284  ;;  %v2295_v19 = vadd.f32 %v2294_v30, %v2293_v61  ;;  %v4443_v61 = vld [vmem:[%s6940_s17 + $0x20] sm:$0xff] }
 0xd87   :  { %v2310_v34 = vsel %vm2292_vm3, %v2307_v33, 0.0  ;;  %v6416_v17 = vadd.f32 %v2285_v60, %v2255_v32  ;;  %v2356_v60 = vld [vmem:[%s6956_s11] sm:$0x1] }
 0xd88   :  { %v2311_v38 = vadd.f32 %v2310_v34, %v2309_v1  ;;  %v4444_v34 = vld [vmem:[%s6940_s17 + $0x28] sm:$0xff] }
 0xd89   :  { %v2296_v37 = vsel %vm2292_vm3, %v6416_v17, 0.0  ;;  %v2308_v42 = vmul.f32 %v6416_v17, %v6416_v17  ;;  %v5410_v1 = vpack.c.bf16 %v4444_v34, %v4443_v61  ;;  %v6499_v61 = vld [vmem:[%s6946_s30] sm:$0xff]  }
 0xd8a   :  { %v2297_v41 = vadd.f32 %v2296_v37, %v2295_v19  ;;  %v4445_v19 = vld [vmem:[%s6940_s17 + $0x30] sm:$0xff]  ;;  %v4446_v37 = vld [vmem:[%s6940_s17 + $0x38] sm:$0xff]  ;;  %v5629_v34 = vld [vmem:[%s6947_s12] sm:$0xff]   ;;  %s5747_s17 = smov [#allocation7]  }
 0xd8b   :  { %v2312_v40 = vsel %vm2292_vm3, %v2308_v42, 0.0  ;;  %5411 = vmatpush3.bf16.msra.mxu1 %v5410_v1  ;;  %s4295_s21 = sshll.u32 %s5747_s17, 4  ;;  %s4296_s21 = int_to_ptr.vmem [resolvable:$true] %s4295_s21 }
 0xd8c   :  { %v2298_v23 = vrot.slane %v2297_v41, 4  ;;  %v2313_v43 = vadd.f32 %v2312_v40, %v2311_v38  ;;  %5412 = vmatprep.subr.bf16.mxu1 %v5742_v46  ;;  %p5671_p9 = scmp.lt.s32.totalorder %s4296_s21, %s4296_s21 }
 0xd8e   :  { %v2299_v48 = vadd.f32 %v2298_v23, %v2297_v41  ;;  %v2314_v53 = vrot.slane %v2313_v43, 4  ;;  %v5413_v41 = vpack.c.bf16 %v4446_v37, %v4445_v19  ;;  %v5630_v37 = vld [vmem:[%s6947_s12 + $0x8] sm:$0xff]  }
 0xd90   :  { %v2300_v56 = vrot.slane %v2299_v48, 2  ;;  %v2315_v57 = vadd.f32 %v2314_v53, %v2313_v43  ;;  %5414 = vmatpush3.bf16.msra.mxu1 %v5413_v41  ;;  %v6510_v41 = vld [vmem:[%s6946_s30 + $0x8] sm:$0xff]  }
 0xd91   :  { %5415 = vmatprep.subr.bf16.mxu1 %v5742_v46 }
 0xd92   :  { %v2301_v59 = vadd.f32 %v2300_v56, %v2299_v48  ;;  %v2316_v63 = vrot.slane %v2315_v57, 2 }
 0xd94   :  { %v2302_v0 = vrot.slane %v2301_v59, 1  ;;  %v2317_v4 = vadd.f32 %v2316_v63, %v2315_v57  ;;  %v4452_v63 = vld [vmem:[%s6942_s25 + $0x20] sm:$0xff] }
 0xd96   :  { %v2303_v5 = vadd.f32 %v2302_v0, %v2301_v59  ;;  %v2318_v8 = vrot.slane %v2317_v4, 1  ;;  %v4453_v0 = vld [vmem:[%s6942_s25 + $0x28] sm:$0xff] }
 0xd98   :  { %v2305_v11 = vmul.f32 0.041666668, %v2303_v5  ;;  %v2319_v15 = vadd.f32 %v2318_v8, %v2317_v4  ;;  %v5416_v4 = vpack.c.bf16 %v4453_v0, %v4452_v63  ;;  %v4454_v5 = vld [vmem:[%s6942_s25 + $0x30] sm:$0xff]  ;;  %v4455_v8 = vld [vmem:[%s6942_s25 + $0x38] sm:$0xff]  ;;  %s5666_s25 = scalar_lea.vmem %s4296_s21, 32 }
 0xd99   :  { %v5635_v63 = vld [vmem:[%s6948_s20 + $0x10] ss:$0 sps:$4 sm:$0x33]   ;;  %p5667_p8 = scmp.ne.s32.totalorder %s4296_s21, %s5666_s25  ;;  %p5672_p10 = scmp.lt.s32.totalorder %s5666_s25, %s5666_s25 }
 0xd9a   :  { %v2320_v16 = vmul.f32 0.041666668, %v2319_v15  ;;  %v2321_v18 = vmul.f32 %v2305_v11, %v2305_v11  ;;  %v5623_v15 = vld [vmem:[#allocation3] sm:$0xff] }
 0xd9b   :  { %p5673_p11 = por %p5672_p10, %p5671_p9 }
 0xd9c   :  { %v2322_v20 = vsub.f32 %v2320_v16, %v2321_v18  ;;  %v5624_v16 = vld [vmem:[#allocation3 + $0x8] sm:$0xff]  ;;  %v5625_v18 = vld [vmem:[#allocation3 + $0x10] sm:$0xff] }
 0xd9d   :  { %p5674_p12 = pnand %p5673_p11, %p5667_p8 }
 0xd9e   :  { %v2324_v22 = vadd.f32 1e-05, %v2322_v20  ;;  %v5626_v20 = vld [vmem:[#allocation3 + $0x18] sm:$0xff] }
 0xda0   :  { %5581 = vrsqrt.f32 %v2324_v22  ;;  %v5627_v22 = vld [vmem:[#allocation3 + $0x20] sm:$0xf] }
 0xdaa   :  { %v5582_v45 = vpop.eup %5581 }
 0xdab   :  { %v2333_v49 = vrot.slane %v5582_v45, %v6424_v9 }
 0xdad   :  { %v2340_v55 = vrot.slane %v2333_v49, %v6424_v9 }
 0xdaf   :  { %2341 = vrot.lane.b32.xlu1 %v2340_v55, %s5744_s1 }
 0xe21   :  { %v2342_v29 = vpop.permute.xlu1 %2341 }
 0xe22   :  { %v2344_v3 = vmul.f32 %v2342_v29, %v2323_v58 }
 0xe24   :  { %v2349_v14 = vrot.slane %v2344_v3, %v6430_v28 }
 0xe26   :  { %2350 = vrot.lane.b32.xlu0 %v2349_v14, %s5743_s6 }
 0xe98   :  { %v2351_v32 = vpop.permute.xlu0 %2350 }
 0xe99   :  { %v2357_v12 = vmul.f32 %v2351_v32, %v2305_v11  ;;  %v2353_v23 = vmul.f32 %v2351_v32, %v6402_v10  ;;  %v2354_v43 = vmul.f32 %v2351_v32, %v6404_v31  ;;  %v2355_v57 = vmul.f32 %v2351_v32, %v6416_v17 }
 0xe9a   :  { %v5419_v31 = vpack.c.bf16 %v4455_v8, %v4454_v5 }
 0xe9b   :  { %v2365_v30 = vrot.slane %v2357_v12, %v6424_v9 }
 0xe9d   :  { %v2372_v33 = vrot.slane %v2365_v30, %v6424_v9 }
 0xe9f   :  { %2373 = vrot.lane.b32.xlu1 %v2372_v33, %s5744_s1 }
 0xf11   :  { %v2374_v42 = vpop.permute.xlu1 %2373 }
 0xf12   :  { %v2376_v38 = vsub.f32 %v2356_v60, %v2374_v42 }
 0xf14   :  { %v2381_v40 = vrot.slane %v2376_v38, %v6430_v28 }
 0xf16   :  { %2382 = vrot.lane.b32.xlu0 %v2381_v40, %s5743_s6 }
 0xf88   :  { %v2383_v48 = vpop.permute.xlu0 %2382 }
 0xf89   :  { %v2385_v53 = vadd.f32 %v2383_v48, %v2353_v23  ;;  %v2386_v56 = vadd.f32 %v2383_v48, %v2354_v43  ;;  %v2387_v59 = vadd.f32 %v2383_v48, %v2355_v57  ;;  %v6517_v43 = vld [vmem:[%s6946_s30 + $0x10] ss:$0 sps:$4 sm:$0x33]   ;;  %v5633_v57 = vld [vmem:[%s6948_s20] sm:$0xff]  }
 0xf8b   :  { %2406 = vrot.lane.b32.xlu0 %v2386_v56, %s5744_s1  ;;  %2404 = vrot.lane.b32.xlu1 %v2385_v53, %s5744_s1 }
 0xf8f   :  { %2408 = vrot.lane.b32.xlu1 %v2387_v59, %s5744_s1  ;;  %v5634_v59 = vld [vmem:[%s6948_s20 + $0x8] sm:$0xff]  }
 0xffd   :  { %v2405_v10 = vpop.permute.xlu1 %2404  ;;  %v2407_v17 = vpop.permute.xlu0 %2406 }
 0xffe   :  { %5059 = vmatmul.mubr.msk.f32.vlgmr.msra.gmra.mrb[68].mxu1 %vm314_vm6, %v2405_v10 }
 0xfff   :  { %5061 = vmatprep.mubr.msk.f32.mxu1 %vm5741_vm7, %v5740_v21  ;;  %5417 = vmatpush3.bf16.msra.mxu1 %v5416_v4 }
0x1000   :  { %5418 = vmatprep.subr.bf16.mxu1 %v5742_v46 }
0x1001   :  { %v2409_v11 = vpop.permute.xlu1 %2408 }
0x1002   :  { %5062 = vmatmul.mubr.msk.f32.gmra.mrb[70].mxu1 %vm314_vm6, %v2407_v17 }
0x1003   :  { %5064 = vmatprep.mubr.msk.f32.mxu1 %vm5741_vm7, %v5740_v21  ;;  %5420 = vmatpush3.bf16.msra.mxu1 %v5419_v31 }
0x1004   :  { %5106 = vmatprep.subr.bf16.mxu1 %v5740_v21 }
0x1006   :  { %5065 = vmatmul.mubr.msk.f32.gmra.mrb[72].mxu1 %vm314_vm6, %v2409_v11 }
0x1007   :  { %5075 = vmatprep.mubr.msk.f32.mxu1 %vm5741_vm7, %v5740_v21 }
0x100a   :  { %5076 = vmatmul.mubr.msk.f32.vlgmr.msra.gmra.mrb[74].mxu1 %vm314_vm6, %v5623_v15 }
0x100b   :  { %5078 = vmatprep.mubr.msk.f32.mxu1 %vm5741_vm7, %v5740_v21 }
0x100e   :  { %5079 = vmatmul.mubr.msk.f32.gmra.mrb[76].mxu1 %vm314_vm6, %v5624_v16 }
0x100f   :  { %5081 = vmatprep.mubr.msk.f32.mxu1 %vm5741_vm7, %v5740_v21 }
0x1012   :  { %5082 = vmatmul.mubr.msk.f32.gmra.mrb[78].mxu1 %vm314_vm6, %v5625_v18 }
0x1013   :  { %5084 = vmatprep.mubr.msk.f32.mxu1 %vm5741_vm7, %v5740_v21 }
0x1016   :  { %5085 = vmatmul.mubr.msk.f32.gmra.mrb[80].mxu1 %vm314_vm6, %v5626_v20 }
0x1017   :  { %5087 = vmatprep.mubr.msk.f32.mxu1 %vm5741_vm7, %v5740_v21 }
0x101a   :  { %5088 = vmatmul.mubr.msk.f32.gmra.mrb[82].mxu1 %vm314_vm6, %v5627_v22 }
0x101b   :  { %5110 = vmatprep.mubr.msk.bf16.mxu1 %vm5741_vm7, %v5740_v21 }
0x10d1   :  { %v2482_v24 = vpop.f32.mrb[68].mxu1 }
0x10d2   :  { %v5060_v6 = vpop.f32.mrb[69].mxu1  ;;  %v6483_v27 = vadd.f32 %v4448_v25, %v2482_v24 }
0x10d5   :  { %v2487_v26 = vpop.f32.mrb[70].mxu1 }
0x10d6   :  { %v6485_v45 = vadd.f32 %v4448_v25, %v2487_v26  ;;  %v5063_v49 = vpop.f32.mrb[71].mxu1 }
0x10d8   :  { %v2591_v55 = vpack.c.bf16 %v6485_v45, %v6483_v27 }
0x10d9   :  { %v2492_v58 = vpop.f32.mrb[72].mxu1 }
0x10da   :  { %v6489_v29 = vadd.f32 %v4448_v25, %v2492_v58  ;;  %2654 = vrot.lane.b32.xlu0 %v2591_v55, %s5743_s6  ;;  %v5066_v3 = vpop.f32.mrb[73].mxu1  ;;  %5091 = vmatpush3.bf16.msra.mxu0 %v2591_v55 }
0x10db   :  { %5092 = vmatprep.subr.bf16.mxu0 %v5740_v21 }
0x10dc   :  { %v2592_v14 = vpack.c.bf16 %v6489_v29, %v6489_v29 }
0x10dd   :  { %v2567_v32 = vpop.f32.mrb[74].mxu1 }
0x10de   :  { %2656 = vrot.lane.b32.xlu1 %v2592_v14, %s5743_s6  ;;  %v5077_v12 = vpop.f32.mrb[75].mxu1  ;;  %v2594_v30 = vsel %vm222_vm0, %v2592_v14, 0 }
0x10df   :  { %5093 = vmatpush3.bf16.msra.mxu0 %v2594_v30 }
0x10e0   :  { %5122 = vmatprep.subr.bf16.mxu0 %v5740_v21 }
0x10e1   :  { %v2572_v33 = vpop.f32.mrb[76].mxu1 }
0x10e2   :  { %v5080_v60 = vpop.f32.mrb[77].mxu1  ;;  %5095 = vmatmul.mubr.msk.bf16.vlgmr.msra.gmra.mrb[72].mxu0 %vm1273_vm12, %v6499_v61 }
0x10e3   :  { %5098 = vmatprep.mubr.msk.bf16.mxu0 %vm5741_vm7, %v5740_v21  ;;  %5123 = vmatpush3.bf16.msra.mxu0 %v5629_v34 }
0x10e4   :  { %5124 = vmatprep.subr.bf16.mxu0 %v5740_v21 }
0x10e5   :  { %v2577_v19 = vpop.f32.mrb[78].mxu1 }
0x10e6   :  { %v5083_v1 = vpop.f32.mrb[79].mxu1 }
0x10e7   :  { %5125 = vmatpush3.bf16.msra.mxu0 %v5630_v37  ;;  %v5637_v1 = vld [vmem:[%s6949_s27 + $0x8] sm:$0xff]  }
0x10e8   :  { %5152 = vmatprep.subr.bf16.mxu0 %v5740_v21 }
0x10e9   :  { %v2582_v42 = vpop.f32.mrb[80].mxu1 }
0x10ea   :  { %v5086_v38 = vpop.f32.mrb[81].mxu1  ;;  %5099 = vmatmul.mubr.msk.bf16.gmra.mrb[76].mxu0 %vm1273_vm12, %v6510_v41 }
0x10eb   :  { %5102 = vmatprep.mubr.msk.bf16.mxu0 %vm5741_vm7, %v5740_v21 }
0x10ed   :  { %v2587_v40 = vpop.f32.mrb[82].mxu1 }
0x10ee   :  { %v5089_v23 = vpop.f32.mrb[83].mxu1 }
0x10f2   :  { %5103 = vmatmul.mubr.msk.bf16.gmra.mrb[80].mxu0 %vm1273_vm12, %v6517_v43 }
0x10f3   :  { %5126 = vmatprep.mubr.msk.bf16.mxu0 %vm5741_vm7, %v5740_v21 }
0x114c   :  { %v2655_v48 = vpop.permute.xlu0 %2654 }
0x114d   :  { %5107 = vmatpush3.bf16.msra.mxu1 %v2655_v48 }
0x114e   :  { %5108 = vmatprep.subr.bf16.mxu1 %v5740_v21 }
0x1150   :  { %v2657_v53 = vpop.permute.xlu1 %2656 }
0x1151   :  { %v2660_v56 = vsel %vm222_vm0, %v2657_v53, 0  ;;  %v5638_v53 = vld [vmem:[%s6949_s27 + $0x10] sm:$0xff]  }
0x1152   :  { %5109 = vmatpush3.bf16.msra.mxu1 %v2660_v56 }
0x1153   :  { %5138 = vmatprep.subr.bf16.mxu1 %v5740_v21 }
0x1155   :  { %5111 = vmatmul.mubr.msk.bf16.vlgmr.msra.gmra.mrb[84].mxu1 %vm1273_vm12, %v5633_v57 }
0x1156   :  { %5114 = vmatprep.mubr.msk.bf16.mxu1 %vm5741_vm7, %v5740_v21  ;;  %5139 = vmatpush3.bf16.msra.mxu1 %v6178_v39 }
0x115d   :  { %5115 = vmatmul.mubr.msk.bf16.gmra.mrb[88].mxu1 %vm1273_vm12, %v5634_v59  ;;  %v5639_v59 = vld [vmem:[%s6949_s27 + $0x18] sm:$0xff]  }
0x115e   :  { %5118 = vmatprep.mubr.msk.bf16.mxu1 %vm5741_vm7, %v5740_v21 }
0x1165   :  { %5119 = vmatmul.mubr.msk.bf16.gmra.mrb[92].mxu1 %vm1273_vm12, %v5635_v63 }
0x1166   :  { %5140 = vmatprep.mubr.msk.bf16.mxu1 %vm5741_vm7, %v5740_v21 }
0x11b5   :  { %v2630_v0 = vpop.f32.mrb[72].mxu0 }
0x11b6   :  { %v5096_v4 = vpop.f32.mrb[73].mxu0 }
0x11b7   :  { %v2633_v5 = vpop.f32.mrb[74].mxu0 }
0x11b8   :  { %v5097_v8 = vpop.f32.mrb[75].mxu0 }
0x11bd   :  { %v2638_v10 = vpop.f32.mrb[76].mxu0 }
0x11be   :  { %v5100_v31 = vpop.f32.mrb[77].mxu0 }
0x11bf   :  { %v2641_v17 = vpop.f32.mrb[78].mxu0 }
0x11c0   :  { %v5101_v39 = vpop.f32.mrb[79].mxu0 }
0x11c5   :  { %v2646_v11 = vpop.f32.mrb[80].mxu0 }
0x11c6   :  { %v5104_v15 = vpop.f32.mrb[81].mxu0 }
0x11c7   :  { %v2649_v16 = vpop.f32.mrb[82].mxu0 }
0x11c8   :  { %v5105_v18 = vpop.f32.mrb[83].mxu0 }
0x1228   :  { %v2696_v20 = vpop.f32.mrb[84].mxu1 }
0x1229   :  { %v6539_v22 = vadd.f32 %v2696_v20, %v2567_v32  ;;  %v5112_v24 = vpop.f32.mrb[85].mxu1  ;;  %v5636_v32 = vld [vmem:[%s6949_s27] sm:$0xff]  }
0x122a   :  { %v2699_v6 = vpop.f32.mrb[86].mxu1 }
0x122b   :  { %v6541_v25 = vadd.f32 %v2699_v6, %v2572_v33  ;;  %v5113_v26 = vpop.f32.mrb[87].mxu1  ;;  %v2718_v49 = vmul.f32 %v6539_v22, %v2630_v0  ;;  %v5641_v0 = vld [vmem:[%s6949_s27 + $0x28] sm:$0xff]  }
0x122d   :  { %v2719_v55 = vmul.f32 %v6541_v25, %v2633_v5 }
0x122f   :  { %v2723_v58 = vpack.c.bf16 %v2719_v55, %v2718_v49 }
0x1230   :  { %v2704_v3 = vpop.f32.mrb[88].mxu1 }
0x1231   :  { %v6545_v14 = vadd.f32 %v2704_v3, %v2577_v19  ;;  %v5116_v12 = vpop.f32.mrb[89].mxu1  ;;  %5127 = vmatmul.mubr.msk.bf16.vlgmr.msra.gmra.mrb[84].mxu0 %vm314_vm6, %v2723_v58 }
0x1232   :  { %v2707_v30 = vpop.f32.mrb[90].mxu1  ;;  %5130 = vmatprep.mubr.msk.bf16.mxu0 %vm5741_vm7, %v5740_v21  ;;  %5153 = vmatpush3.bf16.msra.mxu0 %v5636_v32 }
0x1233   :  { %v6551_v33 = vadd.f32 %v2707_v30, %v2582_v42  ;;  %v5117_v60 = vpop.f32.mrb[91].mxu1  ;;  %5154 = vmatprep.subr.bf16.mxu0 %v5740_v21  ;;  %v2720_v34 = vmul.f32 %v6545_v14, %v2638_v10 }
0x1235   :  { %v2721_v19 = vmul.f32 %v6551_v33, %v2641_v17 }
0x1236   :  { %5155 = vmatpush3.bf16.msra.mxu0 %v5637_v1 }
0x1237   :  { %v2724_v37 = vpack.c.bf16 %v2721_v19, %v2720_v34  ;;  %5156 = vmatprep.subr.bf16.mxu0 %v5740_v21 }
0x1238   :  { %v2712_v38 = vpop.f32.mrb[92].mxu1 }
0x1239   :  { %v6558_v23 = vadd.f32 %v2712_v38, %v2587_v40  ;;  %5131 = vmatmul.mubr.msk.bf16.gmra.mrb[88].mxu0 %vm314_vm6, %v2724_v37  ;;  %v5120_v42 = vpop.f32.mrb[93].mxu1  ;;  %v5640_v40 = vld [vmem:[%s6949_s27 + $0x20] sm:$0xff]  }
0x123a   :  { %v2715_v48 = vpop.f32.mrb[94].mxu1  ;;  %5134 = vmatprep.mubr.msk.bf16.mxu0 %vm5741_vm7, %v5740_v21  ;;  %5157 = vmatpush3.bf16.msra.mxu0 %v5638_v53 }
0x123b   :  { %v2722_v56 = vmul.f32 %v6558_v23, %v2646_v11  ;;  %v5121_v57 = vpop.f32.mrb[95].mxu1  ;;  %5158 = vmatprep.subr.bf16.mxu0 %v5740_v21 }
0x123d   :  { %v2725_v63 = vpack.c.bf16 %v2722_v56, %v2722_v56 }
0x123e   :  { %5159 = vmatpush3.bf16.msra.mxu0 %v5639_v59 }
0x123f   :  { %5160 = vmatprep.subr.bf16.mxu0 %v5740_v21 }
0x1241   :  { %5135 = vmatmul.mubr.msk.bf16.gmra.mrb[92].mxu0 %vm314_vm6, %v2725_v63 }
0x1242   :  { %5161 = vmatpush3.bf16.msra.mxu0 %v5640_v40  ;;  %5164 = vmatprep.mubr.msk.bf16.mxu0 %vm5741_vm7, %v5740_v21 }
0x1243   :  { %5162 = vmatprep.subr.bf16.mxu0 %v5740_v21 }
0x1246   :  { %5163 = vmatpush3.bf16.msra.mxu0 %v5641_v0 }
0x1247   :  { %5202 = vmatprep.subr.bf16.mxu0 %v5740_v21 }
0x1304   :  { %v6575_v4 = vpop.f32.mrb[84].mxu0 }
0x1305   :  { %v5128_v5 = vpop.f32.mrb[85].mxu0 }
0x1306   :  { %v6577_v8 = vpop.f32.mrb[86].mxu0 }
0x1307   :  { %v2791_v10 = vpack.c.bf16 %v6577_v8, %v6575_v4  ;;  %v5129_v31 = vpop.f32.mrb[87].mxu0 }
0x1309   :  { %5141 = vmatmul.mubr.msk.bf16.vlgmr.msra.gmra.mrb[96].mxu1 %vm1518_vm14, %v2791_v10 }
0x130a   :  { %5144 = vmatprep.mubr.msk.bf16.mxu1 %vm5741_vm7, %v5740_v21 }
0x130c   :  { %v6584_v17 = vpop.f32.mrb[88].mxu0 }
0x130d   :  { %v5132_v39 = vpop.f32.mrb[89].mxu0 }
0x130e   :  { %v6586_v11 = vpop.f32.mrb[90].mxu0 }
0x130f   :  { %v2792_v15 = vpack.c.bf16 %v6586_v11, %v6584_v17  ;;  %v5133_v16 = vpop.f32.mrb[91].mxu0 }
0x1311   :  { %5145 = vmatmul.mubr.msk.bf16.gmra.mrb[100].mxu1 %vm1518_vm14, %v2792_v15 }
0x1312   :  { %5148 = vmatprep.mubr.msk.bf16.mxu1 %vm5741_vm7, %v5740_v21 }
0x1314   :  { %v6593_v18 = vpop.f32.mrb[92].mxu0 }
0x1315   :  { %v5136_v20 = vpop.f32.mrb[93].mxu0  ;;  %v2793_v6 = vpack.c.bf16 %v6593_v18, %v6593_v18 }
0x1316   :  { %v2788_v24 = vpop.f32.mrb[94].mxu0 }
0x1317   :  { %v5137_v26 = vpop.f32.mrb[95].mxu0 }
0x1319   :  { %5149 = vmatmul.mubr.msk.bf16.gmra.mrb[104].mxu1 %vm1518_vm14, %v2793_v6 }
0x131a   :  { %5182 = vmatprep.mubr.msk.bf16.mxu1 %vm1740_vm2, %v6293_v62 }
0x13dc   :  { %v2837_v49 = vpop.f32.mrb[96].mxu1 }
0x13dd   :  { %v5142_v55 = vpop.f32.mrb[97].mxu1  ;;  %v2838_v42 = vadd.f32 %v2837_v49, %v6263_v2 }
0x13de   :  { %v2840_v58 = vpop.f32.mrb[98].mxu1 }
0x13df   :  { %v5143_v3 = vpop.f32.mrb[99].mxu1  ;;  %v2841_v48 = vadd.f32 %v2840_v58, %v6266_v7 }
0x13e1   :  { %v2860_v40 = vsel %vm1588_vm15, %v2841_v48, -inf }
0x13e4   :  { %v2845_v12 = vpop.f32.mrb[100].mxu1 }
0x13e5   :  { %v2846_v30 = vadd.f32 %v2845_v12, %v6253_v51  ;;  %v5146_v32 = vpop.f32.mrb[101].mxu1  ;;  %v2859_v51 = vsel %vm1588_vm15, %v2838_v42, -inf }
0x13e6   :  { %v2848_v60 = vpop.f32.mrb[102].mxu1 }
0x13e7   :  { %v2849_v34 = vadd.f32 %v2848_v60, %v6258_v54  ;;  %v5147_v19 = vpop.f32.mrb[103].mxu1  ;;  %v2861_v1 = vsel %vm1588_vm15, %v2846_v30, -inf }
0x13e9   :  { %v2862_v37 = vsel %vm1588_vm15, %v2849_v34, -inf }
0x13ea   :  { %v2866_v38 = vmax.f32 %v2861_v1, %v2862_v37 }
0x13ec   :  { %v2853_v62 = vpop.f32.mrb[104].mxu1 }
0x13ed   :  { %v2854_v53 = vadd.f32 %v2853_v62, %v6270_v13  ;;  %v5150_v56 = vpop.f32.mrb[105].mxu1 }
0x13ee   :  { %v2856_v57 = vpop.f32.mrb[106].mxu1 }
0x13ef   :  { %v2863_v59 = vsel %vm1593_vm1, %v2854_v53, -inf  ;;  %v5151_v54 = vpop.f32.mrb[107].mxu1 }
0x13f0   :  { %v2864_v63 = vmax.f32 %v2859_v51, %v2863_v59 }
0x13f2   :  { %v2865_v0 = vmax.f32 %v2864_v63, %v2860_v40  ;;  %v6635_v63 = vld [vmem:[%s6951_s26 + $0x8] ss:$0 sps:$4 sm:$0xff]  }
0x13f4   :  { %v2867_v5 = vmax.f32 %v2865_v0, %v2866_v38 }
0x13f6   :  { %v2868_v10 = vrot.slane %v2867_v5, 4 }
0x13f8   :  { %v2869_v31 = vmax.f32 %v2867_v5, %v2868_v10 }
0x13fa   :  { %v2870_v2 = vrot.slane %v2869_v31, 2 }
0x13fc   :  { %v2871_v39 = vmax.f32 %v2869_v31, %v2870_v2 }
0x13fe   :  { %v2872_v15 = vrot.slane %v2871_v39, 1 }
0x1400   :  { %v2873_v7 = vmax.f32 %v2871_v39, %v2872_v15 }
0x1402   :  { %v2874_v13 = vmul.f32 %v6248_v44, %v2873_v7  ;;  %v2875_v16 = vmul.f32 %v6251_v50, %v2873_v7  ;;  %v2876_v24 = vmul.f32 %v6241_v35, %v2873_v7  ;;  %v2877_v6 = vmul.f32 %v6243_v36, %v2873_v7 }
0x1403   :  { %v2878_v44 = vmul.f32 %v2873_v7, %v6255_v52 }
0x1404   :  { %v2879_v20 = vpack.c.bf16 %v2875_v16, %v2874_v13  ;;  %v2880_v26 = vpack.c.bf16 %v2877_v6, %v2876_v24  ;;  %v5643_v6 = vld [vmem:[%s6951_s26] sm:$0xff]  }
0x1405   :  { %v2881_v50 = vpack.c.bf16 %v2878_v44, %v2878_v44 }
0x1406   :  { %5165 = vmatmul.mubr.msk.bf16.vlgmr.msra.gmra.mrb[96].mxu0 %vm1588_vm15, %v2879_v20 }
0x1407   :  { %5168 = vmatprep.mubr.msk.bf16.mxu0 %vm5741_vm7, %v5740_v21  ;;  %5203 = vmatpush3.bf16.msra.mxu0 %v6314_v47 }
0x1408   :  { %5421 = vmatprep.subr.bf16.mxu0 %v5742_v46 }
0x140e   :  { %5169 = vmatmul.mubr.msk.bf16.gmra.mrb[100].mxu0 %vm1588_vm15, %v2880_v26 }
0x140f   :  { %5172 = vmatprep.mubr.msk.bf16.mxu0 %vm5741_vm7, %v5740_v21 }
0x1416   :  { %5173 = vmatmul.mubr.msk.bf16.gmra.mrb[104].mxu0 %vm1588_vm15, %v2881_v50 }
0x1417   :  { %5204 = vmatprep.mubr.msk.bf16.mxu0 %vm5741_vm7, %v5740_v21 }
0x14d9   :  { %v2925_v47 = vpop.f32.mrb[96].mxu0 }
0x14da   :  { %v2947_v35 = vsub.f32 %v6575_v4, %v2925_v47  ;;  %v5166_v36 = vpop.f32.mrb[97].mxu0 }
0x14db   :  { %v2928_v49 = vpop.f32.mrb[98].mxu0 }
0x14dc   :  { %v2952_v55 = vmul.f32 1.442695, %v2947_v35  ;;  %v2948_v58 = vsub.f32 %v6577_v8, %v2928_v49  ;;  %v5167_v3 = vpop.f32.mrb[99].mxu0 }
0x14de   :  { %v2954_v12 = vmul.f32 1.442695, %v2948_v58  ;;  %5583 = vpow2.f32 %v2952_v55 }
0x14e0   :  { %5585 = vpow2.f32 %v2954_v12 }
0x14e1   :  { %v2933_v30 = vpop.f32.mrb[100].mxu0 }
0x14e2   :  { %v2949_v52 = vsub.f32 %v6584_v17, %v2933_v30  ;;  %v5170_v32 = vpop.f32.mrb[101].mxu0 }
0x14e3   :  { %v2936_v60 = vpop.f32.mrb[102].mxu0 }
0x14e4   :  { %v2956_v34 = vmul.f32 1.442695, %v2949_v52  ;;  %v2950_v19 = vsub.f32 %v6586_v11, %v2936_v60  ;;  %v5171_v1 = vpop.f32.mrb[103].mxu0 }
0x14e6   :  { %v2958_v37 = vmul.f32 1.442695, %v2950_v19  ;;  %5587 = vpow2.f32 %v2956_v34 }
0x14e8   :  { %5589 = vpow2.f32 %v2958_v37  ;;  %v5584_v4 = vpop.eup %5583 }
0x14e9   :  { %v2941_v38 = vpop.f32.mrb[104].mxu0 }
0x14ea   :  { %v5586_v42 = vpop.eup %5585  ;;  %v2951_v8 = vsub.f32 %v6593_v18, %v2941_v38  ;;  %v5174_v62 = vpop.f32.mrb[105].mxu0 }
0x14eb   :  { %v2944_v48 = vpop.f32.mrb[106].mxu0  ;;  %v2962_v53 = vpack.c.bf16 %v5586_v42, %v5584_v4 }
0x14ec   :  { %v2960_v56 = vmul.f32 1.442695, %v2951_v8  ;;  %v5175_v17 = vpop.f32.mrb[107].mxu0 }
0x14ed   :  { %5176 = vmatprep.subr.bf16.mxu1 %v2962_v53 }
0x14ee   :  { %5591 = vpow2.f32 %v2960_v56  ;;  %5177 = vmatpush3.bf16.msra.mxu1 %v2962_v53 }
0x14f0   :  { %v5588_v57 = vpop.eup %5587 }
0x14f2   :  { %v5590_v11 = vpop.eup %5589 }
0x14f3   :  { %v2963_v51 = vpack.c.bf16 %v5590_v11, %v5588_v57 }
0x14f5   :  { %5178 = vmatprep.subr.bf16.mxu1 %v2963_v51 }
0x14f6   :  { %5179 = vmatpush3.bf16.msra.mxu1 %v2963_v51  ;;  %v4491_v51 = vld [vmem:[%s6953_s2 + $0x28] sm:$0xff] }
0x14f8   :  { %v5592_v59 = vpop.eup %5591 }
0x14f9   :  { %v2964_v54 = vpack.c.bf16 %v5592_v59, %v5592_v59 }
0x14fb   :  { %5477 = vmatprep.subr.msk.bf16.mxu1 %vm1528_vm13, %v2964_v54  ;;  %v2966_v18 = vsel %vm1528_vm13, %v2964_v54, 0 }
0x14fc   :  { %5181 = vmatpush3.bf16.msra.mxu1 %v2966_v18  ;;  %v4492_v18 = vld [vmem:[%s6953_s2 + $0x30] sm:$0xff] }
0x14fd   :  { %5186 = vmatprep.subr.bf16.mxu1 %v5740_v21 }
0x14ff   :  { %5183 = vmatmul.mubr.msk.bf16.vlgmr.msra.gmra.mrb[108].mxu1 %vm1740_vm2, %v6635_v63 }
0x1500   :  { %5190 = vmatprep.mubr.msk.bf16.mxu1 %vm5741_vm7, %v5740_v21 }
0x15d2   :  { %v5184_v40 = vpop.f32.mrb[108].mxu1 }
0x15d3   :  { %v3011_v0 = vadd.f32 1e-16, %v5184_v40  ;;  %v3002_v5 = vpop.f32.mrb[109].mxu1  ;;  %v4493_v40 = vld [vmem:[%s6953_s2 + $0x38] sm:$0xff] }
0x15d4   :  { %v3003_v10 = vadd.f32 1e-16, %v3002_v5  ;;  %v5185_v31 = vpop.f32.mrb[110].mxu1  ;;  %v5425_v5 = vpack.c.bf16 %v4493_v40, %v4492_v18 }
0x15d5   :  { %v3005_v2 = vpop.f32.mrb[111].mxu1  ;;  %5593 = vrcp.f32 %v3011_v0 }
0x15d6   :  { %v3006_v39 = vadd.f32 1e-16, %v3005_v2  ;;  %5595 = vrcp.f32 %v3003_v10 }
0x15d8   :  { %5597 = vrcp.f32 %v3006_v39 }
0x15df   :  { %v5594_v15 = vpop.eup %5593 }
0x15e0   :  { %v5596_v7 = vpop.eup %5595  ;;  %v3020_v20 = vpack.c.bf16 %v5594_v15, %v5594_v15 }
0x15e2   :  { %v5598_v13 = vpop.eup %5597  ;;  %v3022_v24 = vsel %vm222_vm0, %v3020_v20, 0 }
0x15e3   :  { %v3019_v16 = vpack.c.bf16 %v5598_v13, %v5596_v7 }
0x15e5   :  { %5187 = vmatpush3.bf16.msra.mxu1 %v3019_v16 }
0x15e6   :  { %5188 = vmatprep.subr.bf16.mxu1 %v5740_v21 }
0x15e9   :  { %5189 = vmatpush3.bf16.msra.mxu1 %v3022_v24  ;;  %v4487_v24 = vld [vmem:[%s6954_s7 + $0x28] sm:$0xff] }
0x15ec   :  { %5191 = vmatmul.mubr.msk.bf16.vlgmr.msra.gmra.mrb[112].mxu1 %vm1273_vm12, %v6499_v61 }
0x15ed   :  { %5194 = vmatprep.mubr.msk.bf16.mxu1 %vm5741_vm7, %v5740_v21 }
0x15f4   :  { %5195 = vmatmul.mubr.msk.bf16.gmra.mrb[116].mxu1 %vm1273_vm12, %v6510_v41 }
0x15f5   :  { %5198 = vmatprep.mubr.msk.bf16.mxu1 %vm5741_vm7, %v5740_v21 }
0x15fc   :  { %5199 = vmatmul.mubr.msk.bf16.gmra.mrb[120].mxu1 %vm1273_vm12, %v6517_v43 }
0x15fd   :  { %5222 = vmatprep.mubr.msk.bf16.mxu1 %vm1740_vm2, %v5643_v6 }
0x16bf   :  { %v3058_v26 = vpop.f32.mrb[112].mxu1 }
0x16c0   :  { %v5192_v44 = vpop.f32.mrb[113].mxu1  ;;  %v3080_v47 = vmul.f32 %v5584_v4, %v3058_v26  ;;  %v4488_v26 = vld [vmem:[%s6954_s7 + $0x30] sm:$0xff] }
0x16c1   :  { %v3061_v50 = vpop.f32.mrb[114].mxu1  ;;  %v4489_v44 = vld [vmem:[%s6954_s7 + $0x38] sm:$0xff] }
0x16c2   :  { %v3081_v61 = vmul.f32 %v5586_v42, %v3061_v50  ;;  %v5193_v35 = vpop.f32.mrb[115].mxu1 }
0x16c4   :  { %v3085_v36 = vpack.c.bf16 %v3081_v61, %v3080_v47  ;;  %v5431_v61 = vpack.c.bf16 %v4489_v44, %v4488_v26 }
0x16c6   :  { %5205 = vmatmul.mubr.msk.bf16.vlgmr.msra.gmra.mrb[108].mxu0 %vm1518_vm14, %v3085_v36 }
0x16c7   :  { %v3066_v49 = vpop.f32.mrb[116].mxu1  ;;  %5208 = vmatprep.mubr.msk.bf16.mxu0 %vm5741_vm7, %v5740_v21 }
0x16c8   :  { %v5196_v41 = vpop.f32.mrb[117].mxu1  ;;  %v3082_v58 = vmul.f32 %v5588_v57, %v3066_v49 }
0x16c9   :  { %v3069_v55 = vpop.f32.mrb[118].mxu1 }
0x16ca   :  { %v3083_v43 = vmul.f32 %v5590_v11, %v3069_v55  ;;  %v5197_v3 = vpop.f32.mrb[119].mxu1  ;;  %v4490_v11 = vld [vmem:[%s6953_s2 + $0x20] sm:$0xff] }
0x16cc   :  { %v3086_v12 = vpack.c.bf16 %v3083_v43, %v3082_v58 }
0x16ce   :  { %5209 = vmatmul.mubr.msk.bf16.gmra.mrb[112].mxu0 %vm1518_vm14, %v3086_v12 }
0x16cf   :  { %v3074_v30 = vpop.f32.mrb[120].mxu1  ;;  %5212 = vmatprep.mubr.msk.bf16.mxu0 %vm5741_vm7, %v5740_v21 }
0x16d0   :  { %v3084_v52 = vmul.f32 %v5592_v59, %v3074_v30  ;;  %v5200_v32 = vpop.f32.mrb[121].mxu1  ;;  %v5422_v59 = vpack.c.bf16 %v4491_v51, %v4490_v11 }
0x16d1   :  { %v3077_v60 = vpop.f32.mrb[122].mxu1 }
0x16d2   :  { %v5201_v34 = vpop.f32.mrb[123].mxu1  ;;  %v3087_v19 = vpack.c.bf16 %v3084_v52, %v3084_v52  ;;  %5423 = vmatpush3.bf16.msra.mxu0 %v5422_v59 }
0x16d3   :  { %5424 = vmatprep.subr.bf16.mxu0 %v5742_v46 }
0x16d6   :  { %5213 = vmatmul.mubr.msk.bf16.gmra.mrb[116].mxu0 %vm1518_vm14, %v3087_v19 }
0x16d7   :  { %5234 = vmatprep.mubr.msk.f32.mxu0 %vm5741_vm7, %v5740_v21  ;;  %5426 = vmatpush3.bf16.msra.mxu0 %v5425_v5 }
0x16d8   :  { %5427 = vmatprep.subr.bf16.mxu0 %v5742_v46 }
0x1799   :  { %v3131_v1 = vpop.f32.mrb[108].mxu0 }
0x179a   :  { %3158 = vrot.lane.b32.xlu0 %v3131_v1, %s5744_s1  ;;  %v5206_v37 = vpop.f32.mrb[109].mxu0 }
0x179b   :  { %v3134_v4 = vpop.f32.mrb[110].mxu0 }
0x179c   :  { %3160 = vrot.lane.b32.xlu1 %v3134_v4, %s5744_s1  ;;  %v5207_v38 = vpop.f32.mrb[111].mxu0 }
0x17a1   :  { %v3139_v42 = vpop.f32.mrb[112].mxu0 }
0x17a2   :  { %3162 = vrot.lane.b32.xlu0 %v3139_v42, %s5744_s1  ;;  %v5210_v8 = vpop.f32.mrb[113].mxu0 }
0x17a3   :  { %v3142_v62 = vpop.f32.mrb[114].mxu0 }
0x17a4   :  { %3164 = vrot.lane.b32.xlu1 %v3142_v62, %s5744_s1  ;;  %v5211_v48 = vpop.f32.mrb[115].mxu0 }
0x17a9   :  { %v3147_v53 = vpop.f32.mrb[116].mxu0 }
0x17aa   :  { %3166 = vrot.lane.b32.xlu0 %v3147_v53, %s5744_s1  ;;  %v5214_v56 = vpop.f32.mrb[117].mxu0 }
0x17ab   :  { %v3150_v17 = vpop.f32.mrb[118].mxu0 }
0x17ac   :  { %v5215_v57 = vpop.f32.mrb[119].mxu0 }
0x180c   :  { %v3159_v54 = vpop.permute.xlu0 %3158 }
0x180d   :  { %v3173_v10 = vmul.f32 %v3159_v54, %v6539_v22 }
0x180e   :  { %v3161_v0 = vpop.permute.xlu1 %3160 }
0x180f   :  { %v3174_v31 = vmul.f32 %v3161_v0, %v6541_v25 }
0x1811   :  { %v3178_v2 = vpack.c.bf16 %v3174_v31, %v3173_v10 }
0x1813   :  { %3184 = vrot.lane.b32.xlu1 %v3178_v2, %s5743_s6 }
0x1814   :  { %v3163_v39 = vpop.permute.xlu0 %3162 }
0x1815   :  { %v3175_v7 = vmul.f32 %v3163_v39, %v6545_v14 }
0x1816   :  { %v3165_v15 = vpop.permute.xlu1 %3164 }
0x1817   :  { %v3176_v13 = vmul.f32 %v3165_v15, %v6551_v33  ;;  %v4486_v33 = vld [vmem:[%s6954_s7 + $0x20] sm:$0xff] }
0x1819   :  { %v3179_v16 = vpack.c.bf16 %v3176_v13, %v3175_v7 }
0x181b   :  { %3186 = vrot.lane.b32.xlu0 %v3179_v16, %s5743_s6 }
0x181c   :  { %v3167_v22 = vpop.permute.xlu0 %3166 }
0x181d   :  { %v3177_v25 = vmul.f32 %v3167_v22, %v6558_v23  ;;  %v5428_v23 = vpack.c.bf16 %v4487_v24, %v4486_v33 }
0x181f   :  { %v3180_v20 = vpack.c.bf16 %v3177_v25, %v3177_v25  ;;  %3256 = vrot.lane.b32.xlu0 %v6483_v27, %s5744_s1 }
0x1821   :  { %3188 = vrot.lane.b32.xlu1 %v3180_v20, %s5743_s6 }
0x1823   :  { %3260 = vrot.lane.b32.xlu0 %v6489_v29, %s5744_s1 }
0x1825   :  { %3258 = vrot.lane.b32.xlu1 %v6485_v45, %s5744_s1 }
0x1885   :  { %v3185_v14 = vpop.permute.xlu1 %3184 }
0x1886   :  { %5216 = vmatprep.subr.bf16.mxu1 %v3185_v14 }
0x1887   :  { %5217 = vmatpush3.bf16.msra.mxu1 %v3185_v14 }
0x188d   :  { %v3187_v6 = vpop.permute.xlu0 %3186 }
0x188e   :  { %5218 = vmatprep.subr.bf16.mxu1 %v3187_v6 }
0x188f   :  { %5219 = vmatpush3.bf16.msra.mxu1 %v3187_v6 }
0x1891   :  { %v3257_v50 = vpop.permute.xlu0 %3256 }
0x1892   :  { %5235 = vmatmul.mubr.msk.f32.vlgmr.msra.gmra.mrb[70].mxu0 %vm314_vm6, %v3257_v50 }
0x1893   :  { %v3189_v47 = vpop.permute.xlu1 %3188  ;;  %5237 = vmatprep.mubr.msk.f32.mxu0 %vm5741_vm7, %v5740_v21  ;;  %5429 = vmatpush3.bf16.msra.mxu0 %v5428_v23 }
0x1894   :  { %v3193_v35 = vsel %vm1528_vm13, %v3189_v47, 0  ;;  %5478 = vmatprep.subr.msk.bf16.mxu1 %vm1528_vm13, %v3189_v47  ;;  %5430 = vmatprep.subr.bf16.mxu0 %v5742_v46 }
0x1895   :  { %5221 = vmatpush3.bf16.msra.mxu1 %v3193_v35  ;;  %v3261_v49 = vpop.permute.xlu0 %3260 }
0x1896   :  { %5433 = vmatprep.subr.bf16.mxu1 %v5742_v46 }
0x1897   :  { %v3259_v36 = vpop.permute.xlu1 %3258  ;;  %5432 = vmatpush3.bf16.msra.mxu0 %v5431_v61 }
0x1898   :  { %5223 = vmatmul.mubr.msk.bf16.vlgmr.msra.gmra.mrb[124].mxu1 %vm1740_vm2, %v6635_v63  ;;  %5238 = vmatmul.mubr.msk.f32.gmra.mrb[120].mxu0 %vm314_vm6, %v3259_v36 }
0x1899   :  { %5240 = vmatprep.mubr.msk.f32.mxu0 %vm5741_vm7, %v5740_v21  ;;  %5268 = vmatprep.mubr.msk.f32.mxu1 %vm5741_vm7, %v5740_v21 }
0x189a   :  { %5445 = vmatprep.subr.bf16.mxu0 %v5742_v46 }
0x189c   :  { %5241 = vmatmul.mubr.msk.f32.gmra.mrb[122].mxu0 %vm314_vm6, %v3261_v49 }
0x189d   :  { %5251 = vmatprep.mubr.msk.f32.mxu0 %vm5741_vm7, %v5740_v21 }
0x196b   :  { %v5224_v41 = vpop.f32.mrb[124].mxu1 }
0x196c   :  { %v3229_v55 = vpop.f32.mrb[125].mxu1 }
0x196d   :  { %5252 = vmatmul.mubr.msk.f32.vlgmr.msra.gmra.mrb[70].mxu0 %vm314_vm6, %v3229_v55  ;;  %v5225_v63 = vpop.f32.mrb[126].mxu1 }
0x196e   :  { %v3232_v58 = vpop.f32.mrb[127].mxu1  ;;  %5254 = vmatprep.mubr.msk.f32.mxu0 %vm5741_vm7, %v5740_v21 }
0x1971   :  { %5255 = vmatmul.mubr.msk.f32.gmra.mrb[120].mxu0 %vm314_vm6, %v3232_v58 }
0x1972   :  { %5257 = vmatprep.mubr.msk.f32.mxu0 %vm5741_vm7, %v5740_v21 }
0x1975   :  { %5258 = vmatmul.mubr.msk.f32.gmra.mrb[122].mxu0 %vm314_vm6, %v5224_v41 }
0x1976   :  { %5302 = vmatprep.mubr.msk.f32.mxu0 %vm5741_vm7, %v5740_v21 }
0x1a40   :  { %v3423_v43 = vpop.f32.mrb[70].mxu0 }
0x1a41   :  { %v4500_v3 = vmul.f32 -1.442695, %v3423_v43  ;;  %v5253_v12 = vpop.f32.mrb[71].mxu0 }
0x1a43   :  { %5599 = vpow2.f32 %v4500_v3 }
0x1a44   :  { %v3428_v30 = vpop.f32.mrb[120].mxu0 }
0x1a45   :  { %v4501_v52 = vmul.f32 -1.442695, %v3428_v30  ;;  %v5256_v32 = vpop.f32.mrb[121].mxu0 }
0x1a47   :  { %5601 = vpow2.f32 %v4501_v52 }
0x1a48   :  { %v3433_v60 = vpop.f32.mrb[122].mxu0 }
0x1a49   :  { %v4502_v34 = vmul.f32 -1.442695, %v3433_v60  ;;  %v5259_v19 = vpop.f32.mrb[123].mxu0 }
0x1a4b   :  { %5603 = vpow2.f32 %v4502_v34 }
0x1a4d   :  { %v5600_v1 = vpop.eup %5599 }
0x1a4e   :  { %v3446_v37 = vadd.f32 1.0, %v5600_v1 }
0x1a50   :  { %5605 = vrcp.f32 %v3446_v37 }
0x1a51   :  { %v5602_v4 = vpop.eup %5601 }
0x1a52   :  { %v3447_v38 = vadd.f32 1.0, %v5602_v4 }
0x1a54   :  { %5607 = vrcp.f32 %v3447_v38  ;;  %v4503_v38 = vld [vmem:[%s6955_s10 + $0x1] sm:$0x1] }
0x1a55   :  { %v5604_v42 = vpop.eup %5603 }
0x1a56   :  { %v3448_v8 = vadd.f32 1.0, %v5604_v42 }
0x1a58   :  { %5609 = vrcp.f32 %v3448_v8 }
0x1a5a   :  { %v5606_v62 = vpop.eup %5605 }
0x1a5b   :  { %v3473_v48 = vsub.f32 1.0, %v5606_v62 }
0x1a5d   :  { %3478 = vperm.xlu1 %5535, %v3473_v48  }
0x1a5e   :  { %v5608_v53 = vpop.eup %5607 }
0x1a5f   :  { %v3474_v56 = vsub.f32 1.0, %v5608_v53 }
0x1a61   :  { %3483 = vperm.xlu0 %5536, %v3474_v56  }
0x1a62   :  { %v5610_v17 = vpop.eup %5609 }
0x1a63   :  { %v3475_v57 = vsub.f32 1.0, %v5610_v17 }
0x1a65   :  { %3457 = vperm.xlu0 %5536, %v5606_v62   ;;  %3488 = vperm.xlu1 %5535, %v3475_v57   ;;  %v4504_v57 = vld [vmem:[%s6956_s11 + $0x1] sm:$0x1] }
0x1a69   :  { %3467 = vperm.xlu0 %5536, %v5610_v17   ;;  %3462 = vperm.xlu1 %5535, %v5608_v53  }
0x1adc   :  { %v3479_v11 = vpop.permute.xlu1 %3478 }
0x1add   :  { %v3491_v51 = vmul.f32 %v3479_v11, %v3229_v55  ;;  %v3605_v11 = vld [vmem:[%s6957_s15] sm:$0xff] }
0x1adf   :  { %3497 = vrot.lane.b32.xlu1 %v3491_v51, %s5743_s6  ;;  %v3606_v51 = vld [vmem:[%s6957_s15 + $0x8] sm:$0xff] }
0x1ae0   :  { %v3484_v59 = vpop.permute.xlu0 %3483 }
0x1ae1   :  { %v3492_v54 = vmul.f32 %v3484_v59, %v3232_v58  ;;  %v3607_v59 = vld [vmem:[%s6957_s15 + $0x10] sm:$0xff] }
0x1ae3   :  { %3499 = vrot.lane.b32.xlu0 %v3492_v54, %s5743_s6  ;;  %v5434_v54 = vpack.c.bf16 %v3606_v51, %v3605_v11  ;;  %v6824_v51 = vld [vmem:[%s6962_s5 + $0x10] sm:$0xff] }
0x1ae4   :  { %v3489_v18 = vpop.permute.xlu1 %3488  ;;  %v3458_v0 = vpop.permute.xlu0 %3457  ;;  %vm3913_vm9 = vcmp.gt.f32.partialorder %v6824_v51, 0.5 }
0x1ae5   :  { %v3493_v40 = vmul.f32 %v5224_v41, %v3489_v18  ;;  %v3470_v2 = vmul.f32 %v3458_v0, %v6483_v27  ;;  %v3608_v18 = vld [vmem:[%s6957_s15 + $0x18] sm:$0xff]  ;;  %5435 = vmatpush3.bf16.msra.mxu1 %v5434_v54 }
0x1ae6   :  { %5436 = vmatprep.subr.bf16.mxu1 %v5742_v46 }
0x1ae7   :  { %3501 = vrot.lane.b32.xlu1 %v3493_v40, %s5743_s6 }
0x1ae8   :  { %v3463_v5 = vpop.permute.xlu1 %3462  ;;  %v3468_v10 = vpop.permute.xlu0 %3467 }
0x1ae9   :  { %v3471_v39 = vmul.f32 %v3463_v5, %v6485_v45  ;;  %v3472_v16 = vmul.f32 %v3468_v10, %v6489_v29  ;;  %v5437_v5 = vpack.c.bf16 %v3608_v18, %v3607_v59 }
0x1aeb   :  { %5438 = vmatpush3.bf16.msra.mxu1 %v5437_v5 }
0x1aec   :  { %5439 = vmatprep.subr.bf16.mxu1 %v5742_v46 }
0x1b51   :  { %v3498_v31 = vpop.permute.xlu1 %3497 }
0x1b52   :  { %v6725_v15 = vadd.f32 %v3498_v31, %v3470_v2 }
0x1b54   :  { %v3521_v22 = vmul.f32 %v6725_v15, %v6725_v15  ;;  %v3509_v27 = vsel %vm2292_vm3, %v6725_v15, 0.0 }
0x1b55   :  { %v3500_v7 = vpop.permute.xlu0 %3499 }
0x1b56   :  { %v6727_v13 = vadd.f32 %v3500_v7, %v3471_v39  ;;  %v3524_v6 = vsel %vm2292_vm3, %v3521_v22, 0.0 }
0x1b58   :  { %v3510_v25 = vsel %vm2292_vm3, %v6727_v13, 0.0  ;;  %v3522_v20 = vmul.f32 %v6727_v13, %v6727_v13 }
0x1b59   :  { %v3502_v14 = vpop.permute.xlu1 %3501  ;;  %v3511_v24 = vadd.f32 %v3510_v25, %v3509_v27  ;;  %v3715_v25 = vld [vmem:[%s6958_s16 + $0x8] sm:$0xff]  ;;  %v3716_v27 = vld [vmem:[%s6958_s16 + $0x10] sm:$0xff] }
0x1b5a   :  { %v3525_v45 = vsel %vm2292_vm3, %v3522_v20, 0.0  ;;  %v3508_v33 = vadd.f32 %v3502_v14, %v3472_v16 }
0x1b5b   :  { %v3526_v26 = vadd.f32 %v3525_v45, %v3524_v6  ;;  %v3717_v45 = vld [vmem:[%s6958_s16 + $0x18] sm:$0xff]  ;;  %v3819_v6 = vld [vmem:[%s6959_s18 + $0x8] sm:$0xff] }
0x1b5c   :  { %v3512_v29 = vsel %vm2292_vm3, %v3508_v33, 0.0  ;;  %v3523_v23 = vmul.f32 %v3508_v33, %v3508_v33 }
0x1b5d   :  { %v3513_v44 = vadd.f32 %v3512_v29, %v3511_v24  ;;  %v3818_v24 = vld [vmem:[%s6959_s18] sm:$0xff] }
0x1b5e   :  { %v3527_v50 = vsel %vm2292_vm3, %v3523_v23, 0.0  ;;  %v5446_v29 = vpack.c.bf16 %v3819_v6, %v3818_v24  ;;  %v4505_v23 = vld [vmem:[%s6960_s22] ss:$0 sm:$0xff] }
0x1b5f   :  { %v3514_v47 = vrot.slane %v3513_v44, 4  ;;  %v3528_v61 = vadd.f32 %v3527_v50, %v3526_v26 }
0x1b60   :  { %5447 = vmatpush3.bf16.msra.mxu0 %v5446_v29 }
0x1b61   :  { %v3515_v35 = vadd.f32 %v3514_v47, %v3513_v44  ;;  %v3529_v36 = vrot.slane %v3528_v61, 4  ;;  %5448 = vmatprep.subr.bf16.mxu0 %v5742_v46 }
0x1b63   :  { %v3516_v49 = vrot.slane %v3515_v35, 2  ;;  %v3530_v41 = vadd.f32 %v3529_v36, %v3528_v61 }
0x1b65   :  { %v3517_v55 = vadd.f32 %v3516_v49, %v3515_v35  ;;  %v3531_v63 = vrot.slane %v3530_v41, 2 }
0x1b67   :  { %v3518_v58 = vrot.slane %v3517_v55, 1  ;;  %v3532_v43 = vadd.f32 %v3531_v63, %v3530_v41 }
0x1b69   :  { %v3519_v3 = vadd.f32 %v3518_v58, %v3517_v55  ;;  %v3533_v12 = vrot.slane %v3532_v43, 1 }
0x1b6b   :  { %v3520_v30 = vmul.f32 0.041666668, %v3519_v3  ;;  %v3534_v52 = vadd.f32 %v3533_v12, %v3532_v43  ;;  %v3820_v43 = vld [vmem:[%s6959_s18 + $0x10] sm:$0xff]  ;;  %v3821_v3 = vld [vmem:[%s6959_s18 + $0x18] sm:$0xff] }
0x1b6c   :  { %v5449_v12 = vpack.c.bf16 %v3821_v3, %v3820_v43 }
0x1b6d   :  { %v3535_v32 = vmul.f32 0.041666668, %v3534_v52  ;;  %v3536_v60 = vmul.f32 %v3520_v30, %v3520_v30 }
0x1b6e   :  { %5450 = vmatpush3.bf16.msra.mxu0 %v5449_v12 }
0x1b6f   :  { %v3537_v34 = vsub.f32 %v3535_v32, %v3536_v60  ;;  %5319 = vmatprep.subr.bf16.mxu0 %v5740_v21 }
0x1b71   :  { %v3540_v19 = vadd.f32 1e-05, %v3537_v34 }
0x1b73   :  { %5611 = vrsqrt.f32 %v3540_v19 }
0x1b7d   :  { %v5612_v1 = vpop.eup %5611 }
0x1b7e   :  { %v3549_v37 = vrot.slane %v5612_v1, %v6424_v9 }
0x1b80   :  { %v3556_v4 = vrot.slane %v3549_v37, %v6424_v9 }
0x1b82   :  { %3557 = vrot.lane.b32.xlu0 %v3556_v4, %s5744_s1 }
0x1bf4   :  { %v3558_v42 = vpop.permute.xlu0 %3557 }
0x1bf5   :  { %v3560_v8 = vmul.f32 %v4503_v38, %v3558_v42 }
0x1bf7   :  { %v3565_v62 = vrot.slane %v3560_v8, %v6430_v28 }
0x1bf9   :  { %3566 = vrot.lane.b32.xlu1 %v3565_v62, %s5743_s6 }
0x1c6b   :  { %v3567_v48 = vpop.permute.xlu1 %3566 }
0x1c6c   :  { %v3574_v53 = vmul.f32 %v3567_v48, %v3520_v30  ;;  %v3570_v31 = vmul.f32 %v3567_v48, %v6727_v13  ;;  %v3571_v16 = vmul.f32 %v3567_v48, %v3508_v33  ;;  %v5443_v33 = vpack.c.bf16 %v3717_v45, %v3716_v27  ;;  %v4509_v30 = vld [vmem:[%s6961_s0] ss:$0 sm:$0xff] }
0x1c6e   :  { %v3582_v56 = vrot.slane %v3574_v53, %v6424_v9 }
0x1c70   :  { %v3589_v17 = vrot.slane %v3582_v56, %v6424_v9  ;;  %v3569_v9 = vmul.f32 %v3567_v48, %v6725_v15 }
0x1c72   :  { %3590 = vrot.lane.b32.xlu0 %v3589_v17, %s5744_s1  ;;  %v6816_v17 = vld [vmem:[%s6962_s5] sm:$0xff] }
0x1c73   :  { %vm3911_vm4 = vcmp.gt.f32.partialorder %v6816_v17, 0.5 }
0x1ce4   :  { %v3591_v40 = vpop.permute.xlu0 %3590 }
0x1ce5   :  { %v3593_v0 = vsub.f32 %v4504_v57, %v3591_v40  ;;  %v6819_v57 = vld [vmem:[%s6962_s5 + $0x8] sm:$0xff] }
0x1ce6   :  { %vm3912_vm5 = vcmp.gt.f32.partialorder %v6819_v57, 0.5 }
0x1ce7   :  { %v3598_v10 = vrot.slane %v3593_v0, %v6430_v28  ;;  %v3714_v28 = vld [vmem:[%s6958_s16] sm:$0xff] }
0x1ce8   :  { %v5440_v20 = vpack.c.bf16 %v3715_v25, %v3714_v28 }
0x1ce9   :  { %3599 = vrot.lane.b32.xlu1 %v3598_v10, %s5743_s6 }
0x1d5b   :  { %v3600_v2 = vpop.permute.xlu1 %3599 }
0x1d5c   :  { %v3602_v39 = vadd.f32 %v3600_v2, %v3569_v9  ;;  %v3603_v7 = vadd.f32 %v3600_v2, %v3570_v31  ;;  %v3604_v22 = vadd.f32 %v3600_v2, %v3571_v16 }
0x1d5e   :  { %3621 = vrot.lane.b32.xlu1 %v3603_v7, %s5744_s1  ;;  %3619 = vrot.lane.b32.xlu0 %v3602_v39, %s5744_s1 }
0x1d62   :  { %3623 = vrot.lane.b32.xlu0 %v3604_v22, %s5744_s1 }
0x1dd0   :  { %v3620_v14 = vpop.permute.xlu0 %3619  ;;  %v3622_v15 = vpop.permute.xlu1 %3621 }
0x1dd1   :  { %5269 = vmatmul.mubr.msk.f32.vlgmr.msra.gmra.mrb[128].mxu1 %vm314_vm6, %v3620_v14 }
0x1dd2   :  { %5271 = vmatprep.mubr.msk.f32.mxu1 %vm5741_vm7, %v5740_v21  ;;  %5441 = vmatpush3.bf16.msra.mxu1 %v5440_v20 }
0x1dd3   :  { %5442 = vmatprep.subr.bf16.mxu1 %v5742_v46 }
0x1dd4   :  { %v3624_v13 = vpop.permute.xlu0 %3623 }
0x1dd5   :  { %5272 = vmatmul.mubr.msk.f32.gmra.mrb[130].mxu1 %vm314_vm6, %v3622_v15 }
0x1dd6   :  { %5274 = vmatprep.mubr.msk.f32.mxu1 %vm5741_vm7, %v5740_v21  ;;  %5444 = vmatpush3.bf16.msra.mxu1 %v5443_v33 }
0x1dd7   :  { %5311 = vmatprep.subr.bf16.mxu1 %v5740_v21 }
0x1dd9   :  { %5275 = vmatmul.mubr.msk.f32.gmra.mrb[132].mxu1 %vm314_vm6, %v3624_v13 }
0x1dda   :  { %5285 = vmatprep.mubr.msk.f32.mxu1 %vm5741_vm7, %v5740_v21 }
0x1ea4   :  { %v3697_v26 = vpop.f32.mrb[128].mxu1 }
0x1ea5   :  { %v3698_v44 = vadd.f32 %v4505_v23, %v3697_v26  ;;  %v5270_v50 = vpop.f32.mrb[129].mxu1 }
0x1ea7   :  { %v3711_v47 = vmax.f32 %v3698_v44, 0.0 }
0x1ea8   :  { %v3702_v61 = vpop.f32.mrb[130].mxu1 }
0x1ea9   :  { %v3703_v35 = vadd.f32 %v4505_v23, %v3702_v61  ;;  %v5273_v36 = vpop.f32.mrb[131].mxu1  ;;  %5286 = vmatmul.mubr.msk.f32.vlgmr.msra.gmra.mrb[134].mxu1 %vm314_vm6, %v3711_v47 }
0x1eaa   :  { %5288 = vmatprep.mubr.msk.f32.mxu1 %vm5741_vm7, %v5740_v21 }
0x1eab   :  { %v3712_v49 = vmax.f32 %v3703_v35, 0.0 }
0x1eac   :  { %v3707_v41 = vpop.f32.mrb[132].mxu1 }
0x1ead   :  { %v3708_v55 = vadd.f32 %v4505_v23, %v3707_v41  ;;  %v5276_v63 = vpop.f32.mrb[133].mxu1  ;;  %5289 = vmatmul.mubr.msk.f32.gmra.mrb[136].mxu1 %vm314_vm6, %v3712_v49 }
0x1eae   :  { %5291 = vmatprep.mubr.msk.f32.mxu1 %vm5741_vm7, %v5740_v21 }
0x1eaf   :  { %v3713_v58 = vmax.f32 %v3708_v55, 0.0 }
0x1eb1   :  { %5292 = vmatmul.mubr.msk.f32.gmra.mrb[138].mxu1 %vm314_vm6, %v3713_v58 }
0x1eb2   :  { %5315 = vmatprep.mubr.msk.bf16.mxu1 %vm5741_vm7, %v5740_v21 }
0x1f7c   :  { %v3800_v52 = vpop.f32.mrb[134].mxu1 }
0x1f7d   :  { %v6797_v32 = vadd.f32 %v4509_v30, %v3800_v52  ;;  %v5287_v60 = vpop.f32.mrb[135].mxu1 }
0x1f7f   :  { %5303 = vmatmul.mubr.msk.f32.vlgmr.msra.gmra.mrb[124].mxu0 %vm314_vm6, %v6797_v32 }
0x1f80   :  { %v3805_v34 = vpop.f32.mrb[136].mxu1  ;;  %5305 = vmatprep.mubr.msk.f32.mxu0 %vm5741_vm7, %v5740_v21 }
0x1f81   :  { %v6803_v19 = vadd.f32 %v4509_v30, %v3805_v34  ;;  %v5290_v1 = vpop.f32.mrb[137].mxu1 }
0x1f83   :  { %5306 = vmatmul.mubr.msk.f32.gmra.mrb[126].mxu0 %vm314_vm6, %v6803_v19 }
0x1f84   :  { %v3810_v37 = vpop.f32.mrb[138].mxu1  ;;  %5308 = vmatprep.mubr.msk.f32.mxu0 %vm5741_vm7, %v5740_v21 }
0x1f85   :  { %v6809_v4 = vadd.f32 %v4509_v30, %v3810_v37  ;;  %v5293_v38 = vpop.f32.mrb[139].mxu1 }
0x1f87   :  { %5309 = vmatmul.mubr.msk.f32.gmra.mrb[128].mxu0 %vm314_vm6, %v6809_v4 }
0x1f88   :  { %5323 = vmatprep.mubr.msk.bf16.mxu0 %vm5741_vm7, %v5740_v21 }
0x2052   :  { %v3897_v42 = vpop.f32.mrb[124].mxu0 }
0x2053   :  { %3916 = vperm.xlu1 %5535, %v3897_v42   ;;  %v5304_v8 = vpop.f32.mrb[125].mxu0 }
0x2056   :  { %v3902_v62 = vpop.f32.mrb[126].mxu0 }
0x2057   :  { %3921 = vperm.xlu0 %5536, %v3902_v62   ;;  %v5307_v48 = vpop.f32.mrb[127].mxu0 }
0x205a   :  { %v3907_v53 = vpop.f32.mrb[128].mxu0 }
0x205b   :  { %3926 = vperm.xlu1 %5535, %v3907_v53   ;;  %v5310_v56 = vpop.f32.mrb[129].mxu0 }
0x20d2   :  { %v3917_v11 = vpop.permute.xlu1 %3916 }
0x20d3   :  { %v3929_v54 = vsel %vm3911_vm4, %v3917_v11, -1e+30 }
0x20d4   :  { %v3933_v0 = vsel %vm3932_vm8, %v3929_v54, -inf }
0x20d6   :  { %v3922_v59 = vpop.permute.xlu0 %3921 }
0x20d7   :  { %v3930_v18 = vsel %vm3912_vm5, %v3922_v59, -1e+30 }
0x20d8   :  { %v3934_v40 = vsel %vm3932_vm8, %v3930_v18, -inf }
0x20d9   :  { %v3936_v10 = vmax.f32 %v3933_v0, %v3934_v40 }
0x20da   :  { %v3927_v5 = vpop.permute.xlu1 %3926 }
0x20db   :  { %v3931_v9 = vsel %vm3913_vm9, %v3927_v5, -1e+30 }
0x20dc   :  { %v3935_v31 = vsel %vm3932_vm8, %v3931_v9, -inf }
0x20dd   :  { %v3937_v2 = vmax.f32 %v3936_v10, %v3935_v31 }
0x20df   :  { %v3938_v39 = vrot.slane %v3937_v2, 4 }
0x20e1   :  { %v3939_v7 = vmax.f32 %v3937_v2, %v3938_v39 }
0x20e3   :  { %v3940_v16 = vrot.slane %v3939_v7, 2 }
0x20e5   :  { %v3941_v22 = vmax.f32 %v3939_v7, %v3940_v16 }
0x20e7   :  { %v3942_v28 = vrot.slane %v3941_v22, 1 }
0x20e9   :  { %v3943_v25 = vmax.f32 %v3941_v22, %v3942_v28 }
0x20eb   :  { %v3944_v20 = vsub.f32 %v3929_v54, %v3943_v25  ;;  %v3945_v14 = vsub.f32 %v3930_v18, %v3943_v25  ;;  %v3946_v15 = vsub.f32 %v3931_v9, %v3943_v25 }
0x20ed   :  { %v3947_v13 = vmul.f32 1.442695, %v3944_v20  ;;  %v3949_v27 = vmul.f32 1.442695, %v3945_v14  ;;  %v3951_v45 = vmul.f32 1.442695, %v3946_v15 }
0x20ef   :  { %5613 = vpow2.f32 %v3947_v13 }
0x20f0   :  { %5615 = vpow2.f32 %v3949_v27 }
0x20f1   :  { %5617 = vpow2.f32 %v3951_v45  ;;  %v3817_v45 = vld [vmem:[%s6963_s9] sm:$0x1] }
0x20f9   :  { %v5614_v33 = vpop.eup %5613 }
0x20fa   :  { %v5616_v24 = vpop.eup %5615  ;;  %v3953_v6 = vmul.f32 %v5614_v33, %v6816_v17 }
0x20fb   :  { %v5618_v29 = vpop.eup %5617  ;;  %v3954_v23 = vmul.f32 %v5616_v24, %v6819_v57 }
0x20fc   :  { %v3955_v26 = vmul.f32 %v5618_v29, %v6824_v51  ;;  %v3956_v44 = vsel %vm3932_vm8, %v3953_v6, 0.0 }
0x20fd   :  { %v3957_v50 = vsel %vm3932_vm8, %v3954_v23, 0.0 }
0x20fe   :  { %v3958_v47 = vadd.f32 %v3957_v50, %v3956_v44  ;;  %v3959_v61 = vsel %vm3932_vm8, %v3955_v26, 0.0  ;;  %v4119_v44 = vld [vmem:[%s6964_s13 + $0x8] sm:$0xff]  ;;  %v4120_v50 = vld [vmem:[%s6964_s13 + $0x10] sm:$0xff] }
0x2100   :  { %v3960_v35 = vadd.f32 %v3959_v61, %v3958_v47  ;;  %v4121_v61 = vld [vmem:[%s6964_s13 + $0x18] sm:$0xff] }
0x2102   :  { %v3961_v36 = vrot.slane %v3960_v35, 4 }
0x2104   :  { %v3962_v49 = vadd.f32 %v3961_v36, %v3960_v35 }
0x2106   :  { %v3963_v41 = vrot.slane %v3962_v49, 2 }
0x2108   :  { %v3964_v55 = vadd.f32 %v3963_v41, %v3962_v49 }
0x210a   :  { %v3965_v63 = vrot.slane %v3964_v55, 1 }
0x210c   :  { %v3966_v58 = vadd.f32 %v3965_v63, %v3964_v55 }
0x210e   :  { %v3967_v43 = vadd.f32 1e-16, %v3966_v58 }
0x2110   :  { %5619 = vrcp.f32 %v3967_v43 }
0x211a   :  { %v5620_v3 = vpop.eup %5619 }
0x211b   :  { %v3969_v12 = vmul.f32 %v5620_v3, %v3953_v6  ;;  %v3971_v30 = vmul.f32 %v5620_v3, %v3955_v26  ;;  %v3970_v52 = vmul.f32 %v5620_v3, %v3954_v23  ;;  %v4118_v26 = vld [vmem:[%s6964_s13] sm:$0xff] }
0x211c   :  { %v5452_v47 = vpack.c.bf16 %v4119_v44, %v4118_v26  ;;  %v4203_v3 = vld [vmem:[%s5976_s4] sm:$0xff] }
0x211d   :  { %v3972_v60 = vsel %vm3932_vm8, %v3969_v12, -inf  ;;  %v3973_v34 = vsel %vm3932_vm8, %v3970_v52, -inf  ;;  %v3974_v37 = vsel %vm3932_vm8, %v3971_v30, -inf }
0x211e   :  { %v3975_v1 = vmax.f32 %v3972_v60, %v3973_v34  ;;  %v4205_v34 = vld [vmem:[%s5976_s4 + $0x10] sm:$0xff] }
0x2120   :  { %v3976_v38 = vmax.f32 %v3975_v1, %v3974_v37  ;;  %v4206_v1 = vld [vmem:[%s5976_s4 + $0x18] sm:$0xff] }
0x2121   :  { %v5461_v37 = vpack.c.bf16 %v4206_v1, %v4205_v34 }
0x2122   :  { %v3977_v42 = vrot.slane %v3976_v38, 4 }
0x2124   :  { %v3978_v8 = vmax.f32 %v3976_v38, %v3977_v42  ;;  %v4519_v38 = vld [vmem:[%s5971_s19] ss:$0 sm:$0xff] }
0x2126   :  { %v3979_v62 = vrot.slane %v3978_v8, 2 }
0x2128   :  { %v3980_v48 = vmax.f32 %v3978_v8, %v3979_v62 }
0x212a   :  { %v3981_v53 = vrot.slane %v3980_v48, 1 }
0x212c   :  { %v3982_v56 = vmax.f32 %v3980_v48, %v3981_v53  ;;  %v4521_v53 = vld [vmem:[%s5981_s8] ss:$0 sm:$0xff] }
0x212e   :  { %v4516_v11 = vadd.f32 -1e-07, %v3982_v56 }
0x2130   :  { %v3984_v59 = vmin.f32 %v4516_v11, 0.001 }
0x2132   :  { %vm3986_vm10 = vcmp.gt.f32.partialorder %v3970_v52, %v3984_v59  ;;  %vm3985_vm11 = vcmp.gt.f32.partialorder %v3969_v12, %v3984_v59  ;;  %vm3987_vm13 = vcmp.gt.f32.partialorder %v3971_v30, %v3984_v59 }
0x2133   :  { %v3989_v54 = vsel %vm3986_vm10, 1.0, %v5740_v21  ;;  %v3988_v18 = vsel %vm3985_vm11, 1.0, %v5740_v21  ;;  %v3990_v40 = vsel %vm3987_vm13, 1.0, %v5740_v21 }
0x2134   :  { %v3992_v0 = vmul.f32 %v3989_v54, %v6819_v57  ;;  %v3991_v5 = vmul.f32 %v3988_v18, %v6816_v17  ;;  %v3993_v2 = vmul.f32 %v3990_v40, %v6824_v51 }
0x2136   :  { %v4009_v10 = vsel %vm3932_vm8, %v3992_v0, 0.0  ;;  %v4006_v9 = vsel %vm3932_vm8, %v3991_v5, 0.0  ;;  %v3995_v31 = vmul.f32 %v3992_v0, %v3970_v52  ;;  %v4012_v7 = vsel %vm3932_vm8, %v3993_v2, 0.0 }
0x2137   :  { %4010 = vadd.xlane.f32.xlu1 %v4009_v10  ;;  %4007 = vadd.xlane.f32.xlu0 %v4006_v9  ;;  %v3994_v16 = vmul.f32 %v3991_v5, %v3969_v12  ;;  %v3996_v17 = vmul.f32 %v3993_v2, %v3971_v30  ;;  %v4204_v12 = vld [vmem:[%s5976_s4 + $0x8] sm:$0xff] }
0x2138   :  { %v4000_v39 = vsel %vm3932_vm8, %v3995_v31, 0.0  ;;  %v5458_v30 = vpack.c.bf16 %v4204_v12, %v4203_v3 }
0x2139   :  { %v3997_v57 = vsel %vm3932_vm8, %v3994_v16, 0.0  ;;  %v4003_v22 = vsel %vm3932_vm8, %v3996_v17, 0.0 }
0x213b   :  { %4001 = vadd.xlane.f32.xlu1 %v4000_v39  ;;  %4013 = vadd.xlane.f32.xlu0 %v4012_v7 }
0x213f   :  { %3998 = vadd.xlane.f32.xlu0 %v3997_v57 }
0x2143   :  { %4004 = vadd.xlane.f32.xlu0 %v4003_v22 }
0x21c4   :  { %v4011_v28 = vpop.xlane.xlu1 %4010  ;;  %v4008_v25 = vpop.xlane.xlu0 %4007 }
0x21c5   :  { %v4066_v51 = vpack.c.bf16 %v4011_v28, %v4008_v25 }
0x21c7   :  { %5320 = vmatpush3.bf16.msra.mxu0 %v4066_v51 }
0x21c8   :  { %v4014_v20 = vpop.xlane.xlu0 %4013  ;;  %5321 = vmatprep.subr.bf16.mxu0 %v5740_v21  ;;  %v4002_v15 = vpop.xlane.xlu1 %4001 }
0x21c9   :  { %v4067_v14 = vpack.c.bf16 %v4014_v20, %v4014_v20  ;;  %v4016_v33 = vmul.f32 %v4002_v15, %v6803_v19 }
0x21cb   :  { %v4069_v13 = vsel %vm222_vm0, %v4067_v14, 0 }
0x21cc   :  { %5322 = vmatpush3.bf16.msra.mxu0 %v4069_v13  ;;  %v3999_v27 = vpop.xlane.xlu0 %3998 }
0x21cd   :  { %v4015_v24 = vmul.f32 %v3999_v27, %v6797_v32  ;;  %5457 = vmatprep.subr.bf16.mxu0 %v5742_v46 }
0x21cf   :  { %v4018_v6 = vpack.c.bf16 %v4016_v33, %v4015_v24  ;;  %5324 = vmatmul.mubr.msk.bf16.vlgmr.msra.gmra.mrb[132].mxu0 %vm1273_vm12, %v3817_v45 }
0x21d0   :  { %v4005_v29 = vpop.xlane.xlu0 %4004  ;;  %5346 = vmatprep.mubr.msk.f32.mxu0 %vm5741_vm7, %v5740_v21  ;;  %5459 = vmatpush3.bf16.msra.mxu0 %v5458_v30 }
0x21d1   :  { %v4017_v23 = vmul.f32 %v4005_v29, %v6809_v4  ;;  %5312 = vmatpush3.bf16.msra.mxu1 %v4018_v6  ;;  %v5455_v4 = vpack.c.bf16 %v4121_v61, %v4120_v50  ;;  %5460 = vmatprep.subr.bf16.mxu0 %v5742_v46 }
0x21d2   :  { %5313 = vmatprep.subr.bf16.mxu1 %v5740_v21 }
0x21d3   :  { %v4019_v19 = vpack.c.bf16 %v4017_v23, %v4017_v23 }
0x21d4   :  { %5462 = vmatpush3.bf16.msra.mxu0 %v5461_v37 }
0x21d5   :  { %v4024_v32 = vsel %vm222_vm0, %v4019_v19, 0  ;;  %vm4287_vm0 = vcmask 58368  }
0x21d6   :  { %5314 = vmatpush3.bf16.msra.mxu1 %v4024_v32 }
0x21d7   :  { %5451 = vmatprep.subr.bf16.mxu1 %v5742_v46 }
0x21d9   :  { %5316 = vmatmul.mubr.msk.bf16.vlgmr.msra.gmra.mrb[140].mxu1 %vm1273_vm12, %v3817_v45 }
0x21da   :  { %5335 = vmatprep.mubr.msk.f32.mxu1 %vm5741_vm7, %v5740_v21  ;;  %5453 = vmatpush3.bf16.msra.mxu1 %v5452_v47 }
0x21db   :  { %5454 = vmatprep.subr.bf16.mxu1 %v5742_v46 }
0x21de   :  { %5456 = vmatpush3.bf16.msra.mxu1 %v5455_v4 }
0x22a2   :  { %v4105_v35 = vpop.f32.mrb[132].mxu0 }
0x22a3   :  { %5621 = vrcp.f32 %v4105_v35  ;;  %v5325_v36 = vpop.f32.mrb[133].mxu0 }
0x22a4   :  { %v4108_v49 = vpop.f32.mrb[134].mxu0 }
0x22a5   :  { %v5326_v41 = vpop.f32.mrb[135].mxu0 }
0x22ac   :  { %v4060_v21 = vpop.f32.mrb[140].mxu1 }
0x22ad   :  { %v5622_v55 = vpop.eup %5621  ;;  %v5317_v63 = vpop.f32.mrb[141].mxu1 }
0x22ae   :  { %4114 = vperm.xlu1 %5535, %v5622_v55   ;;  %v4063_v58 = vpop.f32.mrb[142].mxu1 }
0x22af   :  { %v5318_v43 = vpop.f32.mrb[143].mxu1 }
0x232d   :  { %v4115_v52 = vpop.permute.xlu1 %4114 }
0x232e   :  { %v4117_v60 = vmul.f32 %v4115_v52, %v4060_v21 }
0x2330   :  { %5336 = vmatmul.mubr.msk.f32.vlgmr.msra.gmra.mrb[144].mxu1 %vm314_vm6, %v4117_v60 }
0x2403   :  { %v4198_v42 = vpop.f32.mrb[144].mxu1 }
0x2404   :  { %v4199_v8 = vadd.f32 %v4519_v38, %v4198_v42  ;;  %v5337_v62 = vpop.f32.mrb[145].mxu1 }
0x2406   :  { %v4202_v48 = vmax.f32 %v4199_v8, 0.0 }
0x2408   :  { %5347 = vmatmul.mubr.msk.f32.vlgmr.msra.gmra.mrb[130].mxu0 %vm314_vm6, %v4202_v48 }
0x24db   :  { %v4283_v56 = vpop.f32.mrb[130].mxu0 }
0x24dc   :  { %v4284_v46 = vadd.f32 %v4521_v53, %v4283_v56  ;;  %v5348_v11 = vpop.f32.mrb[131].mxu0 }
0x24de   :  { %4288 = vst.msk [vmem:[#allocation7] sm:$0x3] %vm4287_vm0, %v4284_v46 }
0x24df   :  { %5677 = shalt.err (!%p5674_p12)
}
0x24e0   :  { %s5678_s19 = scalar_lea.hbm %s5986_s29, 32 }
0x24e1   :  { %p5679_p13 = scmp.ne.s32.totalorder %s5986_s29, %s5678_s19  ;;  %p5682_p0 = scmp.lt.u32.totalorder %s5678_s19, %s5986_s29 }
0x24e3   :  { %p5684_p1 = pnand %p5682_p0, %p5679_p13 }
0x24e5   :  { %5687 = shalt.err (!%p5684_p1)
}
0x24e6   :  { %4298 = dma.vmem_to_hbm [thread:$0]  %s4296_s21, 32, %s5986_s29, [#allocation6]  }
0x24e7   :  { %5690 = dma.done.wait [#allocation6], 32  }
0x24e8   :  { %5691 = vsyncadd [#allocation6], 4294967264 }
0x24e9   :  { %4302 = vsyncpa [#allocation5], 1 }
0x24ea   :  { %4303 = vsyncpa [#allocation6], 1 }

</bundles_post_ra>
